<compile_context>
chip_gen: v7x
topology: tpu7x:2x2x1
jax: 0.10.0
libtpu: 0.0.40
codegen_flags: <defaults>
</compile_context>

<pallas_src>
import math

import numpy as np

import jax
import jax.numpy as jnp
from jax.experimental import pallas as pl
from jax.experimental.pallas import tpu as pltpu

NUMBER_CHANNELS = 2        # input light-curve channels
NUMBER_OF_CLASSES = 15     # PLAsTiCC classes
META_FEATURES = 8          # 50 + 8 = 58 = fc4 in_features

H0, W0 = 48, 10            # input spatial dims -> conv stack -> (12, 6, 3) = 216

NEG_SLOPE = 0.01           # F.leaky_relu default
BN_EPS = 1e-5              # nn.BatchNorm1d default

CONV_CH = (NUMBER_CHANNELS, 36, 60, 12)


def _conv_geom(h, w):
    # kernel (4,2), stride (2,2), padding 1, with even h and even w
    return h // 2, w // 2 + 1


# ---------------------------------------------------------------------------
# Deterministic parameter init (PyTorch-default-style uniform(+-1/sqrt(fan_in)))
# ---------------------------------------------------------------------------

def _init_linear(key, fan_in, fan_out):
    k1, k2 = jax.random.split(key)
    bound = 1.0 / math.sqrt(fan_in)
    w = jax.random.uniform(k1, (fan_in, fan_out), jnp.float32, -bound, bound)
    b = jax.random.uniform(k2, (fan_out,), jnp.float32, -bound, bound)
    return w, b


def _init_conv(key, cout, cin, kh, kw):
    k1, k2 = jax.random.split(key)
    fan_in = cin * kh * kw
    bound = 1.0 / math.sqrt(fan_in)
    w = jax.random.uniform(k1, (cout, cin, kh, kw), jnp.float32, -bound, bound)
    b = jax.random.uniform(k2, (cout,), jnp.float32, -bound, bound)
    return w, b


def init_net2_params(key):
    keys = jax.random.split(key, 10)
    p = {}
    p['conv1_w'], p['conv1_b'] = _init_conv(keys[0], 36, NUMBER_CHANNELS, 4, 2)
    p['conv2_w'], p['conv2_b'] = _init_conv(keys[1], 60, 36, 4, 2)
    p['conv3_w'], p['conv3_b'] = _init_conv(keys[2], 12, 60, 4, 2)
    p['fc1_w'], p['fc1_b'] = _init_linear(keys[3], 216, 100)
    p['fc2_w'], p['fc2_b'] = _init_linear(keys[4], 100, 50)
    p['fc3_w'], p['fc3_b'] = _init_linear(keys[5], 50, 50)
    p['fc4_w'], p['fc4_b'] = _init_linear(keys[6], 58, 200)
    p['fc5_w'], p['fc5_b'] = _init_linear(keys[7], 200, 100)
    p['fc6_w'], p['fc6_b'] = _init_linear(keys[8], 100, 50)
    p['fc7_w'], p['fc7_b'] = _init_linear(keys[9], 50, NUMBER_OF_CLASSES)
    # BatchNorm1d defaults: gamma = 1, beta = 0
    for name, feats in (('bn1', 100), ('bn2', 50), ('bn3', 50), ('bn5', 100), ('bn6', 50)):
        p[f'{name}_g'] = jnp.ones((feats,), jnp.float32)
        p[f'{name}_b'] = jnp.zeros((feats,), jnp.float32)
    return p


# ---------------------------------------------------------------------------
# Host-side (init-time) constant builders: fold conv taps / stride / padding /
# flatten order / batch padding into small dense matrices so the kernel body
# only ever does 2-D matmuls, adds, leaky_relu, BN reductions and softmax.
# ---------------------------------------------------------------------------

def _make_s_stack(n, ho, h_prev):
    """(4*n*ho, n*h_prev) row-selection: row (kh, b, r) picks input row 2r+kh-1."""
    s = np.zeros((4, n * ho, n * h_prev), np.float32)
    for kh in range(4):
        for b in range(n):
            for r in range(ho):
                h = 2 * r + kh - 1               # padding=1 on H
                if 0 <= h < h_prev:
                    s[kh, b * ho + r, b * h_prev + h] = 1.0
    return s.reshape(4 * n * ho, n * h_prev)


def _make_v_stack(w_conv, w_prev):
    """(4, w_prev*cin, wo*cout): per-H-tap weight, W taps/stride/pad folded in."""
    cout, cin, _, _ = w_conv.shape
    wo = w_prev // 2 + 1
    v = np.zeros((4, w_prev * cin, wo * cout), np.float32)
    for kh in range(4):
        for j in range(wo):
            for kw in range(2):
                w = 2 * j + kw - 1               # padding=1 on W
                if 0 <= w < w_prev:
                    v[kh, w * cin:(w + 1) * cin, j * cout:(j + 1) * cout] = (
                        w_conv[:, :, kh, kw].T)  # (cin, cout) = W[o, c, kh, kw]
    return v


def _make_rbig(n, mp, ho3):
    """(ho3*mp, n*ho3): gathers conv3 rows per spatial row r, batch-padded to mp."""
    r = np.zeros((ho3 * mp, n * ho3), np.float32)
    for rr in range(ho3):
        for m in range(n):
            r[rr * mp + m, m * ho3 + rr] = 1.0
    return r


def _make_w1_blocks(w1, ho3, wo3, c3):
    """fc1 weight split into per-spatial-row blocks with the NCHW .view order."""
    out_dim = w1.shape[1]
    blk = np.zeros((ho3, wo3 * c3, out_dim), np.float32)
    for r in range(ho3):
        for j in range(wo3):
            for o in range(c3):
                blk[r, j * c3 + o, :] = w1[o * ho3 * wo3 + r * wo3 + j, :]
    return blk


def build_net2_constants(params, batch):
    n = batch
    mp = max(8, -(-n // 8) * 8)                 # batch rows padded to sublane tile
    _, c1, c2, c3 = CONV_CH
    ho1, wo1 = _conv_geom(H0, W0)               # 24, 6
    ho2, wo2 = _conv_geom(ho1, wo1)             # 12, 4
    ho3, wo3 = _conv_geom(ho2, wo2)             # 6, 3

    p = {k: np.asarray(v, np.float32) for k, v in params.items()}

    # --- all (1, F) rows (conv/fc biases, BN gamma/beta) in one f32 slab ----
    vec_rows = [
        ('cb1', np.tile(p['conv1_b'], wo1)),    # col j*cout + o -> b[o]
        ('cb2', np.tile(p['conv2_b'], wo2)),
        ('cb3', np.tile(p['conv3_b'], wo3)),
        ('fb1', p['fc1_b']), ('g1', p['bn1_g']), ('t1', p['bn1_b']),
        ('fb2', p['fc2_b']), ('g2', p['bn2_g']), ('t2', p['bn2_b']),
        ('fb3', p['fc3_b']), ('g3', p['bn3_g']), ('t3', p['bn3_b']),
        ('fb4', p['fc4_b']),
        ('fb5', p['fc5_b']), ('g5', p['bn5_g']), ('t5', p['bn5_b']),
        ('fb6', p['fc6_b']), ('g6', p['bn6_g']), ('t6', p['bn6_b']),
        ('fb7', p['fc7_b']),
    ]
    vwidth = max(v.shape[0] for _, v in vec_rows)
    vec_slab = np.zeros((len(vec_rows), vwidth), np.float32)
    vec_idx = {}
    for i, (name, v) in enumerate(vec_rows):
        vec_slab[i, :v.shape[0]] = v
        vec_idx[name] = (i, v.shape[0])

    # --- fc2..fc7 weights packed row-wise, starts aligned to the bf16 (16,128)
    #     sublane tile so every in-kernel slice begins on a tile boundary ------
    fc_parts = [p['fc2_w'], p['fc3_w'],
                p['fc4_w'][:50, :], p['fc4_w'][50:, :],     # concat folded into split fc4
                p['fc5_w'], p['fc6_w'], p['fc7_w']]
    fwidth = max(q.shape[1] for q in fc_parts)
    fc_offs, off = [], 0
    for q in fc_parts:
        fc_offs.append(off)
        off = -(-(off + q.shape[0]) // 16) * 16
    fc_slab = np.zeros((off, fwidth), np.float32)
    for q, o in zip(fc_parts, fc_offs):
        fc_slab[o:o + q.shape[0], :q.shape[1]] = q
    fc_shapes = [q.shape for q in fc_parts]

    bf = jnp.bfloat16   # matmul constants stored bf16 (S matrices 0/1 -> exact)

    vmem_consts = dict(                         # needed immediately (conv1 / flatten)
        s1=jnp.asarray(_make_s_stack(n, ho1, H0), bf),
        v1=jnp.asarray(_make_v_stack(p['conv1_w'], W0), bf),
        vec=jnp.asarray(vec_slab, jnp.float32),
        rbig=jnp.asarray(_make_rbig(n, mp, ho3), bf),
    )
    hbm_consts = dict(                          # deferred: async-copied behind compute
        s2=jnp.asarray(_make_s_stack(n, ho2, ho1), bf),
        v2=jnp.asarray(_make_v_stack(p['conv2_w'], wo1), bf),
        s3=jnp.asarray(_make_s_stack(n, ho3, ho2), bf),
        v3=jnp.asarray(_make_v_stack(p['conv3_w'], wo2), bf),
        w1b=jnp.asarray(_make_w1_blocks(p['fc1_w'], ho3, wo3, c3), bf),
        fcs=jnp.asarray(fc_slab, bf),
    )
    geom = dict(mp=mp, rows=(n * ho1, n * ho2, n * ho3), ho3=ho3,
                vec_idx=vec_idx, fc_offs=fc_offs, fc_shapes=fc_shapes)
    return vmem_consts, hbm_consts, geom


# ---------------------------------------------------------------------------
# The single fused Pallas kernel + wrapper
# ---------------------------------------------------------------------------

def make_net2_forward(params, batch):
    vc, hc, geom = build_net2_constants(params, batch)
    n = batch
    mp = geom['mp']
    rows1, rows2, rows3 = geom['rows']
    ho3 = geom['ho3']
    vec_idx = geom['vec_idx']
    fc_offs = geom['fc_offs']
    fc_shapes = geom['fc_shapes']

    def kernel(a0_ref, meta_ref, s1_ref, v1_ref, vec_ref, rbig_ref,
               s2_hbm, v2_hbm, s3_hbm, v3_hbm, w1b_hbm, fc_hbm,
               o_ref,
               s2_v, v2_v, s3_v, v3_v, w1b_v, fc_v, dsem):

        # Kick off every deferred HBM->VMEM constant copy up front so it
        # overlaps with conv1 (which only touches VMEM-resident operands);
        # each .wait() sits right before that stage's first use.
        copies = [
            pltpu.make_async_copy(s2_hbm, s2_v, dsem.at[0]),
            pltpu.make_async_copy(v2_hbm, v2_v, dsem.at[1]),
            pltpu.make_async_copy(s3_hbm, s3_v, dsem.at[2]),
            pltpu.make_async_copy(v3_hbm, v3_v, dsem.at[3]),
            pltpu.make_async_copy(w1b_hbm, w1b_v, dsem.at[4]),
            pltpu.make_async_copy(fc_hbm, fc_v, dsem.at[5]),
        ]
        for cp in copies:
            cp.start()

        def mm(a, b):
            # bf16-stored constants are cast at the matmul; math stays f32.
            return jnp.dot(a.astype(jnp.float32), b.astype(jnp.float32),
                           preferred_element_type=jnp.float32)

        def lrelu(y):
            return jnp.maximum(y, NEG_SLOPE * y)   # single max instead of cmp+select

        def vrow(name):
            r, w = vec_idx[name]
            return vec_ref[r:r + 1, 0:w]            # (1, F) slice of the packed slab

        def fcw(i):
            r0 = fc_offs[i]
            rr, cc = fc_shapes[i]
            return fc_v[r0:r0 + rr, 0:cc]            # 16-row-aligned bf16 slice

        def conv(a_prev, s_ref, v_ref, bias, rows_out):
            # conv(4,2)/stride(2,2)/pad 1 as  sum_kh (S_kh @ A_prev) @ V_kh + bias
            u = mm(s_ref[...], a_prev)              # (4*rows_out, Wp*Cp)
            acc = mm(u[0:rows_out, :], v_ref[0])
            for kh in range(1, 4):
                acc = acc + mm(u[kh * rows_out:(kh + 1) * rows_out, :], v_ref[kh])
            return lrelu(acc + bias)

        a1 = conv(a0_ref[...], s1_ref, v1_ref, vrow('cb1'), rows1)   # (N*24, 6*36)
        copies[0].wait()
        copies[1].wait()
        a2 = conv(a1, s2_v, v2_v, vrow('cb2'), rows2)                # (N*12, 4*60)
        copies[2].wait()
        copies[3].wait()
        a3 = conv(a2, s3_v, v3_v, vrow('cb3'), rows3)                # (N*6,  3*12)

        # flatten + fc1 (batch padded to an 8-row sublane tile, pad rows are 0;
        # PyTorch NCHW .view order is folded into the fc1 weight blocks)
        copies[4].wait()
        xg = mm(rbig_ref[...], a3)                                   # (6*Mp, 36)
        y = mm(xg[0:mp, :], w1b_v[0])
        for r in range(1, ho3):
            y = y + mm(xg[r * mp:(r + 1) * mp, :], w1b_v[r])
        y = y + vrow('fb1')                                          # (Mp, 100)

        row_mask = (jax.lax.broadcasted_iota(jnp.int32, (mp, 1), 0)
                    < n).astype(jnp.float32)
        inv_n = 1.0 / n

        def bn(z, gname, tname):
            # nn.BatchNorm1d training mode over the N real rows, single pass:
            # sum(z) and sum(z^2) are independent; var = E[z^2] - mean^2
            # (clamped >= 0 for f32 cancellation safety).
            zm = z * row_mask
            s = jnp.sum(zm, axis=0, keepdims=True)
            sq = jnp.sum(zm * z, axis=0, keepdims=True)
            mean = s * inv_n
            var = jnp.maximum(sq * inv_n - mean * mean, 0.0)
            return ((z - mean) * jax.lax.rsqrt(var + BN_EPS)
                    * vrow(gname) + vrow(tname))

        x = bn(lrelu(y), 'g1', 't1')
        copies[5].wait()
        x = bn(lrelu(mm(x, fcw(0)) + vrow('fb2')), 'g2', 't2')
        x = bn(lrelu(mm(x, fcw(1)) + vrow('fb3')), 'g3', 't3')
        # torch.cat((x, metadata), 1) @ W4  ==  x @ W4[:50] + metadata @ W4[50:]
        x = lrelu(mm(x, fcw(2)) + mm(meta_ref[...], fcw(3)) + vrow('fb4'))
        x = bn(lrelu(mm(x, fcw(4)) + vrow('fb5')), 'g5', 't5')
        x = bn(lrelu(mm(x, fcw(5)) + vrow('fb6')), 'g6', 't6')

        logits = mm(x, fcw(6)) + vrow('fb7')                         # (Mp, 15)
        mx = jnp.max(logits, axis=1, keepdims=True)
        e = jnp.exp(logits - mx)
        probs = e / jnp.sum(e, axis=1, keepdims=True)                # exact softmax
        o_ref[...] = probs[0:n, :]                                   # drop pad rows

    vmem_spec = pl.BlockSpec(memory_space=pltpu.MemorySpace.VMEM)
    hbm_spec = pl.BlockSpec(memory_space=pl.ANY)

    fused = pl.pallas_call(
        kernel,
        out_shape=jax.ShapeDtypeStruct((n, NUMBER_OF_CLASSES), jnp.float32),
        in_specs=[vmem_spec] * 6 + [hbm_spec] * 6,
        out_specs=vmem_spec,
        scratch_shapes=[
            pltpu.VMEM(hc['s2'].shape, jnp.bfloat16),
            pltpu.VMEM(hc['v2'].shape, jnp.bfloat16),
            pltpu.VMEM(hc['s3'].shape, jnp.bfloat16),
            pltpu.VMEM(hc['v3'].shape, jnp.bfloat16),
            pltpu.VMEM(hc['w1b'].shape, jnp.bfloat16),
            pltpu.VMEM(hc['fcs'].shape, jnp.bfloat16),
            pltpu.SemaphoreType.DMA((6,)),
        ],
    )

    @jax.jit
    def forward(input_data_values, metadata_feature):
        # Only per-forward host work: NCHW -> "(n,h) x (w,c)" 2-D layout and
        # zero-padding the metadata rows up to the sublane tile (replaces the
        # old in-kernel pad-matrix matmul).
        a0 = jnp.transpose(input_data_values, (0, 2, 3, 1)).reshape(
            n * H0, W0 * NUMBER_CHANNELS).astype(jnp.float32)
        meta_p = jnp.pad(metadata_feature.astype(jnp.float32),
                         ((0, mp - n), (0, 0)))
        return fused(a0, meta_p, vc['s1'], vc['v1'], vc['vec'], vc['rbig'],
                     hc['s2'], hc['v2'], hc['s3'], hc['v3'], hc['w1b'], hc['fcs'])

    return forward


if __name__ == "__main__":
    key = jax.random.PRNGKey(0)
    k_params, k_x, k_meta = jax.random.split(key, 3)

    params = init_net2_params(k_params)

    # (N, NUMBER_CHANNELS, 48, 10) -> conv stack -> (N, 12, 6, 3) -> 216 flat.
    batch = 4
    x = jax.random.normal(k_x, (batch, NUMBER_CHANNELS, H0, W0), jnp.float32)
    meta = jax.random.normal(k_meta, (batch, META_FEATURES), jnp.float32)

    net2_forward = make_net2_forward(params, batch)
    out = jax.block_until_ready(net2_forward(x, meta))

    assert out.shape == (batch, NUMBER_OF_CLASSES), out.shape
    assert bool(jnp.all(jnp.isfinite(out)))
    # Softmax rows sum to 1 (exact division now, so tight tolerance).
    assert bool(jnp.allclose(jnp.sum(out, axis=1), 1.0, atol=1e-4))
    print("KERNEL_OK")
</pallas_src>

<mosaic_0001>
module attributes {stable_mosaic.version = 11 : i64} {
  func.func @kernel(%arg0: memref<192x20xf32, #tpu.memory_space<vmem>>, %arg1: memref<8x8xf32, #tpu.memory_space<vmem>>, %arg2: memref<384x192xbf16, #tpu.memory_space<vmem>>, %arg3: memref<4x20x216xbf16, #tpu.memory_space<vmem>>, %arg4: memref<20x240xf32, #tpu.memory_space<vmem>>, %arg5: memref<48x24xbf16, #tpu.memory_space<vmem>>, %arg6: memref<192x96xbf16, #tpu.memory_space<any>>, %arg7: memref<4x216x240xbf16, #tpu.memory_space<any>>, %arg8: memref<96x48xbf16, #tpu.memory_space<any>>, %arg9: memref<4x240x36xbf16, #tpu.memory_space<any>>, %arg10: memref<6x36x100xbf16, #tpu.memory_space<any>>, %arg11: memref<640x200xbf16, #tpu.memory_space<any>>, %arg12: memref<4x15xf32, #tpu.memory_space<vmem>>, %arg13: memref<192x96xbf16, #tpu.memory_space<vmem>>, %arg14: memref<4x216x240xbf16, #tpu.memory_space<vmem>>, %arg15: memref<96x48xbf16, #tpu.memory_space<vmem>>, %arg16: memref<4x240x36xbf16, #tpu.memory_space<vmem>>, %arg17: memref<6x36x100xbf16, #tpu.memory_space<vmem>>, %arg18: memref<640x200xbf16, #tpu.memory_space<vmem>>, %arg19: memref<6x!tpu.dma_semaphore, #tpu.memory_space<semaphore_mem>>) attributes {dimension_semantics = [], scalar_prefetch = 0 : i64, scratch_operands = 7 : i64, tpu.core_type = #tpu.core_type<tc>} {
    %c0_i32 = arith.constant 0 : i32
    %0 = tpu.memref_slice %arg19[%c0_i32] : memref<6x!tpu.dma_semaphore, #tpu.memory_space<semaphore_mem>> -> memref<1x!tpu.dma_semaphore, #tpu.memory_space<semaphore_mem>>
    %1 = tpu.memref_squeeze %0 : memref<1x!tpu.dma_semaphore, #tpu.memory_space<semaphore_mem>> -> memref<!tpu.dma_semaphore, #tpu.memory_space<semaphore_mem>>
    tpu.enqueue_dma source(%arg6 : memref<192x96xbf16, #tpu.memory_space<any>>) target(%arg13 : memref<192x96xbf16, #tpu.memory_space<vmem>>) target_semaphore(%1 : memref<!tpu.dma_semaphore, #tpu.memory_space<semaphore_mem>>)
    %c1_i32 = arith.constant 1 : i32
    %2 = tpu.memref_slice %arg19[%c1_i32] : memref<6x!tpu.dma_semaphore, #tpu.memory_space<semaphore_mem>> -> memref<1x!tpu.dma_semaphore, #tpu.memory_space<semaphore_mem>>
    %3 = tpu.memref_squeeze %2 : memref<1x!tpu.dma_semaphore, #tpu.memory_space<semaphore_mem>> -> memref<!tpu.dma_semaphore, #tpu.memory_space<semaphore_mem>>
    tpu.enqueue_dma source(%arg7 : memref<4x216x240xbf16, #tpu.memory_space<any>>) target(%arg14 : memref<4x216x240xbf16, #tpu.memory_space<vmem>>) target_semaphore(%3 : memref<!tpu.dma_semaphore, #tpu.memory_space<semaphore_mem>>)
    %c2_i32 = arith.constant 2 : i32
    %4 = tpu.memref_slice %arg19[%c2_i32] : memref<6x!tpu.dma_semaphore, #tpu.memory_space<semaphore_mem>> -> memref<1x!tpu.dma_semaphore, #tpu.memory_space<semaphore_mem>>
    %5 = tpu.memref_squeeze %4 : memref<1x!tpu.dma_semaphore, #tpu.memory_space<semaphore_mem>> -> memref<!tpu.dma_semaphore, #tpu.memory_space<semaphore_mem>>
    tpu.enqueue_dma source(%arg8 : memref<96x48xbf16, #tpu.memory_space<any>>) target(%arg15 : memref<96x48xbf16, #tpu.memory_space<vmem>>) target_semaphore(%5 : memref<!tpu.dma_semaphore, #tpu.memory_space<semaphore_mem>>)
    %c3_i32 = arith.constant 3 : i32
    %6 = tpu.memref_slice %arg19[%c3_i32] : memref<6x!tpu.dma_semaphore, #tpu.memory_space<semaphore_mem>> -> memref<1x!tpu.dma_semaphore, #tpu.memory_space<semaphore_mem>>
    %7 = tpu.memref_squeeze %6 : memref<1x!tpu.dma_semaphore, #tpu.memory_space<semaphore_mem>> -> memref<!tpu.dma_semaphore, #tpu.memory_space<semaphore_mem>>
    tpu.enqueue_dma source(%arg9 : memref<4x240x36xbf16, #tpu.memory_space<any>>) target(%arg16 : memref<4x240x36xbf16, #tpu.memory_space<vmem>>) target_semaphore(%7 : memref<!tpu.dma_semaphore, #tpu.memory_space<semaphore_mem>>)
    %c4_i32 = arith.constant 4 : i32
    %8 = tpu.memref_slice %arg19[%c4_i32] : memref<6x!tpu.dma_semaphore, #tpu.memory_space<semaphore_mem>> -> memref<1x!tpu.dma_semaphore, #tpu.memory_space<semaphore_mem>>
    %9 = tpu.memref_squeeze %8 : memref<1x!tpu.dma_semaphore, #tpu.memory_space<semaphore_mem>> -> memref<!tpu.dma_semaphore, #tpu.memory_space<semaphore_mem>>
    tpu.enqueue_dma source(%arg10 : memref<6x36x100xbf16, #tpu.memory_space<any>>) target(%arg17 : memref<6x36x100xbf16, #tpu.memory_space<vmem>>) target_semaphore(%9 : memref<!tpu.dma_semaphore, #tpu.memory_space<semaphore_mem>>)
    %c5_i32 = arith.constant 5 : i32
    %10 = tpu.memref_slice %arg19[%c5_i32] : memref<6x!tpu.dma_semaphore, #tpu.memory_space<semaphore_mem>> -> memref<1x!tpu.dma_semaphore, #tpu.memory_space<semaphore_mem>>
    %11 = tpu.memref_squeeze %10 : memref<1x!tpu.dma_semaphore, #tpu.memory_space<semaphore_mem>> -> memref<!tpu.dma_semaphore, #tpu.memory_space<semaphore_mem>>
    tpu.enqueue_dma source(%arg11 : memref<640x200xbf16, #tpu.memory_space<any>>) target(%arg18 : memref<640x200xbf16, #tpu.memory_space<vmem>>) target_semaphore(%11 : memref<!tpu.dma_semaphore, #tpu.memory_space<semaphore_mem>>)
    %c0 = arith.constant 0 : index
    %c0_0 = arith.constant 0 : index
    %12 = vector.load %arg0[%c0, %c0_0] : memref<192x20xf32, #tpu.memory_space<vmem>>, vector<192x20xf32>
    %c0_1 = arith.constant 0 : index
    %c0_2 = arith.constant 0 : index
    %13 = vector.load %arg4[%c0_1, %c0_2] : memref<20x240xf32, #tpu.memory_space<vmem>>, vector<1x216xf32>
    %c0_3 = arith.constant 0 : index
    %c0_4 = arith.constant 0 : index
    %14 = vector.load %arg2[%c0_3, %c0_4] : memref<384x192xbf16, #tpu.memory_space<vmem>>, vector<384x192xbf16>
    %15 = arith.extf %14 : vector<384x192xbf16> to vector<384x192xf32>
    %cst = arith.constant dense<0.000000e+00> : vector<384x20xf32>
    %16 = tpu.matmul %15, %12, %cst {dimension_numbers = #tpu.dot_dimension_numbers<[1], [0], [0], [1], [0, 0, 1, 1], [], []>} : vector<384x192xf32>, vector<192x20xf32>, vector<384x20xf32> -> vector<384x20xf32>
    %17 = vector.extract_strided_slice %16 {offsets = [0, 0], sizes = [96, 20], strides = [1, 1]} : vector<384x20xf32> to vector<96x20xf32>
    %c0_5 = arith.constant 0 : index
    %c0_6 = arith.constant 0 : index
    %c0_7 = arith.constant 0 : index
    %18 = vector.load %arg3[%c0_5, %c0_6, %c0_7] : memref<4x20x216xbf16, #tpu.memory_space<vmem>>, vector<1x20x216xbf16>
    %19 = vector.shape_cast %18 : vector<1x20x216xbf16> to vector<20x216xbf16>
    %20 = arith.extf %19 : vector<20x216xbf16> to vector<20x216xf32>
    %cst_8 = arith.constant dense<0.000000e+00> : vector<96x216xf32>
    %21 = tpu.matmul %17, %20, %cst_8 {dimension_numbers = #tpu.dot_dimension_numbers<[1], [0], [0], [1], [0, 0, 1, 1], [], []>} : vector<96x20xf32>, vector<20x216xf32>, vector<96x216xf32> -> vector<96x216xf32>
    %22 = vector.extract_strided_slice %16 {offsets = [96, 0], sizes = [96, 20], strides = [1, 1]} : vector<384x20xf32> to vector<96x20xf32>
    %c1 = arith.constant 1 : index
    %c0_9 = arith.constant 0 : index
    %c0_10 = arith.constant 0 : index
    %23 = vector.load %arg3[%c1, %c0_9, %c0_10] : memref<4x20x216xbf16, #tpu.memory_space<vmem>>, vector<1x20x216xbf16>
    %24 = vector.shape_cast %23 : vector<1x20x216xbf16> to vector<20x216xbf16>
    %25 = arith.extf %24 : vector<20x216xbf16> to vector<20x216xf32>
    %cst_11 = arith.constant dense<0.000000e+00> : vector<96x216xf32>
    %26 = tpu.matmul %22, %25, %cst_11 {dimension_numbers = #tpu.dot_dimension_numbers<[1], [0], [0], [1], [0, 0, 1, 1], [], []>} : vector<96x20xf32>, vector<20x216xf32>, vector<96x216xf32> -> vector<96x216xf32>
    %27 = arith.addf %21, %26 : vector<96x216xf32>
    %28 = vector.extract_strided_slice %16 {offsets = [192, 0], sizes = [96, 20], strides = [1, 1]} : vector<384x20xf32> to vector<96x20xf32>
    %c2 = arith.constant 2 : index
    %c0_12 = arith.constant 0 : index
    %c0_13 = arith.constant 0 : index
    %29 = vector.load %arg3[%c2, %c0_12, %c0_13] : memref<4x20x216xbf16, #tpu.memory_space<vmem>>, vector<1x20x216xbf16>
    %30 = vector.shape_cast %29 : vector<1x20x216xbf16> to vector<20x216xbf16>
    %31 = arith.extf %30 : vector<20x216xbf16> to vector<20x216xf32>
    %cst_14 = arith.constant dense<0.000000e+00> : vector<96x216xf32>
    %32 = tpu.matmul %28, %31, %cst_14 {dimension_numbers = #tpu.dot_dimension_numbers<[1], [0], [0], [1], [0, 0, 1, 1], [], []>} : vector<96x20xf32>, vector<20x216xf32>, vector<96x216xf32> -> vector<96x216xf32>
    %33 = arith.addf %27, %32 : vector<96x216xf32>
    %34 = vector.extract_strided_slice %16 {offsets = [288, 0], sizes = [96, 20], strides = [1, 1]} : vector<384x20xf32> to vector<96x20xf32>
    %c3 = arith.constant 3 : index
    %c0_15 = arith.constant 0 : index
    %c0_16 = arith.constant 0 : index
    %35 = vector.load %arg3[%c3, %c0_15, %c0_16] : memref<4x20x216xbf16, #tpu.memory_space<vmem>>, vector<1x20x216xbf16>
    %36 = vector.shape_cast %35 : vector<1x20x216xbf16> to vector<20x216xbf16>
    %37 = arith.extf %36 : vector<20x216xbf16> to vector<20x216xf32>
    %cst_17 = arith.constant dense<0.000000e+00> : vector<96x216xf32>
    %38 = tpu.matmul %34, %37, %cst_17 {dimension_numbers = #tpu.dot_dimension_numbers<[1], [0], [0], [1], [0, 0, 1, 1], [], []>} : vector<96x20xf32>, vector<20x216xf32>, vector<96x216xf32> -> vector<96x216xf32>
    %39 = arith.addf %33, %38 : vector<96x216xf32>
    %40 = vector.broadcast %13 : vector<1x216xf32> to vector<96x216xf32>
    %41 = arith.addf %39, %40 : vector<96x216xf32>
    %cst_18 = arith.constant 0.00999999977 : f32
    %42 = vector.broadcast %cst_18 : f32 to vector<96x216xf32>
    %43 = arith.mulf %42, %41 : vector<96x216xf32>
    %44 = arith.maximumf %41, %43 : vector<96x216xf32>
    %c0_i32_19 = arith.constant 0 : i32
    %45 = tpu.memref_slice %arg19[%c0_i32_19] : memref<6x!tpu.dma_semaphore, #tpu.memory_space<semaphore_mem>> -> memref<1x!tpu.dma_semaphore, #tpu.memory_space<semaphore_mem>>
    %46 = tpu.memref_squeeze %45 : memref<1x!tpu.dma_semaphore, #tpu.memory_space<semaphore_mem>> -> memref<!tpu.dma_semaphore, #tpu.memory_space<semaphore_mem>>
    tpu.wait_dma2 semaphore(%46 : memref<!tpu.dma_semaphore, #tpu.memory_space<semaphore_mem>>) src(%arg6 : memref<192x96xbf16, #tpu.memory_space<any>>) dst(%arg13 : memref<192x96xbf16, #tpu.memory_space<vmem>>)
    %c1_i32_20 = arith.constant 1 : i32
    %47 = tpu.memref_slice %arg19[%c1_i32_20] : memref<6x!tpu.dma_semaphore, #tpu.memory_space<semaphore_mem>> -> memref<1x!tpu.dma_semaphore, #tpu.memory_space<semaphore_mem>>
    %48 = tpu.memref_squeeze %47 : memref<1x!tpu.dma_semaphore, #tpu.memory_space<semaphore_mem>> -> memref<!tpu.dma_semaphore, #tpu.memory_space<semaphore_mem>>
    tpu.wait_dma2 semaphore(%48 : memref<!tpu.dma_semaphore, #tpu.memory_space<semaphore_mem>>) src(%arg7 : memref<4x216x240xbf16, #tpu.memory_space<any>>) dst(%arg14 : memref<4x216x240xbf16, #tpu.memory_space<vmem>>)
    %c1_21 = arith.constant 1 : index
    %c0_22 = arith.constant 0 : index
    %49 = vector.load %arg4[%c1_21, %c0_22] : memref<20x240xf32, #tpu.memory_space<vmem>>, vector<1x240xf32>
    %c0_23 = arith.constant 0 : index
    %c0_24 = arith.constant 0 : index
    %50 = vector.load %arg13[%c0_23, %c0_24] : memref<192x96xbf16, #tpu.memory_space<vmem>>, vector<192x96xbf16>
    %51 = arith.extf %50 : vector<192x96xbf16> to vector<192x96xf32>
    %cst_25 = arith.constant dense<0.000000e+00> : vector<192x216xf32>
    %52 = tpu.matmul %51, %44, %cst_25 {dimension_numbers = #tpu.dot_dimension_numbers<[1], [0], [0], [1], [0, 0, 1, 1], [], []>} : vector<192x96xf32>, vector<96x216xf32>, vector<192x216xf32> -> vector<192x216xf32>
    %53 = vector.extract_strided_slice %52 {offsets = [0, 0], sizes = [48, 216], strides = [1, 1]} : vector<192x216xf32> to vector<48x216xf32>
    %c0_26 = arith.constant 0 : index
    %c0_27 = arith.constant 0 : index
    %c0_28 = arith.constant 0 : index
    %54 = vector.load %arg14[%c0_26, %c0_27, %c0_28] : memref<4x216x240xbf16, #tpu.memory_space<vmem>>, vector<1x216x240xbf16>
    %55 = vector.shape_cast %54 : vector<1x216x240xbf16> to vector<216x240xbf16>
    %56 = arith.extf %55 : vector<216x240xbf16> to vector<216x240xf32>
    %cst_29 = arith.constant dense<0.000000e+00> : vector<48x240xf32>
    %57 = tpu.matmul %53, %56, %cst_29 {dimension_numbers = #tpu.dot_dimension_numbers<[1], [0], [0], [1], [0, 0, 1, 1], [], []>} : vector<48x216xf32>, vector<216x240xf32>, vector<48x240xf32> -> vector<48x240xf32>
    %58 = vector.extract_strided_slice %52 {offsets = [48, 0], sizes = [48, 216], strides = [1, 1]} : vector<192x216xf32> to vector<48x216xf32>
    %c1_30 = arith.constant 1 : index
    %c0_31 = arith.constant 0 : index
    %c0_32 = arith.constant 0 : index
    %59 = vector.load %arg14[%c1_30, %c0_31, %c0_32] : memref<4x216x240xbf16, #tpu.memory_space<vmem>>, vector<1x216x240xbf16>
    %60 = vector.shape_cast %59 : vector<1x216x240xbf16> to vector<216x240xbf16>
    %61 = arith.extf %60 : vector<216x240xbf16> to vector<216x240xf32>
    %cst_33 = arith.constant dense<0.000000e+00> : vector<48x240xf32>
    %62 = tpu.matmul %58, %61, %cst_33 {dimension_numbers = #tpu.dot_dimension_numbers<[1], [0], [0], [1], [0, 0, 1, 1], [], []>} : vector<48x216xf32>, vector<216x240xf32>, vector<48x240xf32> -> vector<48x240xf32>
    %63 = arith.addf %57, %62 : vector<48x240xf32>
    %64 = vector.extract_strided_slice %52 {offsets = [96, 0], sizes = [48, 216], strides = [1, 1]} : vector<192x216xf32> to vector<48x216xf32>
    %c2_34 = arith.constant 2 : index
    %c0_35 = arith.constant 0 : index
    %c0_36 = arith.constant 0 : index
    %65 = vector.load %arg14[%c2_34, %c0_35, %c0_36] : memref<4x216x240xbf16, #tpu.memory_space<vmem>>, vector<1x216x240xbf16>
    %66 = vector.shape_cast %65 : vector<1x216x240xbf16> to vector<216x240xbf16>
    %67 = arith.extf %66 : vector<216x240xbf16> to vector<216x240xf32>
    %cst_37 = arith.constant dense<0.000000e+00> : vector<48x240xf32>
    %68 = tpu.matmul %64, %67, %cst_37 {dimension_numbers = #tpu.dot_dimension_numbers<[1], [0], [0], [1], [0, 0, 1, 1], [], []>} : vector<48x216xf32>, vector<216x240xf32>, vector<48x240xf32> -> vector<48x240xf32>
    %69 = arith.addf %63, %68 : vector<48x240xf32>
    %70 = vector.extract_strided_slice %52 {offsets = [144, 0], sizes = [48, 216], strides = [1, 1]} : vector<192x216xf32> to vector<48x216xf32>
    %c3_38 = arith.constant 3 : index
    %c0_39 = arith.constant 0 : index
    %c0_40 = arith.constant 0 : index
    %71 = vector.load %arg14[%c3_38, %c0_39, %c0_40] : memref<4x216x240xbf16, #tpu.memory_space<vmem>>, vector<1x216x240xbf16>
    %72 = vector.shape_cast %71 : vector<1x216x240xbf16> to vector<216x240xbf16>
    %73 = arith.extf %72 : vector<216x240xbf16> to vector<216x240xf32>
    %cst_41 = arith.constant dense<0.000000e+00> : vector<48x240xf32>
    %74 = tpu.matmul %70, %73, %cst_41 {dimension_numbers = #tpu.dot_dimension_numbers<[1], [0], [0], [1], [0, 0, 1, 1], [], []>} : vector<48x216xf32>, vector<216x240xf32>, vector<48x240xf32> -> vector<48x240xf32>
    %75 = arith.addf %69, %74 : vector<48x240xf32>
    %76 = vector.broadcast %49 : vector<1x240xf32> to vector<48x240xf32>
    %77 = arith.addf %75, %76 : vector<48x240xf32>
    %cst_42 = arith.constant 0.00999999977 : f32
    %78 = vector.broadcast %cst_42 : f32 to vector<48x240xf32>
    %79 = arith.mulf %78, %77 : vector<48x240xf32>
    %80 = arith.maximumf %77, %79 : vector<48x240xf32>
    %c2_i32_43 = arith.constant 2 : i32
    %81 = tpu.memref_slice %arg19[%c2_i32_43] : memref<6x!tpu.dma_semaphore, #tpu.memory_space<semaphore_mem>> -> memref<1x!tpu.dma_semaphore, #tpu.memory_space<semaphore_mem>>
    %82 = tpu.memref_squeeze %81 : memref<1x!tpu.dma_semaphore, #tpu.memory_space<semaphore_mem>> -> memref<!tpu.dma_semaphore, #tpu.memory_space<semaphore_mem>>
    tpu.wait_dma2 semaphore(%82 : memref<!tpu.dma_semaphore, #tpu.memory_space<semaphore_mem>>) src(%arg8 : memref<96x48xbf16, #tpu.memory_space<any>>) dst(%arg15 : memref<96x48xbf16, #tpu.memory_space<vmem>>)
    %c3_i32_44 = arith.constant 3 : i32
    %83 = tpu.memref_slice %arg19[%c3_i32_44] : memref<6x!tpu.dma_semaphore, #tpu.memory_space<semaphore_mem>> -> memref<1x!tpu.dma_semaphore, #tpu.memory_space<semaphore_mem>>
    %84 = tpu.memref_squeeze %83 : memref<1x!tpu.dma_semaphore, #tpu.memory_space<semaphore_mem>> -> memref<!tpu.dma_semaphore, #tpu.memory_space<semaphore_mem>>
    tpu.wait_dma2 semaphore(%84 : memref<!tpu.dma_semaphore, #tpu.memory_space<semaphore_mem>>) src(%arg9 : memref<4x240x36xbf16, #tpu.memory_space<any>>) dst(%arg16 : memref<4x240x36xbf16, #tpu.memory_space<vmem>>)
    %c2_45 = arith.constant 2 : index
    %c0_46 = arith.constant 0 : index
    %85 = vector.load %arg4[%c2_45, %c0_46] : memref<20x240xf32, #tpu.memory_space<vmem>>, vector<1x36xf32>
    %c0_47 = arith.constant 0 : index
    %c0_48 = arith.constant 0 : index
    %86 = vector.load %arg15[%c0_47, %c0_48] : memref<96x48xbf16, #tpu.memory_space<vmem>>, vector<96x48xbf16>
    %87 = arith.extf %86 : vector<96x48xbf16> to vector<96x48xf32>
    %cst_49 = arith.constant dense<0.000000e+00> : vector<96x240xf32>
    %88 = tpu.matmul %87, %80, %cst_49 {dimension_numbers = #tpu.dot_dimension_numbers<[1], [0], [0], [1], [0, 0, 1, 1], [], []>} : vector<96x48xf32>, vector<48x240xf32>, vector<96x240xf32> -> vector<96x240xf32>
    %89 = vector.extract_strided_slice %88 {offsets = [0, 0], sizes = [24, 240], strides = [1, 1]} : vector<96x240xf32> to vector<24x240xf32>
    %c0_50 = arith.constant 0 : index
    %c0_51 = arith.constant 0 : index
    %c0_52 = arith.constant 0 : index
    %90 = vector.load %arg16[%c0_50, %c0_51, %c0_52] : memref<4x240x36xbf16, #tpu.memory_space<vmem>>, vector<1x240x36xbf16>
    %91 = vector.shape_cast %90 : vector<1x240x36xbf16> to vector<240x36xbf16>
    %92 = arith.extf %91 : vector<240x36xbf16> to vector<240x36xf32>
    %cst_53 = arith.constant dense<0.000000e+00> : vector<24x36xf32>
    %93 = tpu.matmul %89, %92, %cst_53 {dimension_numbers = #tpu.dot_dimension_numbers<[1], [0], [0], [1], [0, 0, 1, 1], [], []>} : vector<24x240xf32>, vector<240x36xf32>, vector<24x36xf32> -> vector<24x36xf32>
    %94 = vector.extract_strided_slice %88 {offsets = [24, 0], sizes = [24, 240], strides = [1, 1]} : vector<96x240xf32> to vector<24x240xf32>
    %c1_54 = arith.constant 1 : index
    %c0_55 = arith.constant 0 : index
    %c0_56 = arith.constant 0 : index
    %95 = vector.load %arg16[%c1_54, %c0_55, %c0_56] : memref<4x240x36xbf16, #tpu.memory_space<vmem>>, vector<1x240x36xbf16>
    %96 = vector.shape_cast %95 : vector<1x240x36xbf16> to vector<240x36xbf16>
    %97 = arith.extf %96 : vector<240x36xbf16> to vector<240x36xf32>
    %cst_57 = arith.constant dense<0.000000e+00> : vector<24x36xf32>
    %98 = tpu.matmul %94, %97, %cst_57 {dimension_numbers = #tpu.dot_dimension_numbers<[1], [0], [0], [1], [0, 0, 1, 1], [], []>} : vector<24x240xf32>, vector<240x36xf32>, vector<24x36xf32> -> vector<24x36xf32>
    %99 = arith.addf %93, %98 : vector<24x36xf32>
    %100 = vector.extract_strided_slice %88 {offsets = [48, 0], sizes = [24, 240], strides = [1, 1]} : vector<96x240xf32> to vector<24x240xf32>
    %c2_58 = arith.constant 2 : index
    %c0_59 = arith.constant 0 : index
    %c0_60 = arith.constant 0 : index
    %101 = vector.load %arg16[%c2_58, %c0_59, %c0_60] : memref<4x240x36xbf16, #tpu.memory_space<vmem>>, vector<1x240x36xbf16>
    %102 = vector.shape_cast %101 : vector<1x240x36xbf16> to vector<240x36xbf16>
    %103 = arith.extf %102 : vector<240x36xbf16> to vector<240x36xf32>
    %cst_61 = arith.constant dense<0.000000e+00> : vector<24x36xf32>
    %104 = tpu.matmul %100, %103, %cst_61 {dimension_numbers = #tpu.dot_dimension_numbers<[1], [0], [0], [1], [0, 0, 1, 1], [], []>} : vector<24x240xf32>, vector<240x36xf32>, vector<24x36xf32> -> vector<24x36xf32>
    %105 = arith.addf %99, %104 : vector<24x36xf32>
    %106 = vector.extract_strided_slice %88 {offsets = [72, 0], sizes = [24, 240], strides = [1, 1]} : vector<96x240xf32> to vector<24x240xf32>
    %c3_62 = arith.constant 3 : index
    %c0_63 = arith.constant 0 : index
    %c0_64 = arith.constant 0 : index
    %107 = vector.load %arg16[%c3_62, %c0_63, %c0_64] : memref<4x240x36xbf16, #tpu.memory_space<vmem>>, vector<1x240x36xbf16>
    %108 = vector.shape_cast %107 : vector<1x240x36xbf16> to vector<240x36xbf16>
    %109 = arith.extf %108 : vector<240x36xbf16> to vector<240x36xf32>
    %cst_65 = arith.constant dense<0.000000e+00> : vector<24x36xf32>
    %110 = tpu.matmul %106, %109, %cst_65 {dimension_numbers = #tpu.dot_dimension_numbers<[1], [0], [0], [1], [0, 0, 1, 1], [], []>} : vector<24x240xf32>, vector<240x36xf32>, vector<24x36xf32> -> vector<24x36xf32>
    %111 = arith.addf %105, %110 : vector<24x36xf32>
    %112 = vector.broadcast %85 : vector<1x36xf32> to vector<24x36xf32>
    %113 = arith.addf %111, %112 : vector<24x36xf32>
    %cst_66 = arith.constant 0.00999999977 : f32
    %114 = vector.broadcast %cst_66 : f32 to vector<24x36xf32>
    %115 = arith.mulf %114, %113 : vector<24x36xf32>
    %116 = arith.maximumf %113, %115 : vector<24x36xf32>
    %c4_i32_67 = arith.constant 4 : i32
    %117 = tpu.memref_slice %arg19[%c4_i32_67] : memref<6x!tpu.dma_semaphore, #tpu.memory_space<semaphore_mem>> -> memref<1x!tpu.dma_semaphore, #tpu.memory_space<semaphore_mem>>
    %118 = tpu.memref_squeeze %117 : memref<1x!tpu.dma_semaphore, #tpu.memory_space<semaphore_mem>> -> memref<!tpu.dma_semaphore, #tpu.memory_space<semaphore_mem>>
    tpu.wait_dma2 semaphore(%118 : memref<!tpu.dma_semaphore, #tpu.memory_space<semaphore_mem>>) src(%arg10 : memref<6x36x100xbf16, #tpu.memory_space<any>>) dst(%arg17 : memref<6x36x100xbf16, #tpu.memory_space<vmem>>)
    %c0_68 = arith.constant 0 : index
    %c0_69 = arith.constant 0 : index
    %119 = vector.load %arg5[%c0_68, %c0_69] : memref<48x24xbf16, #tpu.memory_space<vmem>>, vector<48x24xbf16>
    %120 = arith.extf %119 : vector<48x24xbf16> to vector<48x24xf32>
    %cst_70 = arith.constant dense<0.000000e+00> : vector<48x36xf32>
    %121 = tpu.matmul %120, %116, %cst_70 {dimension_numbers = #tpu.dot_dimension_numbers<[1], [0], [0], [1], [0, 0, 1, 1], [], []>} : vector<48x24xf32>, vector<24x36xf32>, vector<48x36xf32> -> vector<48x36xf32>
    %122 = vector.extract_strided_slice %121 {offsets = [0, 0], sizes = [8, 36], strides = [1, 1]} : vector<48x36xf32> to vector<8x36xf32>
    %c0_71 = arith.constant 0 : index
    %c0_72 = arith.constant 0 : index
    %c0_73 = arith.constant 0 : index
    %123 = vector.load %arg17[%c0_71, %c0_72, %c0_73] : memref<6x36x100xbf16, #tpu.memory_space<vmem>>, vector<1x36x100xbf16>
    %124 = vector.shape_cast %123 : vector<1x36x100xbf16> to vector<36x100xbf16>
    %125 = arith.extf %124 : vector<36x100xbf16> to vector<36x100xf32>
    %cst_74 = arith.constant dense<0.000000e+00> : vector<8x100xf32>
    %126 = tpu.matmul %122, %125, %cst_74 {dimension_numbers = #tpu.dot_dimension_numbers<[1], [0], [0], [1], [0, 0, 1, 1], [], []>} : vector<8x36xf32>, vector<36x100xf32>, vector<8x100xf32> -> vector<8x100xf32>
    %127 = vector.extract_strided_slice %121 {offsets = [8, 0], sizes = [8, 36], strides = [1, 1]} : vector<48x36xf32> to vector<8x36xf32>
    %c1_75 = arith.constant 1 : index
    %c0_76 = arith.constant 0 : index
    %c0_77 = arith.constant 0 : index
    %128 = vector.load %arg17[%c1_75, %c0_76, %c0_77] : memref<6x36x100xbf16, #tpu.memory_space<vmem>>, vector<1x36x100xbf16>
    %129 = vector.shape_cast %128 : vector<1x36x100xbf16> to vector<36x100xbf16>
    %130 = arith.extf %129 : vector<36x100xbf16> to vector<36x100xf32>
    %cst_78 = arith.constant dense<0.000000e+00> : vector<8x100xf32>
    %131 = tpu.matmul %127, %130, %cst_78 {dimension_numbers = #tpu.dot_dimension_numbers<[1], [0], [0], [1], [0, 0, 1, 1], [], []>} : vector<8x36xf32>, vector<36x100xf32>, vector<8x100xf32> -> vector<8x100xf32>
    %132 = arith.addf %126, %131 : vector<8x100xf32>
    %133 = vector.extract_strided_slice %121 {offsets = [16, 0], sizes = [8, 36], strides = [1, 1]} : vector<48x36xf32> to vector<8x36xf32>
    %c2_79 = arith.constant 2 : index
    %c0_80 = arith.constant 0 : index
    %c0_81 = arith.constant 0 : index
    %134 = vector.load %arg17[%c2_79, %c0_80, %c0_81] : memref<6x36x100xbf16, #tpu.memory_space<vmem>>, vector<1x36x100xbf16>
    %135 = vector.shape_cast %134 : vector<1x36x100xbf16> to vector<36x100xbf16>
    %136 = arith.extf %135 : vector<36x100xbf16> to vector<36x100xf32>
    %cst_82 = arith.constant dense<0.000000e+00> : vector<8x100xf32>
    %137 = tpu.matmul %133, %136, %cst_82 {dimension_numbers = #tpu.dot_dimension_numbers<[1], [0], [0], [1], [0, 0, 1, 1], [], []>} : vector<8x36xf32>, vector<36x100xf32>, vector<8x100xf32> -> vector<8x100xf32>
    %138 = arith.addf %132, %137 : vector<8x100xf32>
    %139 = vector.extract_strided_slice %121 {offsets = [24, 0], sizes = [8, 36], strides = [1, 1]} : vector<48x36xf32> to vector<8x36xf32>
    %c3_83 = arith.constant 3 : index
    %c0_84 = arith.constant 0 : index
    %c0_85 = arith.constant 0 : index
    %140 = vector.load %arg17[%c3_83, %c0_84, %c0_85] : memref<6x36x100xbf16, #tpu.memory_space<vmem>>, vector<1x36x100xbf16>
    %141 = vector.shape_cast %140 : vector<1x36x100xbf16> to vector<36x100xbf16>
    %142 = arith.extf %141 : vector<36x100xbf16> to vector<36x100xf32>
    %cst_86 = arith.constant dense<0.000000e+00> : vector<8x100xf32>
    %143 = tpu.matmul %139, %142, %cst_86 {dimension_numbers = #tpu.dot_dimension_numbers<[1], [0], [0], [1], [0, 0, 1, 1], [], []>} : vector<8x36xf32>, vector<36x100xf32>, vector<8x100xf32> -> vector<8x100xf32>
    %144 = arith.addf %138, %143 : vector<8x100xf32>
    %145 = vector.extract_strided_slice %121 {offsets = [32, 0], sizes = [8, 36], strides = [1, 1]} : vector<48x36xf32> to vector<8x36xf32>
    %c4 = arith.constant 4 : index
    %c0_87 = arith.constant 0 : index
    %c0_88 = arith.constant 0 : index
    %146 = vector.load %arg17[%c4, %c0_87, %c0_88] : memref<6x36x100xbf16, #tpu.memory_space<vmem>>, vector<1x36x100xbf16>
    %147 = vector.shape_cast %146 : vector<1x36x100xbf16> to vector<36x100xbf16>
    %148 = arith.extf %147 : vector<36x100xbf16> to vector<36x100xf32>
    %cst_89 = arith.constant dense<0.000000e+00> : vector<8x100xf32>
    %149 = tpu.matmul %145, %148, %cst_89 {dimension_numbers = #tpu.dot_dimension_numbers<[1], [0], [0], [1], [0, 0, 1, 1], [], []>} : vector<8x36xf32>, vector<36x100xf32>, vector<8x100xf32> -> vector<8x100xf32>
    %150 = arith.addf %144, %149 : vector<8x100xf32>
    %151 = vector.extract_strided_slice %121 {offsets = [40, 0], sizes = [8, 36], strides = [1, 1]} : vector<48x36xf32> to vector<8x36xf32>
    %c5 = arith.constant 5 : index
    %c0_90 = arith.constant 0 : index
    %c0_91 = arith.constant 0 : index
    %152 = vector.load %arg17[%c5, %c0_90, %c0_91] : memref<6x36x100xbf16, #tpu.memory_space<vmem>>, vector<1x36x100xbf16>
    %153 = vector.shape_cast %152 : vector<1x36x100xbf16> to vector<36x100xbf16>
    %154 = arith.extf %153 : vector<36x100xbf16> to vector<36x100xf32>
    %cst_92 = arith.constant dense<0.000000e+00> : vector<8x100xf32>
    %155 = tpu.matmul %151, %154, %cst_92 {dimension_numbers = #tpu.dot_dimension_numbers<[1], [0], [0], [1], [0, 0, 1, 1], [], []>} : vector<8x36xf32>, vector<36x100xf32>, vector<8x100xf32> -> vector<8x100xf32>
    %156 = arith.addf %150, %155 : vector<8x100xf32>
    %c3_93 = arith.constant 3 : index
    %c0_94 = arith.constant 0 : index
    %157 = vector.load %arg4[%c3_93, %c0_94] : memref<20x240xf32, #tpu.memory_space<vmem>>, vector<1x100xf32>
    %158 = vector.broadcast %157 : vector<1x100xf32> to vector<8x100xf32>
    %159 = arith.addf %156, %158 : vector<8x100xf32>
    %160 = tpu.iota {dimensions = array<i32: 0>} : vector<8x1xi32>
    %c4_i32_95 = arith.constant 4 : i32
    %161 = vector.broadcast %c4_i32_95 : i32 to vector<8x1xi32>
    %162 = arith.cmpi slt, %160, %161 : vector<8x1xi32>
    %163 = arith.extui %162 : vector<8x1xi1> to vector<8x1xi32>
    %164 = arith.sitofp %163 : vector<8x1xi32> to vector<8x1xf32>
    %cst_96 = arith.constant 0.00999999977 : f32
    %165 = vector.broadcast %cst_96 : f32 to vector<8x100xf32>
    %166 = arith.mulf %165, %159 : vector<8x100xf32>
    %167 = arith.maximumf %159, %166 : vector<8x100xf32>
    %168 = vector.broadcast %164 : vector<8x1xf32> to vector<8x100xf32>
    %169 = arith.mulf %167, %168 : vector<8x100xf32>
    %cst_97 = arith.constant dense<0.000000e+00> : vector<100xf32>
    %170 = vector.multi_reduction <add>, %169, %cst_97 [0] : vector<8x100xf32> to vector<100xf32>
    %171 = vector.shape_cast %170 : vector<100xf32> to vector<1x100xf32>
    %172 = arith.mulf %169, %167 : vector<8x100xf32>
    %cst_98 = arith.constant dense<0.000000e+00> : vector<100xf32>
    %173 = vector.multi_reduction <add>, %172, %cst_98 [0] : vector<8x100xf32> to vector<100xf32>
    %174 = vector.shape_cast %173 : vector<100xf32> to vector<1x100xf32>
    %cst_99 = arith.constant 2.500000e-01 : f32
    %175 = vector.broadcast %cst_99 : f32 to vector<1x100xf32>
    %176 = arith.mulf %171, %175 : vector<1x100xf32>
    %cst_100 = arith.constant 2.500000e-01 : f32
    %177 = vector.broadcast %cst_100 : f32 to vector<1x100xf32>
    %178 = arith.mulf %174, %177 : vector<1x100xf32>
    %179 = arith.mulf %176, %176 : vector<1x100xf32>
    %180 = arith.subf %178, %179 : vector<1x100xf32>
    %cst_101 = arith.constant 0.000000e+00 : f32
    %181 = vector.broadcast %cst_101 : f32 to vector<1x100xf32>
    %182 = arith.maximumf %180, %181 : vector<1x100xf32>
    %183 = vector.broadcast %176 : vector<1x100xf32> to vector<8x100xf32>
    %184 = arith.subf %167, %183 : vector<8x100xf32>
    %cst_102 = arith.constant 9.99999974E-6 : f32
    %185 = vector.broadcast %cst_102 : f32 to vector<1x100xf32>
    %186 = arith.addf %182, %185 : vector<1x100xf32>
    %187 = math.rsqrt %186 : vector<1x100xf32>
    %188 = vector.broadcast %187 : vector<1x100xf32> to vector<8x100xf32>
    %189 = arith.mulf %184, %188 : vector<8x100xf32>
    %c4_103 = arith.constant 4 : index
    %c0_104 = arith.constant 0 : index
    %190 = vector.load %arg4[%c4_103, %c0_104] : memref<20x240xf32, #tpu.memory_space<vmem>>, vector<1x100xf32>
    %191 = vector.broadcast %190 : vector<1x100xf32> to vector<8x100xf32>
    %192 = arith.mulf %189, %191 : vector<8x100xf32>
    %c5_105 = arith.constant 5 : index
    %c0_106 = arith.constant 0 : index
    %193 = vector.load %arg4[%c5_105, %c0_106] : memref<20x240xf32, #tpu.memory_space<vmem>>, vector<1x100xf32>
    %194 = vector.broadcast %193 : vector<1x100xf32> to vector<8x100xf32>
    %195 = arith.addf %192, %194 : vector<8x100xf32>
    %c5_i32_107 = arith.constant 5 : i32
    %196 = tpu.memref_slice %arg19[%c5_i32_107] : memref<6x!tpu.dma_semaphore, #tpu.memory_space<semaphore_mem>> -> memref<1x!tpu.dma_semaphore, #tpu.memory_space<semaphore_mem>>
    %197 = tpu.memref_squeeze %196 : memref<1x!tpu.dma_semaphore, #tpu.memory_space<semaphore_mem>> -> memref<!tpu.dma_semaphore, #tpu.memory_space<semaphore_mem>>
    tpu.wait_dma2 semaphore(%197 : memref<!tpu.dma_semaphore, #tpu.memory_space<semaphore_mem>>) src(%arg11 : memref<640x200xbf16, #tpu.memory_space<any>>) dst(%arg18 : memref<640x200xbf16, #tpu.memory_space<vmem>>)
    %c0_108 = arith.constant 0 : index
    %c0_109 = arith.constant 0 : index
    %198 = vector.load %arg18[%c0_108, %c0_109] : memref<640x200xbf16, #tpu.memory_space<vmem>>, vector<100x50xbf16>
    %199 = arith.extf %198 : vector<100x50xbf16> to vector<100x50xf32>
    %cst_110 = arith.constant dense<0.000000e+00> : vector<8x50xf32>
    %200 = tpu.matmul %195, %199, %cst_110 {dimension_numbers = #tpu.dot_dimension_numbers<[1], [0], [0], [1], [0, 0, 1, 1], [], []>} : vector<8x100xf32>, vector<100x50xf32>, vector<8x50xf32> -> vector<8x50xf32>
    %c6 = arith.constant 6 : index
    %c0_111 = arith.constant 0 : index
    %201 = vector.load %arg4[%c6, %c0_111] : memref<20x240xf32, #tpu.memory_space<vmem>>, vector<1x50xf32>
    %202 = vector.broadcast %201 : vector<1x50xf32> to vector<8x50xf32>
    %203 = arith.addf %200, %202 : vector<8x50xf32>
    %cst_112 = arith.constant 0.00999999977 : f32
    %204 = vector.broadcast %cst_112 : f32 to vector<8x50xf32>
    %205 = arith.mulf %204, %203 : vector<8x50xf32>
    %206 = arith.maximumf %203, %205 : vector<8x50xf32>
    %207 = vector.broadcast %164 : vector<8x1xf32> to vector<8x50xf32>
    %208 = arith.mulf %206, %207 : vector<8x50xf32>
    %cst_113 = arith.constant dense<0.000000e+00> : vector<50xf32>
    %209 = vector.multi_reduction <add>, %208, %cst_113 [0] : vector<8x50xf32> to vector<50xf32>
    %210 = vector.shape_cast %209 : vector<50xf32> to vector<1x50xf32>
    %211 = arith.mulf %208, %206 : vector<8x50xf32>
    %cst_114 = arith.constant dense<0.000000e+00> : vector<50xf32>
    %212 = vector.multi_reduction <add>, %211, %cst_114 [0] : vector<8x50xf32> to vector<50xf32>
    %213 = vector.shape_cast %212 : vector<50xf32> to vector<1x50xf32>
    %cst_115 = arith.constant 2.500000e-01 : f32
    %214 = vector.broadcast %cst_115 : f32 to vector<1x50xf32>
    %215 = arith.mulf %210, %214 : vector<1x50xf32>
    %cst_116 = arith.constant 2.500000e-01 : f32
    %216 = vector.broadcast %cst_116 : f32 to vector<1x50xf32>
    %217 = arith.mulf %213, %216 : vector<1x50xf32>
    %218 = arith.mulf %215, %215 : vector<1x50xf32>
    %219 = arith.subf %217, %218 : vector<1x50xf32>
    %cst_117 = arith.constant 0.000000e+00 : f32
    %220 = vector.broadcast %cst_117 : f32 to vector<1x50xf32>
    %221 = arith.maximumf %219, %220 : vector<1x50xf32>
    %222 = vector.broadcast %215 : vector<1x50xf32> to vector<8x50xf32>
    %223 = arith.subf %206, %222 : vector<8x50xf32>
    %cst_118 = arith.constant 9.99999974E-6 : f32
    %224 = vector.broadcast %cst_118 : f32 to vector<1x50xf32>
    %225 = arith.addf %221, %224 : vector<1x50xf32>
    %226 = math.rsqrt %225 : vector<1x50xf32>
    %227 = vector.broadcast %226 : vector<1x50xf32> to vector<8x50xf32>
    %228 = arith.mulf %223, %227 : vector<8x50xf32>
    %c7 = arith.constant 7 : index
    %c0_119 = arith.constant 0 : index
    %229 = vector.load %arg4[%c7, %c0_119] : memref<20x240xf32, #tpu.memory_space<vmem>>, vector<1x50xf32>
    %230 = vector.broadcast %229 : vector<1x50xf32> to vector<8x50xf32>
    %231 = arith.mulf %228, %230 : vector<8x50xf32>
    %c8 = arith.constant 8 : index
    %c0_120 = arith.constant 0 : index
    %232 = vector.load %arg4[%c8, %c0_120] : memref<20x240xf32, #tpu.memory_space<vmem>>, vector<1x50xf32>
    %233 = vector.broadcast %232 : vector<1x50xf32> to vector<8x50xf32>
    %234 = arith.addf %231, %233 : vector<8x50xf32>
    %c112 = arith.constant 112 : index
    %c0_121 = arith.constant 0 : index
    %235 = vector.load %arg18[%c112, %c0_121] : memref<640x200xbf16, #tpu.memory_space<vmem>>, vector<50x50xbf16>
    %236 = arith.extf %235 : vector<50x50xbf16> to vector<50x50xf32>
    %cst_122 = arith.constant dense<0.000000e+00> : vector<8x50xf32>
    %237 = tpu.matmul %234, %236, %cst_122 {dimension_numbers = #tpu.dot_dimension_numbers<[1], [0], [0], [1], [0, 0, 1, 1], [], []>} : vector<8x50xf32>, vector<50x50xf32>, vector<8x50xf32> -> vector<8x50xf32>
    %c9 = arith.constant 9 : index
    %c0_123 = arith.constant 0 : index
    %238 = vector.load %arg4[%c9, %c0_123] : memref<20x240xf32, #tpu.memory_space<vmem>>, vector<1x50xf32>
    %239 = vector.broadcast %238 : vector<1x50xf32> to vector<8x50xf32>
    %240 = arith.addf %237, %239 : vector<8x50xf32>
    %cst_124 = arith.constant 0.00999999977 : f32
    %241 = vector.broadcast %cst_124 : f32 to vector<8x50xf32>
    %242 = arith.mulf %241, %240 : vector<8x50xf32>
    %243 = arith.maximumf %240, %242 : vector<8x50xf32>
    %244 = vector.broadcast %164 : vector<8x1xf32> to vector<8x50xf32>
    %245 = arith.mulf %243, %244 : vector<8x50xf32>
    %cst_125 = arith.constant dense<0.000000e+00> : vector<50xf32>
    %246 = vector.multi_reduction <add>, %245, %cst_125 [0] : vector<8x50xf32> to vector<50xf32>
    %247 = vector.shape_cast %246 : vector<50xf32> to vector<1x50xf32>
    %248 = arith.mulf %245, %243 : vector<8x50xf32>
    %cst_126 = arith.constant dense<0.000000e+00> : vector<50xf32>
    %249 = vector.multi_reduction <add>, %248, %cst_126 [0] : vector<8x50xf32> to vector<50xf32>
    %250 = vector.shape_cast %249 : vector<50xf32> to vector<1x50xf32>
    %cst_127 = arith.constant 2.500000e-01 : f32
    %251 = vector.broadcast %cst_127 : f32 to vector<1x50xf32>
    %252 = arith.mulf %247, %251 : vector<1x50xf32>
    %cst_128 = arith.constant 2.500000e-01 : f32
    %253 = vector.broadcast %cst_128 : f32 to vector<1x50xf32>
    %254 = arith.mulf %250, %253 : vector<1x50xf32>
    %255 = arith.mulf %252, %252 : vector<1x50xf32>
    %256 = arith.subf %254, %255 : vector<1x50xf32>
    %cst_129 = arith.constant 0.000000e+00 : f32
    %257 = vector.broadcast %cst_129 : f32 to vector<1x50xf32>
    %258 = arith.maximumf %256, %257 : vector<1x50xf32>
    %259 = vector.broadcast %252 : vector<1x50xf32> to vector<8x50xf32>
    %260 = arith.subf %243, %259 : vector<8x50xf32>
    %cst_130 = arith.constant 9.99999974E-6 : f32
    %261 = vector.broadcast %cst_130 : f32 to vector<1x50xf32>
    %262 = arith.addf %258, %261 : vector<1x50xf32>
    %263 = math.rsqrt %262 : vector<1x50xf32>
    %264 = vector.broadcast %263 : vector<1x50xf32> to vector<8x50xf32>
    %265 = arith.mulf %260, %264 : vector<8x50xf32>
    %c10 = arith.constant 10 : index
    %c0_131 = arith.constant 0 : index
    %266 = vector.load %arg4[%c10, %c0_131] : memref<20x240xf32, #tpu.memory_space<vmem>>, vector<1x50xf32>
    %267 = vector.broadcast %266 : vector<1x50xf32> to vector<8x50xf32>
    %268 = arith.mulf %265, %267 : vector<8x50xf32>
    %c11 = arith.constant 11 : index
    %c0_132 = arith.constant 0 : index
    %269 = vector.load %arg4[%c11, %c0_132] : memref<20x240xf32, #tpu.memory_space<vmem>>, vector<1x50xf32>
    %270 = vector.broadcast %269 : vector<1x50xf32> to vector<8x50xf32>
    %271 = arith.addf %268, %270 : vector<8x50xf32>
    %c176 = arith.constant 176 : index
    %c0_133 = arith.constant 0 : index
    %272 = vector.load %arg18[%c176, %c0_133] : memref<640x200xbf16, #tpu.memory_space<vmem>>, vector<50x200xbf16>
    %273 = arith.extf %272 : vector<50x200xbf16> to vector<50x200xf32>
    %cst_134 = arith.constant dense<0.000000e+00> : vector<8x200xf32>
    %274 = tpu.matmul %271, %273, %cst_134 {dimension_numbers = #tpu.dot_dimension_numbers<[1], [0], [0], [1], [0, 0, 1, 1], [], []>} : vector<8x50xf32>, vector<50x200xf32>, vector<8x200xf32> -> vector<8x200xf32>
    %c0_135 = arith.constant 0 : index
    %c0_136 = arith.constant 0 : index
    %275 = vector.load %arg1[%c0_135, %c0_136] : memref<8x8xf32, #tpu.memory_space<vmem>>, vector<8x8xf32>
    %c240 = arith.constant 240 : index
    %c0_137 = arith.constant 0 : index
    %276 = vector.load %arg18[%c240, %c0_137] : memref<640x200xbf16, #tpu.memory_space<vmem>>, vector<8x200xbf16>
    %277 = arith.extf %276 : vector<8x200xbf16> to vector<8x200xf32>
    %cst_138 = arith.constant dense<0.000000e+00> : vector<8x200xf32>
    %278 = tpu.matmul %275, %277, %cst_138 {dimension_numbers = #tpu.dot_dimension_numbers<[1], [0], [0], [1], [0, 0, 1, 1], [], []>} : vector<8x8xf32>, vector<8x200xf32>, vector<8x200xf32> -> vector<8x200xf32>
    %279 = arith.addf %274, %278 : vector<8x200xf32>
    %c12 = arith.constant 12 : index
    %c0_139 = arith.constant 0 : index
    %280 = vector.load %arg4[%c12, %c0_139] : memref<20x240xf32, #tpu.memory_space<vmem>>, vector<1x200xf32>
    %281 = vector.broadcast %280 : vector<1x200xf32> to vector<8x200xf32>
    %282 = arith.addf %279, %281 : vector<8x200xf32>
    %cst_140 = arith.constant 0.00999999977 : f32
    %283 = vector.broadcast %cst_140 : f32 to vector<8x200xf32>
    %284 = arith.mulf %283, %282 : vector<8x200xf32>
    %285 = arith.maximumf %282, %284 : vector<8x200xf32>
    %c256 = arith.constant 256 : index
    %c0_141 = arith.constant 0 : index
    %286 = vector.load %arg18[%c256, %c0_141] : memref<640x200xbf16, #tpu.memory_space<vmem>>, vector<200x100xbf16>
    %287 = arith.extf %286 : vector<200x100xbf16> to vector<200x100xf32>
    %cst_142 = arith.constant dense<0.000000e+00> : vector<8x100xf32>
    %288 = tpu.matmul %285, %287, %cst_142 {dimension_numbers = #tpu.dot_dimension_numbers<[1], [0], [0], [1], [0, 0, 1, 1], [], []>} : vector<8x200xf32>, vector<200x100xf32>, vector<8x100xf32> -> vector<8x100xf32>
    %c13 = arith.constant 13 : index
    %c0_143 = arith.constant 0 : index
    %289 = vector.load %arg4[%c13, %c0_143] : memref<20x240xf32, #tpu.memory_space<vmem>>, vector<1x100xf32>
    %290 = vector.broadcast %289 : vector<1x100xf32> to vector<8x100xf32>
    %291 = arith.addf %288, %290 : vector<8x100xf32>
    %cst_144 = arith.constant 0.00999999977 : f32
    %292 = vector.broadcast %cst_144 : f32 to vector<8x100xf32>
    %293 = arith.mulf %292, %291 : vector<8x100xf32>
    %294 = arith.maximumf %291, %293 : vector<8x100xf32>
    %295 = vector.broadcast %164 : vector<8x1xf32> to vector<8x100xf32>
    %296 = arith.mulf %294, %295 : vector<8x100xf32>
    %cst_145 = arith.constant dense<0.000000e+00> : vector<100xf32>
    %297 = vector.multi_reduction <add>, %296, %cst_145 [0] : vector<8x100xf32> to vector<100xf32>
    %298 = vector.shape_cast %297 : vector<100xf32> to vector<1x100xf32>
    %299 = arith.mulf %296, %294 : vector<8x100xf32>
    %cst_146 = arith.constant dense<0.000000e+00> : vector<100xf32>
    %300 = vector.multi_reduction <add>, %299, %cst_146 [0] : vector<8x100xf32> to vector<100xf32>
    %301 = vector.shape_cast %300 : vector<100xf32> to vector<1x100xf32>
    %cst_147 = arith.constant 2.500000e-01 : f32
    %302 = vector.broadcast %cst_147 : f32 to vector<1x100xf32>
    %303 = arith.mulf %298, %302 : vector<1x100xf32>
    %cst_148 = arith.constant 2.500000e-01 : f32
    %304 = vector.broadcast %cst_148 : f32 to vector<1x100xf32>
    %305 = arith.mulf %301, %304 : vector<1x100xf32>
    %306 = arith.mulf %303, %303 : vector<1x100xf32>
    %307 = arith.subf %305, %306 : vector<1x100xf32>
    %cst_149 = arith.constant 0.000000e+00 : f32
    %308 = vector.broadcast %cst_149 : f32 to vector<1x100xf32>
    %309 = arith.maximumf %307, %308 : vector<1x100xf32>
    %310 = vector.broadcast %303 : vector<1x100xf32> to vector<8x100xf32>
    %311 = arith.subf %294, %310 : vector<8x100xf32>
    %cst_150 = arith.constant 9.99999974E-6 : f32
    %312 = vector.broadcast %cst_150 : f32 to vector<1x100xf32>
    %313 = arith.addf %309, %312 : vector<1x100xf32>
    %314 = math.rsqrt %313 : vector<1x100xf32>
    %315 = vector.broadcast %314 : vector<1x100xf32> to vector<8x100xf32>
    %316 = arith.mulf %311, %315 : vector<8x100xf32>
    %c14 = arith.constant 14 : index
    %c0_151 = arith.constant 0 : index
    %317 = vector.load %arg4[%c14, %c0_151] : memref<20x240xf32, #tpu.memory_space<vmem>>, vector<1x100xf32>
    %318 = vector.broadcast %317 : vector<1x100xf32> to vector<8x100xf32>
    %319 = arith.mulf %316, %318 : vector<8x100xf32>
    %c15 = arith.constant 15 : index
    %c0_152 = arith.constant 0 : index
    %320 = vector.load %arg4[%c15, %c0_152] : memref<20x240xf32, #tpu.memory_space<vmem>>, vector<1x100xf32>
    %321 = vector.broadcast %320 : vector<1x100xf32> to vector<8x100xf32>
    %322 = arith.addf %319, %321 : vector<8x100xf32>
    %c464 = arith.constant 464 : index
    %c0_153 = arith.constant 0 : index
    %323 = vector.load %arg18[%c464, %c0_153] : memref<640x200xbf16, #tpu.memory_space<vmem>>, vector<100x50xbf16>
    %324 = arith.extf %323 : vector<100x50xbf16> to vector<100x50xf32>
    %cst_154 = arith.constant dense<0.000000e+00> : vector<8x50xf32>
    %325 = tpu.matmul %322, %324, %cst_154 {dimension_numbers = #tpu.dot_dimension_numbers<[1], [0], [0], [1], [0, 0, 1, 1], [], []>} : vector<8x100xf32>, vector<100x50xf32>, vector<8x50xf32> -> vector<8x50xf32>
    %c16 = arith.constant 16 : index
    %c0_155 = arith.constant 0 : index
    %326 = vector.load %arg4[%c16, %c0_155] : memref<20x240xf32, #tpu.memory_space<vmem>>, vector<1x50xf32>
    %327 = vector.broadcast %326 : vector<1x50xf32> to vector<8x50xf32>
    %328 = arith.addf %325, %327 : vector<8x50xf32>
    %cst_156 = arith.constant 0.00999999977 : f32
    %329 = vector.broadcast %cst_156 : f32 to vector<8x50xf32>
    %330 = arith.mulf %329, %328 : vector<8x50xf32>
    %331 = arith.maximumf %328, %330 : vector<8x50xf32>
    %332 = vector.broadcast %164 : vector<8x1xf32> to vector<8x50xf32>
    %333 = arith.mulf %331, %332 : vector<8x50xf32>
    %cst_157 = arith.constant dense<0.000000e+00> : vector<50xf32>
    %334 = vector.multi_reduction <add>, %333, %cst_157 [0] : vector<8x50xf32> to vector<50xf32>
    %335 = vector.shape_cast %334 : vector<50xf32> to vector<1x50xf32>
    %336 = arith.mulf %333, %331 : vector<8x50xf32>
    %cst_158 = arith.constant dense<0.000000e+00> : vector<50xf32>
    %337 = vector.multi_reduction <add>, %336, %cst_158 [0] : vector<8x50xf32> to vector<50xf32>
    %338 = vector.shape_cast %337 : vector<50xf32> to vector<1x50xf32>
    %cst_159 = arith.constant 2.500000e-01 : f32
    %339 = vector.broadcast %cst_159 : f32 to vector<1x50xf32>
    %340 = arith.mulf %335, %339 : vector<1x50xf32>
    %cst_160 = arith.constant 2.500000e-01 : f32
    %341 = vector.broadcast %cst_160 : f32 to vector<1x50xf32>
    %342 = arith.mulf %338, %341 : vector<1x50xf32>
    %343 = arith.mulf %340, %340 : vector<1x50xf32>
    %344 = arith.subf %342, %343 : vector<1x50xf32>
    %cst_161 = arith.constant 0.000000e+00 : f32
    %345 = vector.broadcast %cst_161 : f32 to vector<1x50xf32>
    %346 = arith.maximumf %344, %345 : vector<1x50xf32>
    %347 = vector.broadcast %340 : vector<1x50xf32> to vector<8x50xf32>
    %348 = arith.subf %331, %347 : vector<8x50xf32>
    %cst_162 = arith.constant 9.99999974E-6 : f32
    %349 = vector.broadcast %cst_162 : f32 to vector<1x50xf32>
    %350 = arith.addf %346, %349 : vector<1x50xf32>
    %351 = math.rsqrt %350 : vector<1x50xf32>
    %352 = vector.broadcast %351 : vector<1x50xf32> to vector<8x50xf32>
    %353 = arith.mulf %348, %352 : vector<8x50xf32>
    %c17 = arith.constant 17 : index
    %c0_163 = arith.constant 0 : index
    %354 = vector.load %arg4[%c17, %c0_163] : memref<20x240xf32, #tpu.memory_space<vmem>>, vector<1x50xf32>
    %355 = vector.broadcast %354 : vector<1x50xf32> to vector<8x50xf32>
    %356 = arith.mulf %353, %355 : vector<8x50xf32>
    %c18 = arith.constant 18 : index
    %c0_164 = arith.constant 0 : index
    %357 = vector.load %arg4[%c18, %c0_164] : memref<20x240xf32, #tpu.memory_space<vmem>>, vector<1x50xf32>
    %358 = vector.broadcast %357 : vector<1x50xf32> to vector<8x50xf32>
    %359 = arith.addf %356, %358 : vector<8x50xf32>
    %c576 = arith.constant 576 : index
    %c0_165 = arith.constant 0 : index
    %360 = vector.load %arg18[%c576, %c0_165] : memref<640x200xbf16, #tpu.memory_space<vmem>>, vector<50x15xbf16>
    %361 = arith.extf %360 : vector<50x15xbf16> to vector<50x15xf32>
    %cst_166 = arith.constant dense<0.000000e+00> : vector<8x15xf32>
    %362 = tpu.matmul %359, %361, %cst_166 {dimension_numbers = #tpu.dot_dimension_numbers<[1], [0], [0], [1], [0, 0, 1, 1], [], []>} : vector<8x50xf32>, vector<50x15xf32>, vector<8x15xf32> -> vector<8x15xf32>
    %c19 = arith.constant 19 : index
    %c0_167 = arith.constant 0 : index
    %363 = vector.load %arg4[%c19, %c0_167] : memref<20x240xf32, #tpu.memory_space<vmem>>, vector<1x15xf32>
    %364 = vector.broadcast %363 : vector<1x15xf32> to vector<8x15xf32>
    %365 = arith.addf %362, %364 : vector<8x15xf32>
    %cst_168 = arith.constant dense<0xFF800000> : vector<8xf32>
    %366 = vector.multi_reduction <maximumf>, %365, %cst_168 [1] : vector<8x15xf32> to vector<8xf32>
    %367 = vector.shape_cast %366 : vector<8xf32> to vector<8x1xf32>
    %368 = vector.broadcast %367 : vector<8x1xf32> to vector<8x15xf32>
    %369 = arith.subf %365, %368 : vector<8x15xf32>
    %370 = math.exp %369 : vector<8x15xf32>
    %cst_169 = arith.constant dense<0.000000e+00> : vector<8xf32>
    %371 = vector.multi_reduction <add>, %370, %cst_169 [1] : vector<8x15xf32> to vector<8xf32>
    %372 = vector.shape_cast %371 : vector<8xf32> to vector<8x1xf32>
    %373 = vector.broadcast %372 : vector<8x1xf32> to vector<8x15xf32>
    %374 = arith.divf %370, %373 : vector<8x15xf32>
    %375 = vector.extract_strided_slice %374 {offsets = [0, 0], sizes = [4, 15], strides = [1, 1]} : vector<8x15xf32> to vector<4x15xf32>
    %c0_170 = arith.constant 0 : index
    %c0_171 = arith.constant 0 : index
    %376 = vector.load %arg12[%c0_170, %c0_171] : memref<4x15xf32, #tpu.memory_space<vmem>>, vector<4x15xf32>
    tpu.vector_store %arg12[%c0_170, %c0_171], %375 {strides = array<i32>} : memref<4x15xf32, #tpu.memory_space<vmem>>, vector<4x15xf32>,
    return
  }
}

</mosaic_0001>

<bundles_post_ra>
// kernel: forward.1
= control target key start
LH: loop header
LB: loop body
LE: loop exit
PB: predicated region body
PF: predicated region fallthrough
CT: control target
= control target key end

     0   :  { %17 = vsyncpa [#allocation10], 0  ;;  %s10685_s0 = inlined_call_operand.vmem [shape: f32[192,20], index: 0, kind: input, shape index: {}]   ;;  %s10686_s1 = inlined_call_operand.vmem [shape: f32[8,8], index: 1, kind: input, shape index: {}]   ;;  %s10687_s2 = inlined_call_operand.vmem [shape: bf16[384,192], index: 2, kind: input, shape index: {}]   ;;  %s10688_s3 = inlined_call_operand.hbm [shape: bf16[4,20,216], index: 3, kind: input, shape index: {}]   ;;  %s10689_s4 = inlined_call_operand.hbm [shape: f32[20,240], index: 4, kind: input, shape index: {}]   ;;  %s10690_s5 = inlined_call_operand.hbm [shape: bf16[48,24], index: 5, kind: input, shape index: {}]   ;;  %s10691_s6 = inlined_call_operand.vmem [shape: bf16[192,96], index: 6, kind: input, shape index: {}]   ;;  %s10692_s7 = inlined_call_operand.vmem [shape: bf16[4,216,240], index: 7, kind: input, shape index: {}]   ;;  %s10693_s8 = inlined_call_operand.vmem [shape: bf16[96,48], index: 8, kind: input, shape index: {}]   ;;  %s10694_s9 = inlined_call_operand.vmem [shape: bf16[4,240,36], index: 9, kind: input, shape index: {}]   ;;  %s10695_s10 = inlined_call_operand.vmem [shape: bf16[6,36,100], index: 10, kind: input, shape index: {}]   ;;  %s10696_s11 = inlined_call_operand.vmem [shape: bf16[640,200], index: 11, kind: input, shape index: {}]   ;;  %s10697_s12 = inlined_call_operand.hbm [shape: f32[4,15], index: 12, kind: output, shape index: {}]  }
   0x1   :  { %18 = vsyncpa [#allocation13], 0 }
   0x2   :  { %19 = vsyncpa [#allocation11], 0  ;;  %s8027_s21 = smov [#allocation12]   ;;  %s7921_s25 = scalar_lea.hbm %s10689_s4, 768 }
   0x3   :  { %s43_s22 = sshll.u32 %s8027_s21, 4  ;;  %p7922_p0 = scmp.ne.s32.totalorder %s10689_s4, %s7921_s25  ;;  %s44_s22 = int_to_ptr.vmem [resolvable:$true] %s43_s22 }
   0x4   :  { %p7925_p1 = scmp.lt.u32.totalorder %s7921_s25, %s10689_s4 }
   0x6   :  { %p7927_p2 = pnand %p7925_p1, %p7922_p0 }
   0x8   :  { %7930 = shalt.err (!%p7927_p2)
}
   0x9   :  { %s7931_s30 = scalar_lea.vmem %s44_s22, 768  ;;  %p7936_p4 = scmp.lt.s32.totalorder %s44_s22, %s44_s22 }
   0xa   :  { %p7932_p3 = scmp.ne.s32.totalorder %s44_s22, %s7931_s30  ;;  %p7937_p5 = scmp.lt.s32.totalorder %s7931_s30, %s7931_s30 }
   0xc   :  { %p7938_p6 = por %p7937_p5, %p7936_p4 }
   0xe   :  { %p7939_p7 = pnand %p7938_p6, %p7932_p3 }
  0x10   :  { %7942 = shalt.err (!%p7939_p7)
}
  0x11   :  { %s8028_s13 = smov 256   ;;  %s8029_s14 = smov 16  }
  0x12   :  { %49 = dma.hbm_to_vmem [thread:$0]  %s10689_s4, 768, %s44_s22, [#allocation13], %s8028_s13, %s8028_s13, %s8029_s14  }
  0x13   :  { %s8030_s17 = smov [#allocation9]   ;;  %s7943_s21 = scalar_lea.hbm %s10688_s3, 1536 }
  0x14   :  { %s31_s18 = sshll.u32 %s8030_s17, 4  ;;  %p7944_p8 = scmp.ne.s32.totalorder %s10688_s3, %s7943_s21  ;;  %s32_s18 = int_to_ptr.vmem [resolvable:$true] %s31_s18 }
  0x15   :  { %p7947_p9 = scmp.lt.u32.totalorder %s7943_s21, %s10688_s3 }
  0x17   :  { %p7949_p10 = pnand %p7947_p9, %p7944_p8 }
  0x19   :  { %7952 = shalt.err (!%p7949_p10)
}
  0x1a   :  { %s7953_s27 = scalar_lea.vmem %s32_s18, 1536  ;;  %p7958_p12 = scmp.lt.s32.totalorder %s32_s18, %s32_s18 }
  0x1b   :  { %p7954_p11 = scmp.ne.s32.totalorder %s32_s18, %s7953_s27  ;;  %p7959_p13 = scmp.lt.s32.totalorder %s7953_s27, %s7953_s27 }
  0x1d   :  { %p7960_p0 = por %p7959_p13, %p7958_p12 }
  0x1f   :  { %p7961_p1 = pnand %p7960_p0, %p7954_p11 }
  0x21   :  { %7964 = shalt.err (!%p7961_p1)
}
  0x22   :  { %s8031_s4 = smov 128   ;;  %s8032_s22 = smov 8  }
  0x23   :  { %37 = dma.hbm_to_vmem [thread:$0]  %s10688_s3, 1536, %s32_s18, [#allocation10], %s8031_s4, %s8031_s4, %s8032_s22  }
  0x24   :  { %s8033_s30 = smov [#allocation14]   ;;  %s7965_s16 = scalar_lea.hbm %s10690_s5, 384 }
  0x25   :  { %s55_s13 = sshll.u32 %s8033_s30, 4  ;;  %p7966_p2 = scmp.ne.s32.totalorder %s10690_s5, %s7965_s16  ;;  %s56_s13 = int_to_ptr.vmem [resolvable:$true] %s55_s13 }
  0x26   :  { %p7969_p3 = scmp.lt.u32.totalorder %s7965_s16, %s10690_s5 }
  0x28   :  { %p7971_p4 = pnand %p7969_p3, %p7966_p2 }
  0x2a   :  { %7974 = shalt.err (!%p7971_p4)
}
  0x2b   :  { %s7975_s23 = scalar_lea.vmem %s56_s13, 384  ;;  %p7980_p6 = scmp.lt.s32.totalorder %s56_s13, %s56_s13 }
  0x2c   :  { %p7976_p5 = scmp.ne.s32.totalorder %s56_s13, %s7975_s23  ;;  %p7981_p7 = scmp.lt.s32.totalorder %s7975_s23, %s7975_s23 }
  0x2e   :  { %p7982_p8 = por %p7981_p7, %p7980_p6 }
  0x30   :  { %p7983_p9 = pnand %p7982_p8, %p7976_p5 }
  0x32   :  { %7986 = shalt.err (!%p7983_p9)
}
  0x33   :  { %s8034_s3 = smov 64   ;;  %s8035_s18 = smov 4  }
  0x34   :  { %61 = dma.hbm_to_vmem [thread:$0]  %s10690_s5, 384, %s56_s13, [#allocation13], %s8034_s3, %s8034_s3, %s8035_s18  }
  0x35   :  { %8009 = dma.done.wait [#allocation10], 1536  }
  0x36   :  { %8010 = vsyncadd [#allocation10], 4294965760 }
  0x37   :  { %8011 = dma.done.wait [#allocation13], 1152  }
  0x38   :  { %8012 = vsyncadd [#allocation13], 4294966144  ;;  %v8144_v0 = vld [vmem:[%s10691_s6] sm:$0xff]  ;;  %v8149_v1 = vld [vmem:[%s10691_s6 + $0x8] sm:$0xff] }
  0x39   :  { %10823 = vst [vmem:[#allocation31_spill] sm:$0xff] %v8144_v0  ;;  %10824 = vst [vmem:[#allocation32_spill] sm:$0xff] %v8149_v1  ;;  %v8154_v2 = vld [vmem:[%s10691_s6 + $0x10] sm:$0xff]  ;;  %v8159_v3 = vld [vmem:[%s10691_s6 + $0x18] sm:$0xff] }
  0x3a   :  { %10825 = vst [vmem:[#allocation33_spill] sm:$0xff] %v8154_v2  ;;  %10826 = vst [vmem:[#allocation34_spill] sm:$0xff] %v8159_v3  ;;  %v8164_v4 = vld [vmem:[%s10691_s6 + $0x20] sm:$0xff]  ;;  %v8169_v5 = vld [vmem:[%s10691_s6 + $0x28] sm:$0xff] }
  0x3b   :  { %10827 = vst [vmem:[#allocation35_spill] sm:$0xff] %v8164_v4  ;;  %10828 = vst [vmem:[#allocation36_spill] sm:$0xff] %v8169_v5  ;;  %v8174_v6 = vld [vmem:[%s10691_s6 + $0x30] sm:$0xff]  ;;  %v8179_v7 = vld [vmem:[%s10691_s6 + $0x38] sm:$0xff] }
  0x3c   :  { %10829 = vst [vmem:[#allocation37_spill] sm:$0xff] %v8174_v6  ;;  %10830 = vst [vmem:[#allocation38_spill] sm:$0xff] %v8179_v7  ;;  %v8184_v8 = vld [vmem:[%s10691_s6 + $0x40] sm:$0xff]  ;;  %v8189_v9 = vld [vmem:[%s10691_s6 + $0x48] sm:$0xff] }
  0x3d   :  { %10831 = vst [vmem:[#allocation39_spill] sm:$0xff] %v8184_v8  ;;  %10832 = vst [vmem:[#allocation40_spill] sm:$0xff] %v8189_v9  ;;  %v8194_v10 = vld [vmem:[%s10691_s6 + $0x50] sm:$0xff]  ;;  %v8199_v11 = vld [vmem:[%s10691_s6 + $0x58] sm:$0xff] }
  0x3e   :  { %10833 = vst [vmem:[#allocation41_spill] sm:$0xff] %v8194_v10  ;;  %10834 = vst [vmem:[#allocation42_spill] sm:$0xff] %v8199_v11 }
  0x3f   :  { %134 = vsyncadd [#allocation8], 1536  ;;  %v8204_v12 = vld [vmem:[%s10692_s7] sm:$0xff]  ;;  %v8209_v13 = vld [vmem:[%s10692_s7 + $0x8] sm:$0xff] }
  0x40   :  { %10835 = vst [vmem:[#allocation43_spill] sm:$0xff] %v8204_v12  ;;  %10836 = vst [vmem:[#allocation44_spill] sm:$0xff] %v8209_v13  ;;  %v8214_v14 = vld [vmem:[%s10692_s7 + $0x10] sm:$0xff]  ;;  %v8219_v15 = vld [vmem:[%s10692_s7 + $0x18] sm:$0xff] }
  0x41   :  { %10837 = vst [vmem:[#allocation45_spill] sm:$0xff] %v8214_v14  ;;  %10838 = vst [vmem:[#allocation46_spill] sm:$0xff] %v8219_v15  ;;  %v8224_v16 = vld [vmem:[%s10692_s7 + $0x20] sm:$0xff]  ;;  %v8229_v17 = vld [vmem:[%s10692_s7 + $0x28] sm:$0xff] }
  0x42   :  { %10839 = vst [vmem:[#allocation47_spill] sm:$0xff] %v8224_v16  ;;  %10840 = vst [vmem:[#allocation48_spill] sm:$0xff] %v8229_v17  ;;  %v8234_v18 = vld [vmem:[%s10692_s7 + $0x30] sm:$0xff]  ;;  %v8239_v19 = vld [vmem:[%s10692_s7 + $0x38] sm:$0xff] }
  0x43   :  { %10841 = vst [vmem:[#allocation49_spill] sm:$0xff] %v8234_v18  ;;  %10842 = vst [vmem:[#allocation50_spill] sm:$0xff] %v8239_v19  ;;  %v8244_v20 = vld [vmem:[%s10692_s7 + $0x40] sm:$0xff]  ;;  %v8249_v21 = vld [vmem:[%s10692_s7 + $0x48] sm:$0xff] }
  0x44   :  { %10843 = vst [vmem:[#allocation51_spill] sm:$0xff] %v8244_v20  ;;  %10844 = vst [vmem:[#allocation52_spill] sm:$0xff] %v8249_v21  ;;  %v8254_v22 = vld [vmem:[%s10692_s7 + $0x50] sm:$0xff]  ;;  %v8259_v23 = vld [vmem:[%s10692_s7 + $0x58] sm:$0xff] }
  0x45   :  { %10845 = vst [vmem:[#allocation53_spill] sm:$0xff] %v8254_v22  ;;  %10846 = vst [vmem:[#allocation54_spill] sm:$0xff] %v8259_v23  ;;  %v8264_v24 = vld [vmem:[%s10692_s7 + $0x60] sm:$0xff]  ;;  %v8269_v25 = vld [vmem:[%s10692_s7 + $0x68] sm:$0xff] }
  0x46   :  { %10847 = vst [vmem:[#allocation55_spill] sm:$0xff] %v8264_v24  ;;  %10848 = vst [vmem:[#allocation56_spill] sm:$0xff] %v8269_v25  ;;  %v8274_v26 = vld [vmem:[%s10692_s7 + $0x70] sm:$0xff]  ;;  %v8279_v27 = vld [vmem:[%s10692_s7 + $0x78] sm:$0xff] }
  0x47   :  { %10849 = vst [vmem:[#allocation57_spill] sm:$0xff] %v8274_v26  ;;  %10850 = vst [vmem:[#allocation58_spill] sm:$0xff] %v8279_v27  ;;  %v8284_v28 = vld [vmem:[%s10692_s7 + $0x80] sm:$0xff]  ;;  %v8289_v29 = vld [vmem:[%s10692_s7 + $0x88] sm:$0xff] }
  0x48   :  { %10851 = vst [vmem:[#allocation59_spill] sm:$0xff] %v8284_v28  ;;  %10852 = vst [vmem:[#allocation60_spill] sm:$0xff] %v8289_v29  ;;  %v8294_v30 = vld [vmem:[%s10692_s7 + $0x90] sm:$0xff]  ;;  %v8299_v31 = vld [vmem:[%s10692_s7 + $0x98] sm:$0xff] }
  0x49   :  { %10853 = vst [vmem:[#allocation61_spill] sm:$0xff] %v8294_v30  ;;  %10854 = vst [vmem:[#allocation62_spill] sm:$0xff] %v8299_v31  ;;  %v8304_v32 = vld [vmem:[%s10692_s7 + $0xa0] sm:$0xff]  ;;  %v8309_v33 = vld [vmem:[%s10692_s7 + $0xa8] sm:$0xff] }
  0x4a   :  { %10855 = vst [vmem:[#allocation63_spill] sm:$0xff] %v8304_v32  ;;  %10856 = vst [vmem:[#allocation64_spill] sm:$0xff] %v8309_v33  ;;  %v8314_v34 = vld [vmem:[%s10692_s7 + $0xb0] sm:$0xff]  ;;  %v8319_v35 = vld [vmem:[%s10692_s7 + $0xb8] sm:$0xff] }
  0x4b   :  { %10857 = vst [vmem:[#allocation65_spill] sm:$0xff] %v8314_v34  ;;  %10858 = vst [vmem:[#allocation66_spill] sm:$0xff] %v8319_v35  ;;  %v8324_v36 = vld [vmem:[%s10692_s7 + $0xc0] sm:$0xff]  ;;  %v8329_v37 = vld [vmem:[%s10692_s7 + $0xc8] sm:$0xff] }
  0x4c   :  { %10859 = vst [vmem:[#allocation67_spill] sm:$0xff] %v8324_v36  ;;  %10860 = vst [vmem:[#allocation68_spill] sm:$0xff] %v8329_v37  ;;  %v8334_v38 = vld [vmem:[%s10692_s7 + $0xd0] sm:$0xff]  ;;  %v8339_v39 = vld [vmem:[%s10692_s7 + $0xd8] sm:$0xff] }
  0x4d   :  { %10861 = vst [vmem:[#allocation69_spill] sm:$0xff] %v8334_v38  ;;  %v8344_v40 = vld [vmem:[%s10692_s7 + $0xe0] sm:$0xff]  ;;  %v8349_v41 = vld [vmem:[%s10692_s7 + $0xe8] sm:$0xff]  ;;  %v8354_v42 = vld [vmem:[%s10692_s7 + $0xf0] sm:$0xff] }
  0x4e   :  { %v8359_v43 = vld [vmem:[%s10692_s7 + $0xf8] sm:$0xff]  ;;  %v8364_v44 = vld [vmem:[%s10692_s7 + $0x100] sm:$0xff]  ;;  %v8369_v45 = vld [vmem:[%s10692_s7 + $0x108] sm:$0xff] }
  0x4f   :  { %v8374_v46 = vld [vmem:[%s10692_s7 + $0x110] sm:$0xff]  ;;  %v8379_v47 = vld [vmem:[%s10692_s7 + $0x118] sm:$0xff]  ;;  %v8384_v48 = vld [vmem:[%s10692_s7 + $0x120] sm:$0xff] }
  0x50   :  { %v8389_v49 = vld [vmem:[%s10692_s7 + $0x128] sm:$0xff]  ;;  %v8394_v50 = vld [vmem:[%s10692_s7 + $0x130] sm:$0xff]  ;;  %v8399_v51 = vld [vmem:[%s10692_s7 + $0x138] sm:$0xff] }
  0x51   :  { %10862 = vst [vmem:[#allocation70_spill] sm:$0xff] %v8389_v49  ;;  %10863 = vst [vmem:[#allocation71_spill] sm:$0xff] %v8394_v50  ;;  %v8404_v52 = vld [vmem:[%s10692_s7 + $0x140] sm:$0xff]  ;;  %v8409_v53 = vld [vmem:[%s10692_s7 + $0x148] sm:$0xff] }
  0x52   :  { %10864 = vst [vmem:[#allocation72_spill] sm:$0xff] %v8399_v51  ;;  %10865 = vst [vmem:[#allocation73_spill] sm:$0xff] %v8404_v52  ;;  %v8414_v54 = vld [vmem:[%s10692_s7 + $0x150] sm:$0xff]  ;;  %v8419_v55 = vld [vmem:[%s10692_s7 + $0x158] sm:$0xff] }
  0x53   :  { %10866 = vst [vmem:[#allocation74_spill] sm:$0xff] %v8409_v53  ;;  %10867 = vst [vmem:[#allocation75_spill] sm:$0xff] %v8414_v54  ;;  %v8424_v56 = vld [vmem:[%s10692_s7 + $0x160] sm:$0xff]  ;;  %v8429_v57 = vld [vmem:[%s10692_s7 + $0x168] sm:$0xff] }
  0x54   :  { %10868 = vst [vmem:[#allocation76_spill] sm:$0xff] %v8419_v55  ;;  %10869 = vst [vmem:[#allocation77_spill] sm:$0xff] %v8424_v56  ;;  %v8434_v58 = vld [vmem:[%s10692_s7 + $0x170] sm:$0xff]  ;;  %v8439_v59 = vld [vmem:[%s10692_s7 + $0x178] sm:$0xff] }
  0x55   :  { %10870 = vst [vmem:[#allocation78_spill] sm:$0xff] %v8429_v57  ;;  %10871 = vst [vmem:[#allocation79_spill] sm:$0xff] %v8434_v58  ;;  %v8444_v60 = vld [vmem:[%s10692_s7 + $0x180] sm:$0xff]  ;;  %v8449_v61 = vld [vmem:[%s10692_s7 + $0x188] sm:$0xff] }
  0x56   :  { %10872 = vst [vmem:[#allocation80_spill] sm:$0xff] %v8439_v59  ;;  %10873 = vst [vmem:[#allocation81_spill] sm:$0xff] %v8444_v60  ;;  %v8454_v62 = vld [vmem:[%s10692_s7 + $0x190] sm:$0xff]  ;;  %v8459_v63 = vld [vmem:[%s10692_s7 + $0x198] sm:$0xff] }
  0x57   :  { %10874 = vst [vmem:[#allocation82_spill] sm:$0xff] %v8449_v61  ;;  %10875 = vst [vmem:[#allocation83_spill] sm:$0xff] %v8454_v62  ;;  %v8464_v38 = vld [vmem:[%s10692_s7 + $0x1a0] sm:$0xff]  ;;  %v8469_v36 = vld [vmem:[%s10692_s7 + $0x1a8] sm:$0xff] }
  0x58   :  { %10876 = vst [vmem:[#allocation84_spill] sm:$0xff] %v8459_v63  ;;  %10877 = vst [vmem:[#allocation85_spill] sm:$0xff] %v8464_v38  ;;  %v8474_v37 = vld [vmem:[%s10692_s7 + $0x1b0] sm:$0xff]  ;;  %v8479_v34 = vld [vmem:[%s10692_s7 + $0x1b8] sm:$0xff] }
  0x59   :  { %10878 = vst [vmem:[#allocation86_spill] sm:$0xff] %v8469_v36  ;;  %10879 = vst [vmem:[#allocation87_spill] sm:$0xff] %v8474_v37  ;;  %v8484_v35 = vld [vmem:[%s10692_s7 + $0x1c0] sm:$0xff]  ;;  %v8489_v32 = vld [vmem:[%s10692_s7 + $0x1c8] sm:$0xff] }
  0x5a   :  { %10880 = vst [vmem:[#allocation88_spill] sm:$0xff] %v8479_v34  ;;  %10881 = vst [vmem:[#allocation89_spill] sm:$0xff] %v8484_v35  ;;  %v8494_v33 = vld [vmem:[%s10692_s7 + $0x1d0] sm:$0xff]  ;;  %v8499_v37 = vld [vmem:[%s10692_s7 + $0x1d8] sm:$0xff] }
  0x5b   :  { %10882 = vst [vmem:[#allocation90_spill] sm:$0xff] %v8489_v32  ;;  %10883 = vst [vmem:[#allocation91_spill] sm:$0xff] %v8494_v33  ;;  %v8504_v34 = vld [vmem:[%s10692_s7 + $0x1e0] sm:$0xff]  ;;  %v8509_v35 = vld [vmem:[%s10692_s7 + $0x1e8] sm:$0xff] }
  0x5c   :  { %10884 = vst [vmem:[#allocation92_spill] sm:$0xff] %v8499_v37  ;;  %10885 = vst [vmem:[#allocation93_spill] sm:$0xff] %v8504_v34  ;;  %v8514_v32 = vld [vmem:[%s10692_s7 + $0x1f0] sm:$0xff]  ;;  %v8519_v33 = vld [vmem:[%s10692_s7 + $0x1f8] sm:$0xff] }
  0x5d   :  { %10886 = vst [vmem:[#allocation94_spill] sm:$0xff] %v8509_v35  ;;  %10887 = vst [vmem:[#allocation95_spill] sm:$0xff] %v8514_v32  ;;  %v8524_v37 = vld [vmem:[%s10692_s7 + $0x200] sm:$0xff]  ;;  %v8529_v34 = vld [vmem:[%s10692_s7 + $0x208] sm:$0xff] }
  0x5e   :  { %10888 = vst [vmem:[#allocation96_spill] sm:$0xff] %v8519_v33  ;;  %10889 = vst [vmem:[#allocation97_spill] sm:$0xff] %v8524_v37  ;;  %v8534_v35 = vld [vmem:[%s10692_s7 + $0x210] sm:$0xff]  ;;  %v8539_v32 = vld [vmem:[%s10692_s7 + $0x218] sm:$0xff] }
  0x5f   :  { %10890 = vst [vmem:[#allocation98_spill] sm:$0xff] %v8529_v34  ;;  %10891 = vst [vmem:[#allocation99_spill] sm:$0xff] %v8534_v35  ;;  %v8544_v33 = vld [vmem:[%s10692_s7 + $0x220] sm:$0xff]  ;;  %v8549_v37 = vld [vmem:[%s10692_s7 + $0x228] sm:$0xff] }
  0x60   :  { %10892 = vst [vmem:[#allocation100_spill] sm:$0xff] %v8539_v32  ;;  %10893 = vst [vmem:[#allocation101_spill] sm:$0xff] %v8544_v33  ;;  %v8554_v34 = vld [vmem:[%s10692_s7 + $0x230] sm:$0xff]  ;;  %v8559_v35 = vld [vmem:[%s10692_s7 + $0x238] sm:$0xff] }
  0x61   :  { %10894 = vst [vmem:[#allocation102_spill] sm:$0xff] %v8549_v37  ;;  %10895 = vst [vmem:[#allocation103_spill] sm:$0xff] %v8554_v34  ;;  %v8564_v32 = vld [vmem:[%s10692_s7 + $0x240] sm:$0xff]  ;;  %v8569_v33 = vld [vmem:[%s10692_s7 + $0x248] sm:$0xff] }
  0x62   :  { %10896 = vst [vmem:[#allocation104_spill] sm:$0xff] %v8559_v35  ;;  %10897 = vst [vmem:[#allocation105_spill] sm:$0xff] %v8564_v32  ;;  %v8574_v37 = vld [vmem:[%s10692_s7 + $0x250] sm:$0xff]  ;;  %v8579_v34 = vld [vmem:[%s10692_s7 + $0x258] sm:$0xff] }
  0x63   :  { %10898 = vst [vmem:[#allocation106_spill] sm:$0xff] %v8569_v33  ;;  %10899 = vst [vmem:[#allocation107_spill] sm:$0xff] %v8574_v37  ;;  %v8584_v35 = vld [vmem:[%s10692_s7 + $0x260] sm:$0xff]  ;;  %v8589_v32 = vld [vmem:[%s10692_s7 + $0x268] sm:$0xff] }
  0x64   :  { %10900 = vst [vmem:[#allocation108_spill] sm:$0xff] %v8579_v34  ;;  %10901 = vst [vmem:[#allocation109_spill] sm:$0xff] %v8584_v35  ;;  %v8594_v33 = vld [vmem:[%s10692_s7 + $0x270] sm:$0xff]  ;;  %v8599_v37 = vld [vmem:[%s10692_s7 + $0x278] sm:$0xff] }
  0x65   :  { %10902 = vst [vmem:[#allocation110_spill] sm:$0xff] %v8589_v32  ;;  %10903 = vst [vmem:[#allocation111_spill] sm:$0xff] %v8594_v33  ;;  %v8604_v34 = vld [vmem:[%s10692_s7 + $0x280] sm:$0xff]  ;;  %v8609_v35 = vld [vmem:[%s10692_s7 + $0x288] sm:$0xff] }
  0x66   :  { %10904 = vst [vmem:[#allocation112_spill] sm:$0xff] %v8599_v37  ;;  %10905 = vst [vmem:[#allocation113_spill] sm:$0xff] %v8604_v34  ;;  %v8614_v32 = vld [vmem:[%s10692_s7 + $0x290] sm:$0xff]  ;;  %v8619_v33 = vld [vmem:[%s10692_s7 + $0x298] sm:$0xff] }
  0x67   :  { %10906 = vst [vmem:[#allocation114_spill] sm:$0xff] %v8609_v35  ;;  %10907 = vst [vmem:[#allocation115_spill] sm:$0xff] %v8614_v32  ;;  %v8624_v37 = vld [vmem:[%s10692_s7 + $0x2a0] sm:$0xff]  ;;  %v8629_v34 = vld [vmem:[%s10692_s7 + $0x2a8] sm:$0xff] }
  0x68   :  { %10908 = vst [vmem:[#allocation116_spill] sm:$0xff] %v8619_v33  ;;  %10909 = vst [vmem:[#allocation117_spill] sm:$0xff] %v8624_v37  ;;  %v8634_v35 = vld [vmem:[%s10692_s7 + $0x2b0] sm:$0xff]  ;;  %v8639_v32 = vld [vmem:[%s10692_s7 + $0x2b8] sm:$0xff] }
  0x69   :  { %10910 = vst [vmem:[#allocation118_spill] sm:$0xff] %v8629_v34  ;;  %10911 = vst [vmem:[#allocation119_spill] sm:$0xff] %v8634_v35  ;;  %v8644_v33 = vld [vmem:[%s10692_s7 + $0x2c0] sm:$0xff]  ;;  %v8649_v37 = vld [vmem:[%s10692_s7 + $0x2c8] sm:$0xff] }
  0x6a   :  { %10912 = vst [vmem:[#allocation120_spill] sm:$0xff] %v8639_v32  ;;  %10913 = vst [vmem:[#allocation121_spill] sm:$0xff] %v8644_v33  ;;  %v8654_v34 = vld [vmem:[%s10692_s7 + $0x2d0] sm:$0xff]  ;;  %v8659_v35 = vld [vmem:[%s10692_s7 + $0x2d8] sm:$0xff] }
  0x6b   :  { %10914 = vst [vmem:[#allocation122_spill] sm:$0xff] %v8649_v37  ;;  %10915 = vst [vmem:[#allocation123_spill] sm:$0xff] %v8654_v34  ;;  %v8664_v32 = vld [vmem:[%s10692_s7 + $0x2e0] sm:$0xff]  ;;  %v8669_v33 = vld [vmem:[%s10692_s7 + $0x2e8] sm:$0xff] }
  0x6c   :  { %10916 = vst [vmem:[#allocation124_spill] sm:$0xff] %v8659_v35  ;;  %10917 = vst [vmem:[#allocation125_spill] sm:$0xff] %v8664_v32  ;;  %v8674_v37 = vld [vmem:[%s10692_s7 + $0x2f0] sm:$0xff]  ;;  %v8679_v34 = vld [vmem:[%s10692_s7 + $0x2f8] sm:$0xff] }
  0x6d   :  { %10918 = vst [vmem:[#allocation126_spill] sm:$0xff] %v8669_v33  ;;  %10919 = vst [vmem:[#allocation127_spill] sm:$0xff] %v8674_v37  ;;  %v8684_v35 = vld [vmem:[%s10692_s7 + $0x300] sm:$0xff]  ;;  %v8689_v32 = vld [vmem:[%s10692_s7 + $0x308] sm:$0xff] }
  0x6e   :  { %10920 = vst [vmem:[#allocation128_spill] sm:$0xff] %v8679_v34  ;;  %10921 = vst [vmem:[#allocation129_spill] sm:$0xff] %v8684_v35  ;;  %v8694_v33 = vld [vmem:[%s10692_s7 + $0x310] sm:$0xff]  ;;  %v8699_v37 = vld [vmem:[%s10692_s7 + $0x318] sm:$0xff] }
  0x6f   :  { %10922 = vst [vmem:[#allocation130_spill] sm:$0xff] %v8689_v32  ;;  %10923 = vst [vmem:[#allocation131_spill] sm:$0xff] %v8694_v33  ;;  %v8704_v34 = vld [vmem:[%s10692_s7 + $0x320] sm:$0xff]  ;;  %v8709_v35 = vld [vmem:[%s10692_s7 + $0x328] sm:$0xff] }
  0x70   :  { %10924 = vst [vmem:[#allocation132_spill] sm:$0xff] %v8699_v37  ;;  %10925 = vst [vmem:[#allocation133_spill] sm:$0xff] %v8704_v34  ;;  %v8714_v32 = vld [vmem:[%s10692_s7 + $0x330] sm:$0xff]  ;;  %v8719_v33 = vld [vmem:[%s10692_s7 + $0x338] sm:$0xff] }
  0x71   :  { %10926 = vst [vmem:[#allocation134_spill] sm:$0xff] %v8709_v35  ;;  %10927 = vst [vmem:[#allocation135_spill] sm:$0xff] %v8714_v32  ;;  %v8724_v37 = vld [vmem:[%s10692_s7 + $0x340] sm:$0xff]  ;;  %v8729_v34 = vld [vmem:[%s10692_s7 + $0x348] sm:$0xff] }
  0x72   :  { %10928 = vst [vmem:[#allocation136_spill] sm:$0xff] %v8719_v33  ;;  %10929 = vst [vmem:[#allocation137_spill] sm:$0xff] %v8724_v37  ;;  %v8734_v35 = vld [vmem:[%s10692_s7 + $0x350] sm:$0xff]  ;;  %v8739_v32 = vld [vmem:[%s10692_s7 + $0x358] sm:$0xff] }
  0x73   :  { %10930 = vst [vmem:[#allocation138_spill] sm:$0xff] %v8729_v34  ;;  %10931 = vst [vmem:[#allocation139_spill] sm:$0xff] %v8734_v35 }
  0x74   :  { %10932 = vst [vmem:[#allocation140_spill] sm:$0xff] %v8739_v32 }
  0x75   :  { %391 = vsyncadd [#allocation8 + $0x1], 13824  ;;  %v8744_v33 = vld [vmem:[%s10693_s8] sm:$0xff]  ;;  %v8749_v34 = vld [vmem:[%s10693_s8 + $0x8] sm:$0xff] }
  0x76   :  { %10933 = vst [vmem:[#allocation141_spill] sm:$0xff] %v8744_v33  ;;  %10934 = vst [vmem:[#allocation142_spill] sm:$0xff] %v8749_v34  ;;  %v8754_v35 = vld [vmem:[%s10693_s8 + $0x10] sm:$0xff]  ;;  %v8759_v32 = vld [vmem:[%s10693_s8 + $0x18] sm:$0xff] }
  0x77   :  { %10935 = vst [vmem:[#allocation143_spill] sm:$0xff] %v8754_v35  ;;  %10936 = vst [vmem:[#allocation144_spill] sm:$0xff] %v8759_v32  ;;  %v8764_v37 = vld [vmem:[%s10693_s8 + $0x20] sm:$0xff]  ;;  %v8769_v33 = vld [vmem:[%s10693_s8 + $0x28] sm:$0xff] }
  0x78   :  { %10937 = vst [vmem:[#allocation145_spill] sm:$0xff] %v8764_v37  ;;  %10938 = vst [vmem:[#allocation146_spill] sm:$0xff] %v8769_v33 }
  0x79   :  { %444 = vsyncadd [#allocation8 + $0x2], 768  ;;  %v8774_v35 = vld [vmem:[%s10694_s9] sm:$0xff]  ;;  %v8779_v32 = vld [vmem:[%s10694_s9 + $0x8] sm:$0xff] }
  0x7a   :  { %10939 = vst [vmem:[#allocation147_spill] sm:$0xff] %v8774_v35  ;;  %10940 = vst [vmem:[#allocation148_spill] sm:$0xff] %v8779_v32  ;;  %v8784_v37 = vld [vmem:[%s10694_s9 + $0x10] sm:$0xff]  ;;  %v8789_v33 = vld [vmem:[%s10694_s9 + $0x18] sm:$0xff] }
  0x7b   :  { %10941 = vst [vmem:[#allocation149_spill] sm:$0xff] %v8784_v37  ;;  %10942 = vst [vmem:[#allocation150_spill] sm:$0xff] %v8789_v33  ;;  %v8794_v34 = vld [vmem:[%s10694_s9 + $0x20] sm:$0xff]  ;;  %v8799_v35 = vld [vmem:[%s10694_s9 + $0x28] sm:$0xff] }
  0x7c   :  { %10943 = vst [vmem:[#allocation151_spill] sm:$0xff] %v8794_v34  ;;  %10944 = vst [vmem:[#allocation152_spill] sm:$0xff] %v8799_v35  ;;  %v8804_v32 = vld [vmem:[%s10694_s9 + $0x30] sm:$0xff]  ;;  %v8809_v37 = vld [vmem:[%s10694_s9 + $0x38] sm:$0xff] }
  0x7d   :  { %10945 = vst [vmem:[#allocation153_spill] sm:$0xff] %v8804_v32  ;;  %10946 = vst [vmem:[#allocation154_spill] sm:$0xff] %v8809_v37  ;;  %v8814_v33 = vld [vmem:[%s10694_s9 + $0x40] sm:$0xff]  ;;  %v8819_v34 = vld [vmem:[%s10694_s9 + $0x48] sm:$0xff] }
  0x7e   :  { %10947 = vst [vmem:[#allocation155_spill] sm:$0xff] %v8814_v33  ;;  %10948 = vst [vmem:[#allocation156_spill] sm:$0xff] %v8819_v34  ;;  %v8824_v35 = vld [vmem:[%s10694_s9 + $0x50] sm:$0xff]  ;;  %v8829_v32 = vld [vmem:[%s10694_s9 + $0x58] sm:$0xff] }
  0x7f   :  { %10949 = vst [vmem:[#allocation157_spill] sm:$0xff] %v8824_v35  ;;  %10950 = vst [vmem:[#allocation158_spill] sm:$0xff] %v8829_v32  ;;  %v8834_v37 = vld [vmem:[%s10694_s9 + $0x60] sm:$0xff]  ;;  %v8839_v33 = vld [vmem:[%s10694_s9 + $0x68] sm:$0xff] }
  0x80   :  { %10951 = vst [vmem:[#allocation159_spill] sm:$0xff] %v8834_v37  ;;  %10952 = vst [vmem:[#allocation160_spill] sm:$0xff] %v8839_v33  ;;  %v8844_v34 = vld [vmem:[%s10694_s9 + $0x70] sm:$0xff]  ;;  %v8849_v35 = vld [vmem:[%s10694_s9 + $0x78] sm:$0xff] }
  0x81   :  { %10953 = vst [vmem:[#allocation161_spill] sm:$0xff] %v8844_v34  ;;  %10954 = vst [vmem:[#allocation162_spill] sm:$0xff] %v8849_v35  ;;  %v8854_v32 = vld [vmem:[%s10694_s9 + $0x80] sm:$0xff]  ;;  %v8859_v37 = vld [vmem:[%s10694_s9 + $0x88] sm:$0xff] }
  0x82   :  { %10955 = vst [vmem:[#allocation163_spill] sm:$0xff] %v8854_v32  ;;  %10956 = vst [vmem:[#allocation164_spill] sm:$0xff] %v8859_v37  ;;  %v8864_v33 = vld [vmem:[%s10694_s9 + $0x90] sm:$0xff]  ;;  %v8869_v34 = vld [vmem:[%s10694_s9 + $0x98] sm:$0xff] }
  0x83   :  { %10957 = vst [vmem:[#allocation165_spill] sm:$0xff] %v8864_v33  ;;  %10958 = vst [vmem:[#allocation166_spill] sm:$0xff] %v8869_v34  ;;  %v8874_v35 = vld [vmem:[%s10694_s9 + $0xa0] sm:$0xff]  ;;  %v8879_v32 = vld [vmem:[%s10694_s9 + $0xa8] sm:$0xff] }
  0x84   :  { %10959 = vst [vmem:[#allocation167_spill] sm:$0xff] %v8874_v35  ;;  %10960 = vst [vmem:[#allocation168_spill] sm:$0xff] %v8879_v32  ;;  %v8884_v37 = vld [vmem:[%s10694_s9 + $0xb0] sm:$0xff]  ;;  %v8889_v33 = vld [vmem:[%s10694_s9 + $0xb8] sm:$0xff] }
  0x85   :  { %10961 = vst [vmem:[#allocation169_spill] sm:$0xff] %v8884_v37  ;;  %10962 = vst [vmem:[#allocation170_spill] sm:$0xff] %v8889_v33  ;;  %v8894_v34 = vld [vmem:[%s10694_s9 + $0xc0] sm:$0xff]  ;;  %v8899_v35 = vld [vmem:[%s10694_s9 + $0xc8] sm:$0xff] }
  0x86   :  { %10963 = vst [vmem:[#allocation171_spill] sm:$0xff] %v8894_v34  ;;  %10964 = vst [vmem:[#allocation172_spill] sm:$0xff] %v8899_v35  ;;  %v8904_v32 = vld [vmem:[%s10694_s9 + $0xd0] sm:$0xff]  ;;  %v8909_v37 = vld [vmem:[%s10694_s9 + $0xd8] sm:$0xff] }
  0x87   :  { %10965 = vst [vmem:[#allocation173_spill] sm:$0xff] %v8904_v32  ;;  %10966 = vst [vmem:[#allocation174_spill] sm:$0xff] %v8909_v37  ;;  %v8914_v33 = vld [vmem:[%s10694_s9 + $0xe0] sm:$0xff]  ;;  %v8919_v34 = vld [vmem:[%s10694_s9 + $0xe8] sm:$0xff] }
  0x88   :  { %10967 = vst [vmem:[#allocation175_spill] sm:$0xff] %v8914_v33  ;;  %10968 = vst [vmem:[#allocation176_spill] sm:$0xff] %v8919_v34  ;;  %v8924_v35 = vld [vmem:[%s10694_s9 + $0xf0] sm:$0xff]  ;;  %v8929_v32 = vld [vmem:[%s10694_s9 + $0xf8] sm:$0xff] }
  0x89   :  { %10969 = vst [vmem:[#allocation177_spill] sm:$0xff] %v8924_v35  ;;  %10970 = vst [vmem:[#allocation178_spill] sm:$0xff] %v8929_v32  ;;  %v8934_v37 = vld [vmem:[%s10694_s9 + $0x100] sm:$0xff]  ;;  %v8939_v33 = vld [vmem:[%s10694_s9 + $0x108] sm:$0xff] }
  0x8a   :  { %10971 = vst [vmem:[#allocation179_spill] sm:$0xff] %v8934_v37  ;;  %10972 = vst [vmem:[#allocation180_spill] sm:$0xff] %v8939_v33  ;;  %v8944_v34 = vld [vmem:[%s10694_s9 + $0x110] sm:$0xff]  ;;  %v8949_v35 = vld [vmem:[%s10694_s9 + $0x118] sm:$0xff] }
  0x8b   :  { %10973 = vst [vmem:[#allocation181_spill] sm:$0xff] %v8944_v34  ;;  %10974 = vst [vmem:[#allocation182_spill] sm:$0xff] %v8949_v35  ;;  %v8954_v32 = vld [vmem:[%s10694_s9 + $0x120] sm:$0xff]  ;;  %v8959_v37 = vld [vmem:[%s10694_s9 + $0x128] sm:$0xff] }
  0x8c   :  { %10975 = vst [vmem:[#allocation183_spill] sm:$0xff] %v8954_v32  ;;  %10976 = vst [vmem:[#allocation184_spill] sm:$0xff] %v8959_v37  ;;  %v8964_v33 = vld [vmem:[%s10694_s9 + $0x130] sm:$0xff]  ;;  %v8969_v34 = vld [vmem:[%s10694_s9 + $0x138] sm:$0xff] }
  0x8d   :  { %10977 = vst [vmem:[#allocation185_spill] sm:$0xff] %v8964_v33  ;;  %10978 = vst [vmem:[#allocation186_spill] sm:$0xff] %v8969_v34  ;;  %v8974_v35 = vld [vmem:[%s10694_s9 + $0x140] sm:$0xff]  ;;  %v8979_v32 = vld [vmem:[%s10694_s9 + $0x148] sm:$0xff] }
  0x8e   :  { %10979 = vst [vmem:[#allocation187_spill] sm:$0xff] %v8974_v35  ;;  %10980 = vst [vmem:[#allocation188_spill] sm:$0xff] %v8979_v32  ;;  %v8984_v37 = vld [vmem:[%s10694_s9 + $0x150] sm:$0xff]  ;;  %v8989_v33 = vld [vmem:[%s10694_s9 + $0x158] sm:$0xff] }
  0x8f   :  { %10981 = vst [vmem:[#allocation189_spill] sm:$0xff] %v8984_v37  ;;  %10982 = vst [vmem:[#allocation190_spill] sm:$0xff] %v8989_v33  ;;  %v8994_v34 = vld [vmem:[%s10694_s9 + $0x160] sm:$0xff]  ;;  %v8999_v35 = vld [vmem:[%s10694_s9 + $0x168] sm:$0xff] }
  0x90   :  { %10983 = vst [vmem:[#allocation191_spill] sm:$0xff] %v8994_v34  ;;  %10984 = vst [vmem:[#allocation192_spill] sm:$0xff] %v8999_v35  ;;  %v9004_v32 = vld [vmem:[%s10694_s9 + $0x170] sm:$0xff]  ;;  %v9009_v37 = vld [vmem:[%s10694_s9 + $0x178] sm:$0xff] }
  0x91   :  { %10985 = vst [vmem:[#allocation193_spill] sm:$0xff] %v9004_v32  ;;  %10986 = vst [vmem:[#allocation194_spill] sm:$0xff] %v9009_v37  ;;  %v9014_v33 = vld [vmem:[%s10694_s9 + $0x180] sm:$0xff]  ;;  %v9019_v34 = vld [vmem:[%s10694_s9 + $0x188] sm:$0xff] }
  0x92   :  { %10987 = vst [vmem:[#allocation195_spill] sm:$0xff] %v9014_v33  ;;  %10988 = vst [vmem:[#allocation196_spill] sm:$0xff] %v9019_v34  ;;  %v9024_v35 = vld [vmem:[%s10694_s9 + $0x190] sm:$0xff]  ;;  %v9029_v32 = vld [vmem:[%s10694_s9 + $0x198] sm:$0xff] }
  0x93   :  { %10989 = vst [vmem:[#allocation197_spill] sm:$0xff] %v9024_v35  ;;  %10990 = vst [vmem:[#allocation198_spill] sm:$0xff] %v9029_v32  ;;  %v9034_v37 = vld [vmem:[%s10694_s9 + $0x1a0] sm:$0xff]  ;;  %v9039_v33 = vld [vmem:[%s10694_s9 + $0x1a8] sm:$0xff] }
  0x94   :  { %10991 = vst [vmem:[#allocation199_spill] sm:$0xff] %v9034_v37  ;;  %10992 = vst [vmem:[#allocation200_spill] sm:$0xff] %v9039_v33  ;;  %v9044_v34 = vld [vmem:[%s10694_s9 + $0x1b0] sm:$0xff]  ;;  %v9049_v35 = vld [vmem:[%s10694_s9 + $0x1b8] sm:$0xff] }
  0x95   :  { %10993 = vst [vmem:[#allocation201_spill] sm:$0xff] %v9044_v34  ;;  %10994 = vst [vmem:[#allocation202_spill] sm:$0xff] %v9049_v35  ;;  %v9054_v32 = vld [vmem:[%s10694_s9 + $0x1c0] sm:$0xff]  ;;  %v9059_v37 = vld [vmem:[%s10694_s9 + $0x1c8] sm:$0xff] }
  0x96   :  { %10995 = vst [vmem:[#allocation203_spill] sm:$0xff] %v9054_v32  ;;  %10996 = vst [vmem:[#allocation204_spill] sm:$0xff] %v9059_v37  ;;  %v9064_v33 = vld [vmem:[%s10694_s9 + $0x1d0] sm:$0xff]  ;;  %v9069_v34 = vld [vmem:[%s10694_s9 + $0x1d8] sm:$0xff] }
  0x97   :  { %10997 = vst [vmem:[#allocation205_spill] sm:$0xff] %v9064_v33  ;;  %10998 = vst [vmem:[#allocation206_spill] sm:$0xff] %v9069_v34 }
  0x98   :  { %605 = vsyncadd [#allocation8 + $0x3], 7680  ;;  %v639_v32 = vld [vmem:[%s10695_s10] sm:$0xff]  ;;  %v641_v35 = vld [vmem:[%s10695_s10 + $0x8] sm:$0xff] }
  0x99   :  { %640 = vst [vmem:[#allocation6] sm:$0xff] %v639_v32  ;;  %642 = vst [vmem:[#allocation6 + $0x8] sm:$0xff] %v641_v35  ;;  %v643_v33 = vld [vmem:[%s10695_s10 + $0x10] sm:$0xff]  ;;  %v645_v37 = vld [vmem:[%s10695_s10 + $0x18] sm:$0xff] }
  0x9a   :  { %v647_v34 = vld [vmem:[%s10695_s10 + $0x20] sm:$0xff]  ;;  %644 = vst [vmem:[#allocation6 + $0x10] sm:$0xff] %v643_v33  ;;  %646 = vst [vmem:[#allocation6 + $0x18] sm:$0xff] %v645_v37  ;;  %v649_v32 = vld [vmem:[%s10695_s10 + $0x28] sm:$0xff] }
  0x9b   :  { %648 = vst [vmem:[#allocation6 + $0x20] sm:$0xff] %v647_v34  ;;  %v651_v35 = vld [vmem:[%s10695_s10 + $0x30] sm:$0xff]  ;;  %v653_v30 = vld [vmem:[%s10695_s10 + $0x38] sm:$0xff]  ;;  %650 = vst [vmem:[#allocation6 + $0x28] sm:$0xff] %v649_v32 }
  0x9c   :  { %652 = vst [vmem:[#allocation6 + $0x30] sm:$0xff] %v651_v35  ;;  %654 = vst [vmem:[#allocation6 + $0x38] sm:$0xff] %v653_v30  ;;  %v655_v33 = vld [vmem:[%s10695_s10 + $0x40] sm:$0xff]  ;;  %v657_v34 = vld [vmem:[%s10695_s10 + $0x48] sm:$0xff] }
  0x9d   :  { %v659_v37 = vld [vmem:[%s10695_s10 + $0x50] sm:$0xff]  ;;  %656 = vst [vmem:[#allocation6 + $0x40] sm:$0xff] %v655_v33  ;;  %658 = vst [vmem:[#allocation6 + $0x48] sm:$0xff] %v657_v34  ;;  %v661_v32 = vld [vmem:[%s10695_s10 + $0x58] sm:$0xff] }
  0x9e   :  { %660 = vst [vmem:[#allocation6 + $0x50] sm:$0xff] %v659_v37  ;;  %v663_v30 = vld [vmem:[%s10695_s10 + $0x60] sm:$0xff]  ;;  %v665_v35 = vld [vmem:[%s10695_s10 + $0x68] sm:$0xff]  ;;  %662 = vst [vmem:[#allocation6 + $0x58] sm:$0xff] %v661_v32 }
  0x9f   :  { %664 = vst [vmem:[#allocation6 + $0x60] sm:$0xff] %v663_v30  ;;  %666 = vst [vmem:[#allocation6 + $0x68] sm:$0xff] %v665_v35  ;;  %v667_v33 = vld [vmem:[%s10695_s10 + $0x70] sm:$0xff] }
  0xa0   :  { %668 = vst [vmem:[#allocation6 + $0x70] sm:$0xff] %v667_v33 }
  0xa1   :  { %676 = vsyncadd [#allocation8 + $0x4], 1920  ;;  %v695_v34 = vld [vmem:[%s10696_s11] sm:$0xf]  ;;  %v697_v37 = vld [vmem:[%s10696_s11 + $0x8] sm:$0xf] }
  0xa2   :  { %696 = vst [vmem:[#allocation7] sm:$0xf] %v695_v34  ;;  %698 = vst [vmem:[#allocation7 + $0x4] sm:$0xf] %v697_v37  ;;  %v701_v32 = vld [vmem:[%s10696_s11 + $0xc] sm:$0xff]   ;;  %v709_v35 = vld [vmem:[%s10696_s11 + $0x1c] sm:$0xff]  }
  0xa3   :  { %v705_v30 = vld [vmem:[%s10696_s11 + $0x18] sm:$0xf]  ;;  %702 = vst [vmem:[#allocation7 + $0xc] sm:$0xff] %v701_v32   ;;  %v713_v33 = vld [vmem:[%s10696_s11 + $0x28] sm:$0xf]  ;;  %710 = vst [vmem:[#allocation7 + $0x1c] sm:$0xff] %v709_v35  }
  0xa4   :  { %706 = vst [vmem:[#allocation7 + $0x14] sm:$0xf] %v705_v30  ;;  %714 = vst [vmem:[#allocation7 + $0x24] sm:$0xf] %v713_v33  ;;  %v717_v34 = vld [vmem:[%s10696_s11 + $0x2c] sm:$0xff]   ;;  %v725_v32 = vld [vmem:[%s10696_s11 + $0x3c] sm:$0xff]  }
  0xa5   :  { %v721_v37 = vld [vmem:[%s10696_s11 + $0x38] sm:$0xf]  ;;  %718 = vst [vmem:[#allocation7 + $0x2c] sm:$0xff] %v717_v34   ;;  %v729_v30 = vld [vmem:[%s10696_s11 + $0x48] sm:$0xf]  ;;  %726 = vst [vmem:[#allocation7 + $0x3c] sm:$0xff] %v725_v32  }
  0xa6   :  { %722 = vst [vmem:[#allocation7 + $0x34] sm:$0xf] %v721_v37  ;;  %730 = vst [vmem:[#allocation7 + $0x44] sm:$0xf] %v729_v30  ;;  %v733_v35 = vld [vmem:[%s10696_s11 + $0x4c] sm:$0xff]   ;;  %v741_v34 = vld [vmem:[%s10696_s11 + $0x5c] sm:$0xff]  }
  0xa7   :  { %v737_v33 = vld [vmem:[%s10696_s11 + $0x58] sm:$0xf]  ;;  %734 = vst [vmem:[#allocation7 + $0x4c] sm:$0xff] %v733_v35   ;;  %742 = vst [vmem:[#allocation7 + $0x5c] sm:$0xff] %v741_v34   ;;  %v749_v37 = vld [vmem:[%s10696_s11 + $0x6c] sm:$0xff]  }
  0xa8   :  { %738 = vst [vmem:[#allocation7 + $0x54] sm:$0xf] %v737_v33  ;;  %v753_v32 = vld [vmem:[%s10696_s11 + $0x78] sm:$0xf]  ;;  %750 = vst [vmem:[#allocation7 + $0x6c] sm:$0xff] %v749_v37   ;;  %v757_v30 = vld [vmem:[%s10696_s11 + $0x7c] sm:$0xff]  }
  0xa9   :  { %754 = vst [vmem:[#allocation7 + $0x74] sm:$0xf] %v753_v32  ;;  %v761_v35 = vld [vmem:[%s10696_s11 + $0x88] sm:$0xf]  ;;  %758 = vst [vmem:[#allocation7 + $0x7c] sm:$0xff] %v757_v30   ;;  %v765_v33 = vld [vmem:[%s10696_s11 + $0x8c] sm:$0xff]  }
  0xaa   :  { %762 = vst [vmem:[#allocation7 + $0x84] sm:$0xf] %v761_v35  ;;  %v769_v34 = vld [vmem:[%s10696_s11 + $0x98] sm:$0xf]  ;;  %766 = vst [vmem:[#allocation7 + $0x8c] sm:$0xff] %v765_v33   ;;  %v773_v37 = vld [vmem:[%s10696_s11 + $0x9c] sm:$0xff]  }
  0xab   :  { %770 = vst [vmem:[#allocation7 + $0x94] sm:$0xf] %v769_v34  ;;  %774 = vst [vmem:[#allocation7 + $0x9c] sm:$0xff] %v773_v37   ;;  %v781_v32 = vld [vmem:[%s10696_s11 + $0xac] sm:$0xff]   ;;  %v785_v30 = vld [vmem:[%s10696_s11 + $0xb8] sm:$0xf] }
  0xac   :  { %782 = vst [vmem:[#allocation7 + $0xac] sm:$0xff] %v781_v32   ;;  %786 = vst [vmem:[#allocation7 + $0xb4] sm:$0xf] %v785_v30  ;;  %v787_v35 = vld [vmem:[%s10696_s11 + $0xb4] sm:$0xf]  ;;  %v789_v33 = vld [vmem:[%s10696_s11 + $0xbc] sm:$0xff]  }
  0xad   :  { %v793_v34 = vld [vmem:[%s10696_s11 + $0xc8] sm:$0xf]  ;;  %788 = vst [vmem:[#allocation7 + $0xb8] sm:$0xf] %v787_v35  ;;  %790 = vst [vmem:[#allocation7 + $0xbc] sm:$0xff] %v789_v33   ;;  %v797_v32 = vld [vmem:[%s10696_s11 + $0xcc] sm:$0xff]  }
  0xae   :  { %794 = vst [vmem:[#allocation7 + $0xc4] sm:$0xf] %v793_v34  ;;  %v795_v37 = vld [vmem:[%s10696_s11 + $0xc4] sm:$0xf]  ;;  %v801_v30 = vld [vmem:[%s10696_s11 + $0xd8] sm:$0xf] }
  0xaf   :  { %796 = vst [vmem:[#allocation7 + $0xc8] sm:$0xf] %v795_v37  ;;  %798 = vst [vmem:[#allocation7 + $0xcc] sm:$0xff] %v797_v32   ;;  %v803_v35 = vld [vmem:[%s10696_s11 + $0xd4] sm:$0xf]  ;;  %v805_v33 = vld [vmem:[%s10696_s11 + $0xdc] sm:$0xff]  }
  0xb0   :  { %802 = vst [vmem:[#allocation7 + $0xd4] sm:$0xf] %v801_v30  ;;  %804 = vst [vmem:[#allocation7 + $0xd8] sm:$0xf] %v803_v35  ;;  %v811_v34 = vld [vmem:[%s10696_s11 + $0xe4] sm:$0xf] }
  0xb1   :  { %806 = vst [vmem:[#allocation7 + $0xdc] sm:$0xff] %v805_v33   ;;  %v813_v37 = vld [vmem:[%s10696_s11 + $0xec] sm:$0xff]   ;;  %812 = vst [vmem:[#allocation7 + $0xe8] sm:$0xf] %v811_v34  ;;  %v819_v32 = vld [vmem:[%s10696_s11 + $0xf4] sm:$0xf] }
  0xb2   :  { %814 = vst [vmem:[#allocation7 + $0xec] sm:$0xff] %v813_v37   ;;  %v821_v30 = vld [vmem:[%s10696_s11 + $0xfc] sm:$0xff]   ;;  %v825_v35 = vld [vmem:[%s10696_s11 + $0x108] sm:$0xf]  ;;  %820 = vst [vmem:[#allocation7 + $0xf8] sm:$0xf] %v819_v32 }
  0xb3   :  { %822 = vst [vmem:[#allocation7 + $0xfc] sm:$0xff] %v821_v30   ;;  %826 = vst [vmem:[#allocation7 + $0x104] sm:$0xf] %v825_v35  ;;  %v829_v33 = vld [vmem:[%s10696_s11 + $0x10c] sm:$0xff]   ;;  %v833_v34 = vld [vmem:[%s10696_s11 + $0x118] sm:$0xf] }
  0xb4   :  { %830 = vst [vmem:[#allocation7 + $0x10c] sm:$0xff] %v829_v33   ;;  %834 = vst [vmem:[#allocation7 + $0x114] sm:$0xf] %v833_v34  ;;  %v837_v37 = vld [vmem:[%s10696_s11 + $0x11c] sm:$0xff]   ;;  %v841_v32 = vld [vmem:[%s10696_s11 + $0x128] sm:$0xf] }
  0xb5   :  { %838 = vst [vmem:[#allocation7 + $0x11c] sm:$0xff] %v837_v37   ;;  %842 = vst [vmem:[#allocation7 + $0x124] sm:$0xf] %v841_v32  ;;  %v845_v30 = vld [vmem:[%s10696_s11 + $0x12c] sm:$0xff]   ;;  %v849_v35 = vld [vmem:[%s10696_s11 + $0x138] sm:$0xf] }
  0xb6   :  { %846 = vst [vmem:[#allocation7 + $0x12c] sm:$0xff] %v845_v30   ;;  %850 = vst [vmem:[#allocation7 + $0x134] sm:$0xf] %v849_v35  ;;  %v853_v33 = vld [vmem:[%s10696_s11 + $0x13c] sm:$0xff]   ;;  %v857_v34 = vld [vmem:[%s10696_s11 + $0x148] sm:$0xf] }
  0xb7   :  { %854 = vst [vmem:[#allocation7 + $0x13c] sm:$0xff] %v853_v33   ;;  %858 = vst [vmem:[#allocation7 + $0x144] sm:$0xf] %v857_v34  ;;  %v861_v37 = vld [vmem:[%s10696_s11 + $0x14c] sm:$0xff]   ;;  %v865_v32 = vld [vmem:[%s10696_s11 + $0x158] sm:$0xf] }
  0xb8   :  { %862 = vst [vmem:[#allocation7 + $0x14c] sm:$0xff] %v861_v37   ;;  %866 = vst [vmem:[#allocation7 + $0x154] sm:$0xf] %v865_v32  ;;  %v869_v30 = vld [vmem:[%s10696_s11 + $0x15c] sm:$0xff]   ;;  %v873_v35 = vld [vmem:[%s10696_s11 + $0x168] sm:$0xf] }
  0xb9   :  { %870 = vst [vmem:[#allocation7 + $0x15c] sm:$0xff] %v869_v30   ;;  %874 = vst [vmem:[#allocation7 + $0x164] sm:$0xf] %v873_v35  ;;  %v877_v33 = vld [vmem:[%s10696_s11 + $0x16c] sm:$0xff]   ;;  %v881_v34 = vld [vmem:[%s10696_s11 + $0x178] sm:$0xf] }
  0xba   :  { %878 = vst [vmem:[#allocation7 + $0x16c] sm:$0xff] %v877_v33   ;;  %882 = vst [vmem:[#allocation7 + $0x174] sm:$0xf] %v881_v34  ;;  %v885_v37 = vld [vmem:[%s10696_s11 + $0x17c] sm:$0xff]   ;;  %v889_v32 = vld [vmem:[%s10696_s11 + $0x188] sm:$0xf] }
  0xbb   :  { %886 = vst [vmem:[#allocation7 + $0x17c] sm:$0xff] %v885_v37   ;;  %890 = vst [vmem:[#allocation7 + $0x184] sm:$0xf] %v889_v32  ;;  %v893_v30 = vld [vmem:[%s10696_s11 + $0x18c] sm:$0xff]   ;;  %v897_v35 = vld [vmem:[%s10696_s11 + $0x198] sm:$0xf] }
  0xbc   :  { %894 = vst [vmem:[#allocation7 + $0x18c] sm:$0xff] %v893_v30   ;;  %898 = vst [vmem:[#allocation7 + $0x194] sm:$0xf] %v897_v35  ;;  %v901_v33 = vld [vmem:[%s10696_s11 + $0x19c] sm:$0xff]   ;;  %v905_v34 = vld [vmem:[%s10696_s11 + $0x1a8] sm:$0xf] }
  0xbd   :  { %902 = vst [vmem:[#allocation7 + $0x19c] sm:$0xff] %v901_v33   ;;  %906 = vst [vmem:[#allocation7 + $0x1a4] sm:$0xf] %v905_v34  ;;  %v909_v37 = vld [vmem:[%s10696_s11 + $0x1ac] sm:$0xff]   ;;  %v913_v32 = vld [vmem:[%s10696_s11 + $0x1b8] sm:$0xf] }
  0xbe   :  { %910 = vst [vmem:[#allocation7 + $0x1ac] sm:$0xff] %v909_v37   ;;  %914 = vst [vmem:[#allocation7 + $0x1b4] sm:$0xf] %v913_v32  ;;  %v917_v30 = vld [vmem:[%s10696_s11 + $0x1bc] sm:$0xff]   ;;  %v925_v35 = vld [vmem:[%s10696_s11 + $0x1cc] sm:$0xff]  }
  0xbf   :  { %918 = vst [vmem:[#allocation7 + $0x1bc] sm:$0xff] %v917_v30   ;;  %v929_v33 = vld [vmem:[%s10696_s11 + $0x1d8] sm:$0xf]  ;;  %926 = vst [vmem:[#allocation7 + $0x1cc] sm:$0xff] %v925_v35   ;;  %v933_v34 = vld [vmem:[%s10696_s11 + $0x1dc] sm:$0xff]  }
  0xc0   :  { %930 = vst [vmem:[#allocation7 + $0x1d4] sm:$0xf] %v929_v33  ;;  %v937_v37 = vld [vmem:[%s10696_s11 + $0x1e8] sm:$0xf]  ;;  %934 = vst [vmem:[#allocation7 + $0x1dc] sm:$0xff] %v933_v34   ;;  %v941_v32 = vld [vmem:[%s10696_s11 + $0x1ec] sm:$0xff]  }
  0xc1   :  { %938 = vst [vmem:[#allocation7 + $0x1e4] sm:$0xf] %v937_v37  ;;  %v945_v30 = vld [vmem:[%s10696_s11 + $0x1f8] sm:$0xf]  ;;  %942 = vst [vmem:[#allocation7 + $0x1ec] sm:$0xff] %v941_v32   ;;  %v949_v35 = vld [vmem:[%s10696_s11 + $0x1fc] sm:$0xff]  }
  0xc2   :  { %946 = vst [vmem:[#allocation7 + $0x1f4] sm:$0xf] %v945_v30  ;;  %v953_v33 = vld [vmem:[%s10696_s11 + $0x208] sm:$0xf]  ;;  %950 = vst [vmem:[#allocation7 + $0x1fc] sm:$0xff] %v949_v35   ;;  %v957_v34 = vld [vmem:[%s10696_s11 + $0x20c] sm:$0xff]  }
  0xc3   :  { %954 = vst [vmem:[#allocation7 + $0x204] sm:$0xf] %v953_v33  ;;  %v961_v37 = vld [vmem:[%s10696_s11 + $0x218] sm:$0xf]  ;;  %958 = vst [vmem:[#allocation7 + $0x20c] sm:$0xff] %v957_v34   ;;  %v965_v32 = vld [vmem:[%s10696_s11 + $0x21c] sm:$0xff]  }
  0xc4   :  { %962 = vst [vmem:[#allocation7 + $0x214] sm:$0xf] %v961_v37  ;;  %v969_v30 = vld [vmem:[%s10696_s11 + $0x228] sm:$0xf]  ;;  %966 = vst [vmem:[#allocation7 + $0x21c] sm:$0xff] %v965_v32   ;;  %v973_v35 = vld [vmem:[%s10696_s11 + $0x22c] sm:$0xff]  }
  0xc5   :  { %970 = vst [vmem:[#allocation7 + $0x224] sm:$0xf] %v969_v30  ;;  %974 = vst [vmem:[#allocation7 + $0x22c] sm:$0xff] %v973_v35   ;;  %v981_v33 = vld [vmem:[%s10696_s11 + $0x23c] sm:$0xff]   ;;  %v985_v34 = vld [vmem:[%s10696_s11 + $0x248] sm:$0xf] }
  0xc6   :  { %982 = vst [vmem:[#allocation7 + $0x23c] sm:$0xff] %v981_v33   ;;  %986 = vst [vmem:[#allocation7 + $0x244] sm:$0xf] %v985_v34  ;;  %v989_v37 = vld [vmem:[%s10696_s11 + $0x24c] sm:$0xff]   ;;  %v993_v32 = vld [vmem:[%s10696_s11 + $0x258] sm:$0xf] }
  0xc7   :  { %990 = vst [vmem:[#allocation7 + $0x24c] sm:$0xff] %v989_v37   ;;  %994 = vst [vmem:[#allocation7 + $0x254] sm:$0xf] %v993_v32  ;;  %v997_v30 = vld [vmem:[%s10696_s11 + $0x25c] sm:$0xff]   ;;  %v1001_v35 = vld [vmem:[%s10696_s11 + $0x268] sm:$0xf] }
  0xc8   :  { %998 = vst [vmem:[#allocation7 + $0x25c] sm:$0xff] %v997_v30   ;;  %1002 = vst [vmem:[#allocation7 + $0x264] sm:$0xf] %v1001_v35  ;;  %v1005_v33 = vld [vmem:[%s10696_s11 + $0x26c] sm:$0xff]  }
  0xc9   :  { %1006 = vst [vmem:[#allocation7 + $0x26c] sm:$0xff] %v1005_v33  }
  0xca   :  { %1365 = vsyncadd [#allocation8 + $0x5], 10240  ;;  %v1366_v34 = vld [vmem:[%s10685_s0] sm:$0xff]  ;;  %v1367_v37 = vld [vmem:[%s10685_s0 + $0x8] sm:$0xff]  ;;  %v10772_v32 = vmov 0.0|0.0   ;;  %vm1535_vm0 = vcmask 523264  }
  0xcb   :  { %7012 = vmatprep.subr.bf16.mxu0 %v10772_v32  ;;  %v7013_v31 = vpack.c.bf16 %v1367_v37, %v1366_v34  ;;  %v1368_v30 = vld [vmem:[%s10685_s0 + $0x10] sm:$0xff]  ;;  %v1369_v35 = vld [vmem:[%s10685_s0 + $0x18] sm:$0xff]  ;;  %v1370_v28 = vld [vmem:[%s10685_s0 + $0x20] sm:$0xff]  ;;  %vm2041_vm1 = vcmask 1043456   ;;  %vm2004_vm2 = vcmask 162816  }
  0xcc   :  { %v7016_v33 = vpack.c.bf16 %v1369_v35, %v1368_v30  ;;  %v1371_v34 = vld [vmem:[%s10685_s0 + $0x28] sm:$0xff]  ;;  %v1372_v29 = vld [vmem:[%s10685_s0 + $0x30] sm:$0xff]  ;;  %v1391_v30 = vld [vmem:[%s10687_s2] sm:$0xff] }
  0xcd   :  { %7014 = vmatpush1.bf16.msra.mxu0 %v7013_v31  ;;  %v7019_v37 = vpack.c.bf16 %v1371_v34, %v1370_v28  ;;  %v1373_v31 = vld [vmem:[%s10685_s0 + $0x38] sm:$0xff]  ;;  %v1440_v35 = vunpack.c.h.bf16 %v1391_v30  ;;  %v1374_v28 = vld [vmem:[%s10685_s0 + $0x40] sm:$0xff] }
  0xce   :  { %7015 = vmatprep.subr.bf16.mxu0 %v10772_v32  ;;  %v7022_v26 = vpack.c.bf16 %v1373_v31, %v1372_v29  ;;  %v1376_v29 = vld [vmem:[%s10685_s0 + $0x50] sm:$0xff] }
  0xcf   :  { %6468 = vmatprep.mubr.msk.f32.mxu0 %vm1535_vm0, %v1440_v35  ;;  %v1378_v35 = vld [vmem:[%s10685_s0 + $0x60] sm:$0xff] }
  0xd1   :  { %7017 = vmatpush1.bf16.msra.mxu0 %v7016_v33  ;;  %v1375_v33 = vld [vmem:[%s10685_s0 + $0x48] sm:$0xff] }
  0xd2   :  { %7018 = vmatprep.subr.bf16.mxu0 %v10772_v32  ;;  %v7025_v34 = vpack.c.bf16 %v1375_v33, %v1374_v28  ;;  %v1380_v33 = vld [vmem:[%s10685_s0 + $0x70] sm:$0xff] }
  0xd5   :  { %7020 = vmatpush1.bf16.msra.mxu0 %v7019_v37  ;;  %v1377_v37 = vld [vmem:[%s10685_s0 + $0x58] sm:$0xff] }
  0xd6   :  { %7021 = vmatprep.subr.bf16.mxu0 %v10772_v32  ;;  %v7028_v31 = vpack.c.bf16 %v1377_v37, %v1376_v29  ;;  %v1382_v37 = vld [vmem:[%s10685_s0 + $0x80] sm:$0xff] }
  0xd9   :  { %7023 = vmatpush1.bf16.msra.mxu0 %v7022_v26  ;;  %v1379_v26 = vld [vmem:[%s10685_s0 + $0x68] sm:$0xff] }
  0xda   :  { %7024 = vmatprep.subr.bf16.mxu0 %v10772_v32  ;;  %v7031_v28 = vpack.c.bf16 %v1379_v26, %v1378_v35  ;;  %v1384_v26 = vld [vmem:[%s10685_s0 + $0x90] sm:$0xff] }
  0xdd   :  { %7026 = vmatpush1.bf16.msra.mxu0 %v7025_v34  ;;  %v1381_v34 = vld [vmem:[%s10685_s0 + $0x78] sm:$0xff] }
  0xde   :  { %7027 = vmatprep.subr.bf16.mxu0 %v10772_v32  ;;  %v7034_v29 = vpack.c.bf16 %v1381_v34, %v1380_v33  ;;  %v1386_v34 = vld [vmem:[%s10685_s0 + $0xa0] sm:$0xff] }
  0xe1   :  { %7029 = vmatpush1.bf16.msra.mxu0 %v7028_v31  ;;  %v1383_v31 = vld [vmem:[%s10685_s0 + $0x88] sm:$0xff] }
  0xe2   :  { %7030 = vmatprep.subr.bf16.mxu0 %v10772_v32  ;;  %v7037_v35 = vpack.c.bf16 %v1383_v31, %v1382_v37  ;;  %v1388_v31 = vld [vmem:[%s10685_s0 + $0xb0] sm:$0xff] }
  0xe5   :  { %7032 = vmatpush1.bf16.msra.mxu0 %v7031_v28  ;;  %v1385_v28 = vld [vmem:[%s10685_s0 + $0x98] sm:$0xff] }
  0xe6   :  { %7033 = vmatprep.subr.bf16.mxu0 %v10772_v32  ;;  %v7040_v33 = vpack.c.bf16 %v1385_v28, %v1384_v26  ;;  %v1392_v28 = vld [vmem:[%s10687_s2 + $0x8] sm:$0xff] }
  0xe7   :  { %v1441_v27 = vunpack.c.l.bf16 %v1392_v28 }
  0xe9   :  { %7035 = vmatpush1.bf16.msra.mxu0 %v7034_v29  ;;  %v1387_v29 = vld [vmem:[%s10685_s0 + $0xa8] sm:$0xff] }
  0xea   :  { %7036 = vmatprep.subr.bf16.mxu0 %v10772_v32  ;;  %v7043_v37 = vpack.c.bf16 %v1387_v29, %v1386_v34  ;;  %v1442_v34 = vunpack.c.h.bf16 %v1392_v28  ;;  %v1393_v29 = vld [vmem:[%s10687_s2 + $0x10] sm:$0xff] }
  0xeb   :  { %v1444_v24 = vunpack.c.h.bf16 %v1393_v29 }
  0xed   :  { %7038 = vmatpush1.bf16.msra.mxu0 %v7037_v35  ;;  %v1389_v35 = vld [vmem:[%s10685_s0 + $0xb8] sm:$0xff] }
  0xee   :  { %7039 = vmatprep.subr.bf16.mxu0 %v10772_v32  ;;  %v7046_v26 = vpack.c.bf16 %v1389_v35, %v1388_v31  ;;  %v1443_v31 = vunpack.c.l.bf16 %v1393_v29  ;;  %v1395_v35 = vld [vmem:[%s10687_s2 + $0x20] sm:$0xff] }
  0xef   :  { %v1448_v28 = vunpack.c.h.bf16 %v1395_v35 }
  0xf1   :  { %7041 = vmatpush1.bf16.msra.mxu0 %v7040_v33  ;;  %v1439_v33 = vunpack.c.l.bf16 %v1391_v30 }
  0xf2   :  { %7042 = vmatprep.subr.bf16.mxu0 %v10772_v32 }
  0xf5   :  { %7044 = vmatpush1.bf16.msra.mxu0 %v7043_v37  ;;  %v1394_v37 = vld [vmem:[%s10687_s2 + $0x18] sm:$0xff] }
  0xf6   :  { %7045 = vmatprep.subr.bf16.mxu0 %v10772_v32  ;;  %v1446_v30 = vunpack.c.h.bf16 %v1394_v37  ;;  %v1425_v32 = vld [vmem:[%s10687_s2 + $0x110] sm:$0xff] }
  0xf9   :  { %7047 = vmatpush1.bf16.msra.mxu0 %v7046_v26  ;;  %v1445_v26 = vunpack.c.l.bf16 %v1394_v37 }
  0xfc   :  { %1745 = vmatmul.mubr.f32.vlgmr.msra.gmra.mrb[0].mxu0 %v1439_v33  ;;  %v1396_v33 = vld [vmem:[%s10687_s2 + $0x28] sm:$0xff] }
  0xfd   :  { %6469 = vmatprep.mubr.msk.f32.mxu0 %vm1535_vm0, %v1442_v34  ;;  %v1447_v34 = vunpack.c.l.bf16 %v1395_v35  ;;  %v1449_v29 = vunpack.c.l.bf16 %v1396_v33 }
 0x100   :  { %1750 = vmatmul.mubr.f32.gmra.mrb[2].mxu0 %v1441_v27  ;;  %v1450_v27 = vunpack.c.h.bf16 %v1396_v33 }
 0x101   :  { %6470 = vmatprep.mubr.msk.f32.mxu0 %vm1535_vm0, %v1444_v24  ;;  %v1397_v24 = vld [vmem:[%s10687_s2 + $0x30] sm:$0xff] }
 0x102   :  { %v1452_v37 = vunpack.c.h.bf16 %v1397_v24 }
 0x104   :  { %1755 = vmatmul.mubr.f32.gmra.mrb[4].mxu0 %v1443_v31  ;;  %v1398_v31 = vld [vmem:[%s10687_s2 + $0x38] sm:$0xff] }
 0x105   :  { %6471 = vmatprep.mubr.msk.f32.mxu0 %vm1535_vm0, %v1446_v30  ;;  %v1451_v30 = vunpack.c.l.bf16 %v1397_v24  ;;  %v1454_v35 = vunpack.c.h.bf16 %v1398_v31 }
 0x108   :  { %1760 = vmatmul.mubr.f32.gmra.mrb[6].mxu0 %v1445_v26  ;;  %v1399_v26 = vld [vmem:[%s10687_s2 + $0x40] sm:$0xff] }
 0x109   :  { %6472 = vmatprep.mubr.msk.f32.mxu0 %vm1535_vm0, %v1448_v28  ;;  %v1453_v28 = vunpack.c.l.bf16 %v1398_v31  ;;  %v1456_v33 = vunpack.c.h.bf16 %v1399_v26 }
 0x10c   :  { %1765 = vmatmul.mubr.f32.gmra.mrb[8].mxu0 %v1447_v34  ;;  %v1400_v34 = vld [vmem:[%s10687_s2 + $0x48] sm:$0xff] }
 0x10d   :  { %6473 = vmatprep.mubr.msk.f32.mxu0 %vm1535_vm0, %v1450_v27  ;;  %v1455_v27 = vunpack.c.l.bf16 %v1399_v26  ;;  %v1458_v24 = vunpack.c.h.bf16 %v1400_v34 }
 0x110   :  { %1770 = vmatmul.mubr.f32.gmra.mrb[10].mxu0 %v1449_v29  ;;  %v1401_v29 = vld [vmem:[%s10687_s2 + $0x50] sm:$0xff] }
 0x111   :  { %6474 = vmatprep.mubr.msk.f32.mxu0 %vm1535_vm0, %v1452_v37  ;;  %v1457_v37 = vunpack.c.l.bf16 %v1400_v34  ;;  %v1460_v31 = vunpack.c.h.bf16 %v1401_v29 }
 0x114   :  { %1775 = vmatmul.mubr.f32.gmra.mrb[12].mxu0 %v1451_v30  ;;  %v1402_v30 = vld [vmem:[%s10687_s2 + $0x58] sm:$0xff] }
 0x115   :  { %6475 = vmatprep.mubr.msk.f32.mxu0 %vm1535_vm0, %v1454_v35  ;;  %v1459_v35 = vunpack.c.l.bf16 %v1401_v29  ;;  %v1462_v26 = vunpack.c.h.bf16 %v1402_v30 }
 0x118   :  { %1780 = vmatmul.mubr.f32.gmra.mrb[14].mxu0 %v1453_v28  ;;  %v1403_v28 = vld [vmem:[%s10687_s2 + $0x60] sm:$0xff] }
 0x119   :  { %6476 = vmatprep.mubr.msk.f32.mxu0 %vm1535_vm0, %v1456_v33  ;;  %v1461_v33 = vunpack.c.l.bf16 %v1402_v30  ;;  %v1464_v34 = vunpack.c.h.bf16 %v1403_v28 }
 0x11c   :  { %1785 = vmatmul.mubr.f32.gmra.mrb[16].mxu0 %v1455_v27  ;;  %v1404_v27 = vld [vmem:[%s10687_s2 + $0x68] sm:$0xff] }
 0x11d   :  { %6477 = vmatprep.mubr.msk.f32.mxu0 %vm1535_vm0, %v1458_v24  ;;  %v1463_v24 = vunpack.c.l.bf16 %v1403_v28  ;;  %v1466_v29 = vunpack.c.h.bf16 %v1404_v27 }
 0x120   :  { %1790 = vmatmul.mubr.f32.gmra.mrb[18].mxu0 %v1457_v37  ;;  %v1405_v37 = vld [vmem:[%s10687_s2 + $0x70] sm:$0xff] }
 0x121   :  { %6478 = vmatprep.mubr.msk.f32.mxu0 %vm1535_vm0, %v1460_v31  ;;  %v1465_v31 = vunpack.c.l.bf16 %v1404_v27  ;;  %v1468_v30 = vunpack.c.h.bf16 %v1405_v37 }
 0x124   :  { %1795 = vmatmul.mubr.f32.gmra.mrb[20].mxu0 %v1459_v35  ;;  %v1406_v35 = vld [vmem:[%s10687_s2 + $0x78] sm:$0xff] }
 0x125   :  { %6479 = vmatprep.mubr.msk.f32.mxu0 %vm1535_vm0, %v1462_v26  ;;  %v1467_v26 = vunpack.c.l.bf16 %v1405_v37  ;;  %v1470_v28 = vunpack.c.h.bf16 %v1406_v35 }
 0x128   :  { %1800 = vmatmul.mubr.f32.gmra.mrb[22].mxu0 %v1461_v33  ;;  %v1407_v33 = vld [vmem:[%s10687_s2 + $0x80] sm:$0xff] }
 0x129   :  { %6480 = vmatprep.mubr.msk.f32.mxu0 %vm1535_vm0, %v1464_v34  ;;  %v1469_v34 = vunpack.c.l.bf16 %v1406_v35  ;;  %v1472_v27 = vunpack.c.h.bf16 %v1407_v33 }
 0x12c   :  { %1805 = vmatmul.mubr.f32.gmra.mrb[24].mxu0 %v1463_v24  ;;  %v1408_v24 = vld [vmem:[%s10687_s2 + $0x88] sm:$0xff] }
 0x12d   :  { %6481 = vmatprep.mubr.msk.f32.mxu0 %vm1535_vm0, %v1466_v29  ;;  %v1471_v29 = vunpack.c.l.bf16 %v1407_v33  ;;  %v1474_v37 = vunpack.c.h.bf16 %v1408_v24 }
 0x130   :  { %1810 = vmatmul.mubr.f32.gmra.mrb[26].mxu0 %v1465_v31  ;;  %v1409_v31 = vld [vmem:[%s10687_s2 + $0x90] sm:$0xff] }
 0x131   :  { %6482 = vmatprep.mubr.msk.f32.mxu0 %vm1535_vm0, %v1468_v30  ;;  %v1473_v30 = vunpack.c.l.bf16 %v1408_v24  ;;  %v1476_v35 = vunpack.c.h.bf16 %v1409_v31 }
 0x134   :  { %1815 = vmatmul.mubr.f32.gmra.mrb[28].mxu0 %v1467_v26  ;;  %v1410_v26 = vld [vmem:[%s10687_s2 + $0x98] sm:$0xff] }
 0x135   :  { %6483 = vmatprep.mubr.msk.f32.mxu0 %vm1535_vm0, %v1470_v28  ;;  %v1475_v28 = vunpack.c.l.bf16 %v1409_v31  ;;  %v1478_v33 = vunpack.c.h.bf16 %v1410_v26 }
 0x138   :  { %1820 = vmatmul.mubr.f32.gmra.mrb[30].mxu0 %v1469_v34  ;;  %v1411_v34 = vld [vmem:[%s10687_s2 + $0xa0] sm:$0xff] }
 0x139   :  { %6484 = vmatprep.mubr.msk.f32.mxu0 %vm1535_vm0, %v1472_v27  ;;  %v1477_v27 = vunpack.c.l.bf16 %v1410_v26  ;;  %v1480_v24 = vunpack.c.h.bf16 %v1411_v34 }
 0x13c   :  { %1825 = vmatmul.mubr.f32.gmra.mrb[32].mxu0 %v1471_v29  ;;  %v1412_v29 = vld [vmem:[%s10687_s2 + $0xa8] sm:$0xff] }
 0x13d   :  { %6485 = vmatprep.mubr.msk.f32.mxu0 %vm1535_vm0, %v1474_v37  ;;  %v1479_v37 = vunpack.c.l.bf16 %v1411_v34  ;;  %v1482_v31 = vunpack.c.h.bf16 %v1412_v29 }
 0x140   :  { %1830 = vmatmul.mubr.f32.gmra.mrb[34].mxu0 %v1473_v30  ;;  %v1413_v30 = vld [vmem:[%s10687_s2 + $0xb0] sm:$0xff] }
 0x141   :  { %6486 = vmatprep.mubr.msk.f32.mxu0 %vm1535_vm0, %v1476_v35  ;;  %v1481_v35 = vunpack.c.l.bf16 %v1412_v29  ;;  %v1484_v26 = vunpack.c.h.bf16 %v1413_v30 }
 0x144   :  { %1835 = vmatmul.mubr.f32.gmra.mrb[36].mxu0 %v1475_v28  ;;  %v1414_v28 = vld [vmem:[%s10687_s2 + $0xb8] sm:$0xff] }
 0x145   :  { %6487 = vmatprep.mubr.msk.f32.mxu0 %vm1535_vm0, %v1478_v33  ;;  %v1483_v33 = vunpack.c.l.bf16 %v1413_v30  ;;  %v1486_v34 = vunpack.c.h.bf16 %v1414_v28 }
 0x148   :  { %1840 = vmatmul.mubr.f32.gmra.mrb[38].mxu0 %v1477_v27  ;;  %v1415_v27 = vld [vmem:[%s10687_s2 + $0xc0] sm:$0xff] }
 0x149   :  { %6488 = vmatprep.mubr.msk.f32.mxu0 %vm1535_vm0, %v1480_v24  ;;  %v1485_v24 = vunpack.c.l.bf16 %v1414_v28  ;;  %v1488_v29 = vunpack.c.h.bf16 %v1415_v27 }
 0x14c   :  { %1845 = vmatmul.mubr.f32.gmra.mrb[40].mxu0 %v1479_v37  ;;  %v1416_v37 = vld [vmem:[%s10687_s2 + $0xc8] sm:$0xff] }
 0x14d   :  { %6489 = vmatprep.mubr.msk.f32.mxu0 %vm1535_vm0, %v1482_v31  ;;  %v1487_v31 = vunpack.c.l.bf16 %v1415_v27  ;;  %v1490_v30 = vunpack.c.h.bf16 %v1416_v37 }
 0x150   :  { %1850 = vmatmul.mubr.f32.gmra.mrb[42].mxu0 %v1481_v35  ;;  %v1417_v35 = vld [vmem:[%s10687_s2 + $0xd0] sm:$0xff] }
 0x151   :  { %6490 = vmatprep.mubr.msk.f32.mxu0 %vm1535_vm0, %v1484_v26  ;;  %v1489_v26 = vunpack.c.l.bf16 %v1416_v37  ;;  %v1492_v28 = vunpack.c.h.bf16 %v1417_v35 }
 0x154   :  { %1855 = vmatmul.mubr.f32.gmra.mrb[44].mxu0 %v1483_v33  ;;  %v1418_v33 = vld [vmem:[%s10687_s2 + $0xd8] sm:$0xff] }
 0x155   :  { %6491 = vmatprep.mubr.msk.f32.mxu0 %vm1535_vm0, %v1486_v34  ;;  %v1491_v34 = vunpack.c.l.bf16 %v1417_v35  ;;  %v1494_v27 = vunpack.c.h.bf16 %v1418_v33 }
 0x158   :  { %1860 = vmatmul.mubr.f32.gmra.mrb[46].mxu0 %v1485_v24  ;;  %v1419_v24 = vld [vmem:[%s10687_s2 + $0xe0] sm:$0xff] }
 0x159   :  { %6492 = vmatprep.mubr.msk.f32.mxu0 %vm1535_vm0, %v1488_v29  ;;  %v1493_v29 = vunpack.c.l.bf16 %v1418_v33  ;;  %v1496_v37 = vunpack.c.h.bf16 %v1419_v24 }
 0x15c   :  { %1865 = vmatmul.mubr.f32.gmra.mrb[48].mxu0 %v1487_v31  ;;  %v1420_v31 = vld [vmem:[%s10687_s2 + $0xe8] sm:$0xff] }
 0x15d   :  { %6493 = vmatprep.mubr.msk.f32.mxu0 %vm1535_vm0, %v1490_v30  ;;  %v1495_v30 = vunpack.c.l.bf16 %v1419_v24  ;;  %v1498_v35 = vunpack.c.h.bf16 %v1420_v31 }
 0x160   :  { %1870 = vmatmul.mubr.f32.gmra.mrb[50].mxu0 %v1489_v26  ;;  %v1421_v26 = vld [vmem:[%s10687_s2 + $0xf0] sm:$0xff] }
 0x161   :  { %6494 = vmatprep.mubr.msk.f32.mxu0 %vm1535_vm0, %v1492_v28  ;;  %v1497_v28 = vunpack.c.l.bf16 %v1420_v31  ;;  %v1500_v33 = vunpack.c.h.bf16 %v1421_v26 }
 0x164   :  { %1875 = vmatmul.mubr.f32.gmra.mrb[52].mxu0 %v1491_v34  ;;  %v1422_v34 = vld [vmem:[%s10687_s2 + $0xf8] sm:$0xff] }
 0x165   :  { %6495 = vmatprep.mubr.msk.f32.mxu0 %vm1535_vm0, %v1494_v27  ;;  %v1499_v27 = vunpack.c.l.bf16 %v1421_v26  ;;  %v1502_v24 = vunpack.c.h.bf16 %v1422_v34  ;;  %v7894_v26 = vld [vmem:[#allocation9 + $0x18] ss:$8 sps:$4 sm:$0xff]  }
 0x168   :  { %1880 = vmatmul.mubr.f32.gmra.mrb[54].mxu0 %v1493_v29  ;;  %v1423_v29 = vld [vmem:[%s10687_s2 + $0x100] sm:$0xff] }
 0x169   :  { %6496 = vmatprep.mubr.msk.f32.mxu0 %vm1535_vm0, %v1496_v37  ;;  %v1501_v37 = vunpack.c.l.bf16 %v1422_v34  ;;  %v1504_v31 = vunpack.c.h.bf16 %v1423_v29  ;;  %v1997_v34 = vld [vmem:[#allocation9 + $0x28] sm:$0x33] }
 0x16a   :  { %v2002_v25 = vunpack.c.l.bf16 %v1997_v34 }
 0x16c   :  { %1885 = vmatmul.mubr.f32.gmra.mrb[56].mxu0 %v1495_v30  ;;  %v1424_v30 = vld [vmem:[%s10687_s2 + $0x108] sm:$0xff] }
 0x16d   :  { %6497 = vmatprep.mubr.msk.f32.mxu0 %vm1535_vm0, %v1498_v35  ;;  %v1503_v35 = vunpack.c.l.bf16 %v1423_v29  ;;  %v1508_v29 = vunpack.c.h.bf16 %v1425_v32 }
 0x170   :  { %1890 = vmatmul.mubr.f32.gmra.mrb[58].mxu0 %v1497_v28  ;;  %v7892_v28 = vld [vmem:[#allocation9 + $0x1c] ss:$8 sps:$4 sm:$0xff]  }
 0x171   :  { %6498 = vmatprep.mubr.msk.f32.mxu0 %vm1535_vm0, %v1500_v33  ;;  %v1506_v33 = vunpack.c.h.bf16 %v1424_v30  ;;  %7049 = vmatprep.subr.bf16.mxu1 %v7892_v28  ;;  %v7895_v28 = vld [vmem:[#allocation9 + $0x4] ss:$8 sps:$4 sm:$0xff]  }
 0x172   :  { %7051 = vmatpush1.bf16.msra.mxu1 %v7894_v26  ;;  %v1427_v26 = vld [vmem:[%s10687_s2 + $0x120] sm:$0xff] }
 0x174   :  { %1895 = vmatmul.mubr.f32.gmra.mrb[60].mxu0 %v1499_v27  ;;  %v1505_v27 = vunpack.c.l.bf16 %v1424_v30  ;;  %v1507_v30 = vunpack.c.l.bf16 %v1425_v32 }
 0x175   :  { %6499 = vmatprep.mubr.msk.f32.mxu0 %vm1535_vm0, %v1502_v24  ;;  %v2003_v24 = vunpack.c.h.bf16 %v1997_v34  ;;  %v1512_v34 = vunpack.c.h.bf16 %v1427_v26 }
 0x177   :  { %6516 = vmatprep.subr.msk.mxu1 %vm2041_vm1, %v2003_v24  ;;  %v1429_v24 = vld [vmem:[%s10687_s2 + $0x130] sm:$0xff] }
 0x178   :  { %1900 = vmatmul.mubr.f32.gmra.mrb[62].mxu0 %v1501_v37  ;;  %v1426_v37 = vld [vmem:[%s10687_s2 + $0x118] sm:$0xff]  ;;  %6517 = vmatpush1.msk.msra.mxu1 %vm2041_vm1, %v2002_v25  ;;  %v1428_v25 = vld [vmem:[%s10687_s2 + $0x128] sm:$0xff] }
 0x179   :  { %6500 = vmatprep.mubr.msk.f32.mxu0 %vm1535_vm0, %v1504_v31  ;;  %v10775_v31 = vmov 0.0   ;;  %7053 = vmatprep.subr.bf16.mxu1 %v7895_v28  ;;  %v1514_v32 = vunpack.c.h.bf16 %v1428_v25  ;;  %v1430_v28 = vld [vmem:[%s10687_s2 + $0x138] sm:$0xff] }
 0x17a   :  { %2112 = vmatprep.mubr.f32.mxu1 %v10775_v31 }
 0x17c   :  { %1905 = vmatmul.mubr.f32.gmra.mrb[64].mxu0 %v1503_v35  ;;  %v1510_v35 = vunpack.c.h.bf16 %v1426_v37 }
 0x17d   :  { %6501 = vmatprep.mubr.msk.f32.mxu0 %vm1535_vm0, %v1506_v33  ;;  %v1509_v33 = vunpack.c.l.bf16 %v1426_v37  ;;  %v1516_v37 = vunpack.c.h.bf16 %v1429_v24 }
 0x180   :  { %1910 = vmatmul.mubr.f32.gmra.mrb[66].mxu0 %v1505_v27  ;;  %v1511_v27 = vunpack.c.l.bf16 %v1427_v26  ;;  %v1431_v26 = vld [vmem:[%s10687_s2 + $0x140] sm:$0xff] }
 0x181   :  { %6502 = vmatprep.mubr.msk.f32.mxu0 %vm1535_vm0, %v1508_v29  ;;  %v1513_v29 = vunpack.c.l.bf16 %v1428_v25  ;;  %v1432_v25 = vld [vmem:[%s10687_s2 + $0x148] sm:$0xff] }
 0x184   :  { %1915 = vmatmul.mubr.f32.gmra.mrb[68].mxu0 %v1507_v30  ;;  %v1515_v30 = vunpack.c.l.bf16 %v1429_v24  ;;  %v1433_v24 = vld [vmem:[%s10687_s2 + $0x150] sm:$0xff] }
 0x185   :  { %6503 = vmatprep.mubr.msk.f32.mxu0 %vm1535_vm0, %v1510_v35  ;;  %v1518_v35 = vunpack.c.h.bf16 %v1430_v28 }
 0x188   :  { %1920 = vmatmul.mubr.f32.gmra.mrb[70].mxu0 %v1509_v33  ;;  %v1517_v33 = vunpack.c.l.bf16 %v1430_v28  ;;  %v1434_v28 = vld [vmem:[%s10687_s2 + $0x158] sm:$0xff] }
 0x189   :  { %6504 = vmatprep.mubr.msk.f32.mxu0 %vm1535_vm0, %v1512_v34  ;;  %v1520_v34 = vunpack.c.h.bf16 %v1431_v26 }
 0x18c   :  { %1925 = vmatmul.mubr.f32.gmra.mrb[72].mxu0 %v1511_v27  ;;  %v1519_v27 = vunpack.c.l.bf16 %v1431_v26  ;;  %v1435_v26 = vld [vmem:[%s10687_s2 + $0x160] sm:$0xff] }
 0x18d   :  { %6505 = vmatprep.mubr.msk.f32.mxu0 %vm1535_vm0, %v1514_v32  ;;  %v1522_v32 = vunpack.c.h.bf16 %v1432_v25 }
 0x190   :  { %1930 = vmatmul.mubr.f32.gmra.mrb[74].mxu0 %v1513_v29  ;;  %v1521_v29 = vunpack.c.l.bf16 %v1432_v25  ;;  %v1436_v25 = vld [vmem:[%s10687_s2 + $0x168] sm:$0xff] }
 0x191   :  { %6506 = vmatprep.mubr.msk.f32.mxu0 %vm1535_vm0, %v1516_v37  ;;  %v1524_v37 = vunpack.c.h.bf16 %v1433_v24 }
 0x194   :  { %1935 = vmatmul.mubr.f32.gmra.mrb[76].mxu0 %v1515_v30  ;;  %v1523_v30 = vunpack.c.l.bf16 %v1433_v24  ;;  %v1437_v24 = vld [vmem:[%s10687_s2 + $0x170] sm:$0xff] }
 0x195   :  { %6507 = vmatprep.mubr.msk.f32.mxu0 %vm1535_vm0, %v1518_v35  ;;  %v1526_v35 = vunpack.c.h.bf16 %v1434_v28 }
 0x198   :  { %1940 = vmatmul.mubr.f32.gmra.mrb[78].mxu0 %v1517_v33  ;;  %v1525_v33 = vunpack.c.l.bf16 %v1434_v28  ;;  %v1438_v28 = vld [vmem:[%s10687_s2 + $0x178] sm:$0xff] }
 0x199   :  { %6508 = vmatprep.mubr.msk.f32.mxu0 %vm1535_vm0, %v1520_v34  ;;  %v1528_v34 = vunpack.c.h.bf16 %v1435_v26 }
 0x19c   :  { %1945 = vmatmul.mubr.f32.gmra.mrb[80].mxu0 %v1519_v27  ;;  %v1527_v27 = vunpack.c.l.bf16 %v1435_v26  ;;  %v1533_v26 = vunpack.c.l.bf16 %v1438_v28 }
 0x19d   :  { %6509 = vmatprep.mubr.msk.f32.mxu0 %vm1535_vm0, %v1522_v32  ;;  %v1530_v32 = vunpack.c.h.bf16 %v1436_v25 }
 0x1a0   :  { %1950 = vmatmul.mubr.f32.gmra.mrb[82].mxu0 %v1521_v29  ;;  %v1529_v29 = vunpack.c.l.bf16 %v1436_v25 }
 0x1a1   :  { %6510 = vmatprep.mubr.msk.f32.mxu0 %vm1535_vm0, %v1524_v37  ;;  %v1532_v37 = vunpack.c.h.bf16 %v1437_v24 }
 0x1a4   :  { %1955 = vmatmul.mubr.f32.gmra.mrb[84].mxu0 %v1523_v30  ;;  %v1531_v30 = vunpack.c.l.bf16 %v1437_v24 }
 0x1a5   :  { %6511 = vmatprep.mubr.msk.f32.mxu0 %vm1535_vm0, %v1526_v35  ;;  %v1534_v35 = vunpack.c.h.bf16 %v1438_v28 }
 0x1a8   :  { %1960 = vmatmul.mubr.f32.gmra.mrb[86].mxu0 %v1525_v33 }
 0x1a9   :  { %6512 = vmatprep.mubr.msk.f32.mxu0 %vm1535_vm0, %v1528_v34 }
 0x1ac   :  { %1965 = vmatmul.mubr.f32.gmra.mrb[88].mxu0 %v1527_v27 }
 0x1ad   :  { %6513 = vmatprep.mubr.msk.f32.mxu0 %vm1535_vm0, %v1530_v32 }
 0x1b0   :  { %1970 = vmatmul.mubr.f32.gmra.mrb[90].mxu0 %v1529_v29 }
 0x1b1   :  { %6514 = vmatprep.mubr.msk.f32.mxu0 %vm1535_vm0, %v1532_v37 }
 0x1b4   :  { %1975 = vmatmul.mubr.f32.gmra.mrb[92].mxu0 %v1531_v30 }
 0x1b5   :  { %6515 = vmatprep.mubr.msk.f32.mxu0 %vm1535_vm0, %v1534_v35 }
 0x1b8   :  { %1980 = vmatmul.mubr.f32.gmra.mrb[94].mxu0 %v1533_v26 }
 0x1cf   :  { %v9629_v33 = vpop.f32.mrb[0].mxu0 }
 0x1d0   :  { %v1748_v34 = vpop.f32.mrb[1].mxu0 }
 0x1d3   :  { %v9631_v25 = vpop.f32.mrb[2].mxu0 }
 0x1d4   :  { %v1753_v27 = vpop.f32.mrb[3].mxu0 }
 0x1d7   :  { %v9633_v32 = vpop.f32.mrb[4].mxu0 }
 0x1d8   :  { %v1758_v31 = vpop.f32.mrb[5].mxu0 }
 0x1db   :  { %v9635_v22 = vpop.f32.mrb[6].mxu0 }
 0x1dc   :  { %v1763_v24 = vpop.f32.mrb[7].mxu0 }
 0x1df   :  { %v9637_v29 = vpop.f32.mrb[8].mxu0 }
 0x1e0   :  { %v1768_v37 = vpop.f32.mrb[9].mxu0 }
 0x1e1   :  { %v1987_v37 = vld [vmem:[#allocation9 + $0x10] sm:$0x33] }
 0x1e2   :  { %v1993_v17 = vunpack.c.h.bf16 %v1987_v37 }
 0x1e3   :  { %v9639_v30 = vpop.f32.mrb[10].mxu0 }
 0x1e4   :  { %v1773_v28 = vpop.f32.mrb[11].mxu0 }
 0x1e5   :  { %v7897_v28 = vld [vmem:[#allocation9] ss:$8 sps:$4 sm:$0xff]  }
 0x1e7   :  { %v9641_v35 = vpop.f32.mrb[12].mxu0 }
 0x1e8   :  { %v1778_v26 = vpop.f32.mrb[13].mxu0 }
 0x1eb   :  { %v9643_v23 = vpop.f32.mrb[14].mxu0 }
 0x1ec   :  { %v1783_v34 = vpop.f32.mrb[15].mxu0 }
 0x1ed   :  { %v10999_v34 = vmov 0.0  }
 0x1ef   :  { %v9645_v20 = vpop.f32.mrb[16].mxu0 }
 0x1f0   :  { %v1788_v27 = vpop.f32.mrb[17].mxu0 }
 0x1f1   :  { %v1992_v27 = vunpack.c.l.bf16 %v1987_v37 }
 0x1f3   :  { %v9647_v21 = vpop.f32.mrb[18].mxu0 }
 0x1f4   :  { %v1793_v31 = vpop.f32.mrb[19].mxu0 }
 0x1f5   :  { %v7898_v31 = vld [vmem:[#allocation9 + $0x34] ss:$8 sps:$4 sm:$0xff]  }
 0x1f7   :  { %v9649_v18 = vpop.f32.mrb[20].mxu0 }
 0x1f8   :  { %v1798_v24 = vpop.f32.mrb[21].mxu0 }
 0x1fb   :  { %v9651_v19 = vpop.f32.mrb[22].mxu0 }
 0x1fc   :  { %v1803_v16 = vpop.f32.mrb[23].mxu0 }
 0x1ff   :  { %v1806_v26 = vpop.f32.mrb[24].mxu0 }
 0x200   :  { %v1808_v14 = vpop.f32.mrb[25].mxu0  ;;  %6518 = vmatmul.mubr.msk.f32.vlgmr.msra.gmra.mrb[0].mxu1 %vm2004_vm2, %v1806_v26 }
 0x201   :  { %7055 = vmatpush1.bf16.msra.mxu1 %v7897_v28  ;;  %2118 = vmatprep.mubr.f32.mxu1 %v10999_v34 }
 0x202   :  { %6530 = vmatprep.subr.msk.mxu1 %vm2041_vm1, %v1993_v17 }
 0x203   :  { %v1811_v15 = vpop.f32.mrb[26].mxu0 }
 0x204   :  { %v1813_v24 = vpop.f32.mrb[27].mxu0  ;;  %6519 = vmatmul.mubr.msk.f32.gmra.mrb[2].mxu1 %vm2004_vm2, %v1811_v15 }
 0x205   :  { %2124 = vmatprep.mubr.f32.mxu1 %v10999_v34  ;;  %6531 = vmatpush1.msk.msra.mxu1 %vm2041_vm1, %v1992_v27 }
 0x206   :  { %7057 = vmatprep.subr.bf16.mxu1 %v7898_v31 }
 0x207   :  { %v1816_v16 = vpop.f32.mrb[28].mxu0 }
 0x208   :  { %v1818_v14 = vpop.f32.mrb[29].mxu0  ;;  %6520 = vmatmul.mubr.msk.f32.gmra.mrb[4].mxu1 %vm2004_vm2, %v1816_v16 }
 0x209   :  { %2130 = vmatprep.mubr.f32.mxu1 %v10999_v34 }
 0x20b   :  { %v1821_v28 = vpop.f32.mrb[30].mxu0 }
 0x20c   :  { %v1823_v37 = vpop.f32.mrb[31].mxu0  ;;  %6521 = vmatmul.mubr.msk.f32.gmra.mrb[6].mxu1 %vm2004_vm2, %v1821_v28 }
 0x20d   :  { %2136 = vmatprep.mubr.f32.mxu1 %v10999_v34 }
 0x20f   :  { %v1826_v17 = vpop.f32.mrb[32].mxu0 }
 0x210   :  { %v1828_v26 = vpop.f32.mrb[33].mxu0  ;;  %6522 = vmatmul.mubr.msk.f32.gmra.mrb[8].mxu1 %vm2004_vm2, %v1826_v17 }
 0x211   :  { %2142 = vmatprep.mubr.f32.mxu1 %v10999_v34 }
 0x213   :  { %v1831_v15 = vpop.f32.mrb[34].mxu0 }
 0x214   :  { %v1833_v27 = vpop.f32.mrb[35].mxu0  ;;  %6523 = vmatmul.mubr.msk.f32.gmra.mrb[10].mxu1 %vm2004_vm2, %v1831_v15 }
 0x215   :  { %2148 = vmatprep.mubr.f32.mxu1 %v10999_v34 }
 0x217   :  { %v1836_v31 = vpop.f32.mrb[36].mxu0 }
 0x218   :  { %v1838_v24 = vpop.f32.mrb[37].mxu0  ;;  %6524 = vmatmul.mubr.msk.f32.gmra.mrb[12].mxu1 %vm2004_vm2, %v1836_v31 }
 0x219   :  { %2154 = vmatprep.mubr.f32.mxu1 %v10999_v34  ;;  %v2367_v24 = vld [vmem:[#allocation9 + $0x40] sm:$0x33] }
 0x21b   :  { %v1841_v16 = vpop.f32.mrb[38].mxu0 }
 0x21c   :  { %v1843_v14 = vpop.f32.mrb[39].mxu0  ;;  %6525 = vmatmul.mubr.msk.f32.gmra.mrb[14].mxu1 %vm2004_vm2, %v1841_v16 }
 0x21d   :  { %2160 = vmatprep.mubr.f32.mxu1 %v10999_v34  ;;  %v7900_v14 = vld [vmem:[#allocation9 + $0x30] ss:$8 sps:$4 sm:$0xff]  }
 0x21f   :  { %v1846_v28 = vpop.f32.mrb[40].mxu0 }
 0x220   :  { %v1848_v37 = vpop.f32.mrb[41].mxu0  ;;  %6526 = vmatmul.mubr.msk.f32.gmra.mrb[16].mxu1 %vm2004_vm2, %v1846_v28  ;;  %v2373_v28 = vunpack.c.h.bf16 %v2367_v24 }
 0x221   :  { %2166 = vmatprep.mubr.f32.mxu1 %v10999_v34 }
 0x223   :  { %v1851_v17 = vpop.f32.mrb[42].mxu0 }
 0x224   :  { %v1853_v26 = vpop.f32.mrb[43].mxu0  ;;  %6527 = vmatmul.mubr.msk.f32.gmra.mrb[18].mxu1 %vm2004_vm2, %v1851_v17 }
 0x225   :  { %2172 = vmatprep.mubr.f32.mxu1 %v10999_v34  ;;  %v2372_v26 = vunpack.c.l.bf16 %v2367_v24 }
 0x227   :  { %v1856_v15 = vpop.f32.mrb[44].mxu0 }
 0x228   :  { %v1858_v27 = vpop.f32.mrb[45].mxu0  ;;  %6528 = vmatmul.mubr.msk.f32.gmra.mrb[20].mxu1 %vm2004_vm2, %v1856_v15  ;;  %v7901_v15 = vld [vmem:[#allocation9 + $0x4c] ss:$8 sps:$4 sm:$0xff]  }
 0x229   :  { %2178 = vmatprep.mubr.f32.mxu1 %v10999_v34 }
 0x22b   :  { %v1861_v31 = vpop.f32.mrb[46].mxu0 }
 0x22c   :  { %v1863_v16 = vpop.f32.mrb[47].mxu0  ;;  %6529 = vmatmul.mubr.msk.f32.gmra.mrb[22].mxu1 %vm2004_vm2, %v1861_v31 }
 0x22d   :  { %2291 = vmatprep.mubr.f32.mxu1 %v10999_v34 }
 0x22f   :  { %v1866_v37 = vpop.f32.mrb[48].mxu0 }
 0x230   :  { %6532 = vmatmul.mubr.msk.f32.vlgmr.msra.gmra.mrb[0].mxu1 %vm2004_vm2, %v9629_v33  ;;  %v1868_v17 = vpop.f32.mrb[49].mxu0 }
 0x231   :  { %7059 = vmatpush1.bf16.msra.mxu1 %v7900_v14  ;;  %2297 = vmatprep.mubr.f32.mxu1 %v10999_v34 }
 0x232   :  { %6544 = vmatprep.subr.msk.mxu1 %vm2041_vm1, %v2373_v28 }
 0x233   :  { %v1871_v27 = vpop.f32.mrb[50].mxu0 }
 0x234   :  { %6533 = vmatmul.mubr.msk.f32.gmra.mrb[2].mxu1 %vm2004_vm2, %v9631_v25  ;;  %v1873_v31 = vpop.f32.mrb[51].mxu0 }
 0x235   :  { %2303 = vmatprep.mubr.f32.mxu1 %v10999_v34  ;;  %6545 = vmatpush1.msk.msra.mxu1 %vm2041_vm1, %v2372_v26 }
 0x236   :  { %7061 = vmatprep.subr.bf16.mxu1 %v7901_v15 }
 0x237   :  { %v1876_v16 = vpop.f32.mrb[52].mxu0 }
 0x238   :  { %6534 = vmatmul.mubr.msk.f32.gmra.mrb[4].mxu1 %vm2004_vm2, %v9633_v32  ;;  %v1878_v33 = vpop.f32.mrb[53].mxu0 }
 0x239   :  { %2309 = vmatprep.mubr.f32.mxu1 %v10999_v34 }
 0x23b   :  { %v1881_v24 = vpop.f32.mrb[54].mxu0 }
 0x23c   :  { %6535 = vmatmul.mubr.msk.f32.gmra.mrb[6].mxu1 %vm2004_vm2, %v9635_v22  ;;  %v1883_v14 = vpop.f32.mrb[55].mxu0 }
 0x23d   :  { %2315 = vmatprep.mubr.f32.mxu1 %v10999_v34 }
 0x23f   :  { %v1886_v25 = vpop.f32.mrb[56].mxu0 }
 0x240   :  { %6536 = vmatmul.mubr.msk.f32.gmra.mrb[8].mxu1 %vm2004_vm2, %v9637_v29  ;;  %v1888_v28 = vpop.f32.mrb[57].mxu0 }
 0x241   :  { %2321 = vmatprep.mubr.f32.mxu1 %v10999_v34  ;;  %v2580_v28 = vld [vmem:[#allocation9 + $0x58] sm:$0x33] }
 0x243   :  { %v1891_v17 = vpop.f32.mrb[58].mxu0 }
 0x244   :  { %6537 = vmatmul.mubr.msk.f32.gmra.mrb[10].mxu1 %vm2004_vm2, %v9639_v30  ;;  %v1893_v32 = vpop.f32.mrb[59].mxu0 }
 0x245   :  { %2327 = vmatprep.mubr.f32.mxu1 %v10999_v34 }
 0x247   :  { %v1896_v26 = vpop.f32.mrb[60].mxu0 }
 0x248   :  { %6538 = vmatmul.mubr.msk.f32.gmra.mrb[12].mxu1 %vm2004_vm2, %v9641_v35  ;;  %v1898_v22 = vpop.f32.mrb[61].mxu0 }
 0x249   :  { %2333 = vmatprep.mubr.f32.mxu1 %v10999_v34  ;;  %v7903_v22 = vld [vmem:[#allocation9 + $0x48] ss:$8 sps:$4 sm:$0xff]  }
 0x24b   :  { %v1901_v15 = vpop.f32.mrb[62].mxu0 }
 0x24c   :  { %6539 = vmatmul.mubr.msk.f32.gmra.mrb[14].mxu1 %vm2004_vm2, %v9643_v23  ;;  %v1903_v29 = vpop.f32.mrb[63].mxu0 }
 0x24d   :  { %2339 = vmatprep.mubr.f32.mxu1 %v10999_v34 }
 0x24f   :  { %v1906_v31 = vpop.f32.mrb[64].mxu0 }
 0x250   :  { %6540 = vmatmul.mubr.msk.f32.gmra.mrb[16].mxu1 %vm2004_vm2, %v9645_v20  ;;  %v1908_v30 = vpop.f32.mrb[65].mxu0 }
 0x251   :  { %2345 = vmatprep.mubr.f32.mxu1 %v10999_v34 }
 0x253   :  { %v1911_v33 = vpop.f32.mrb[66].mxu0 }
 0x254   :  { %6541 = vmatmul.mubr.msk.f32.gmra.mrb[18].mxu1 %vm2004_vm2, %v9647_v21  ;;  %v1913_v35 = vpop.f32.mrb[67].mxu0  ;;  %v2586_v21 = vunpack.c.h.bf16 %v2580_v28 }
 0x255   :  { %2351 = vmatprep.mubr.f32.mxu1 %v10999_v34 }
 0x257   :  { %v1916_v14 = vpop.f32.mrb[68].mxu0 }
 0x258   :  { %6542 = vmatmul.mubr.msk.f32.gmra.mrb[20].mxu1 %vm2004_vm2, %v9649_v18  ;;  %v1918_v23 = vpop.f32.mrb[69].mxu0  ;;  %v2585_v18 = vunpack.c.l.bf16 %v2580_v28 }
 0x259   :  { %2357 = vmatprep.mubr.f32.mxu1 %v10999_v34 }
 0x25b   :  { %v1921_v32 = vpop.f32.mrb[70].mxu0 }
 0x25c   :  { %6543 = vmatmul.mubr.msk.f32.gmra.mrb[22].mxu1 %vm2004_vm2, %v9651_v19  ;;  %v1923_v20 = vpop.f32.mrb[71].mxu0 }
 0x25d   :  { %2480 = vmatprep.mubr.f32.mxu1 %v10999_v34 }
 0x25f   :  { %v1926_v29 = vpop.f32.mrb[72].mxu0 }
 0x260   :  { %6546 = vmatmul.mubr.msk.f32.vlgmr.msra.gmra.mrb[0].mxu1 %vm2004_vm2, %v1866_v37  ;;  %v1928_v30 = vpop.f32.mrb[73].mxu0 }
 0x261   :  { %7063 = vmatpush1.bf16.msra.mxu1 %v7903_v22  ;;  %2486 = vmatprep.mubr.f32.mxu1 %v10999_v34 }
 0x262   :  { %6558 = vmatprep.subr.msk.mxu1 %vm2041_vm1, %v2586_v21 }
 0x263   :  { %v1931_v35 = vpop.f32.mrb[74].mxu0 }
 0x264   :  { %6547 = vmatmul.mubr.msk.f32.gmra.mrb[2].mxu1 %vm2004_vm2, %v1871_v27  ;;  %v1933_v23 = vpop.f32.mrb[75].mxu0 }
 0x265   :  { %2492 = vmatprep.mubr.f32.mxu1 %v10999_v34  ;;  %6559 = vmatpush1.msk.msra.mxu1 %vm2041_vm1, %v2585_v18 }
 0x267   :  { %v1936_v19 = vpop.f32.mrb[76].mxu0 }
 0x268   :  { %6548 = vmatmul.mubr.msk.f32.gmra.mrb[4].mxu1 %vm2004_vm2, %v1876_v16  ;;  %v1938_v20 = vpop.f32.mrb[77].mxu0 }
 0x269   :  { %2498 = vmatprep.mubr.f32.mxu1 %v10999_v34 }
 0x26b   :  { %v1941_v37 = vpop.f32.mrb[78].mxu0 }
 0x26c   :  { %6549 = vmatmul.mubr.msk.f32.gmra.mrb[6].mxu1 %vm2004_vm2, %v1881_v24  ;;  %v1943_v28 = vpop.f32.mrb[79].mxu0 }
 0x26d   :  { %2504 = vmatprep.mubr.f32.mxu1 %v10999_v34 }
 0x26f   :  { %v1946_v22 = vpop.f32.mrb[80].mxu0 }
 0x270   :  { %6550 = vmatmul.mubr.msk.f32.gmra.mrb[8].mxu1 %vm2004_vm2, %v1886_v25  ;;  %v1948_v27 = vpop.f32.mrb[81].mxu0 }
 0x271   :  { %2510 = vmatprep.mubr.f32.mxu1 %v10999_v34 }
 0x273   :  { %v1951_v21 = vpop.f32.mrb[82].mxu0 }
 0x274   :  { %6551 = vmatmul.mubr.msk.f32.gmra.mrb[10].mxu1 %vm2004_vm2, %v1891_v17  ;;  %v1953_v30 = vpop.f32.mrb[83].mxu0 }
 0x275   :  { %2516 = vmatprep.mubr.f32.mxu1 %v10999_v34 }
 0x277   :  { %v1956_v16 = vpop.f32.mrb[84].mxu0 }
 0x278   :  { %6552 = vmatmul.mubr.msk.f32.gmra.mrb[12].mxu1 %vm2004_vm2, %v1896_v26  ;;  %v1958_v18 = vpop.f32.mrb[85].mxu0 }
 0x279   :  { %2522 = vmatprep.mubr.f32.mxu1 %v10999_v34 }
 0x27b   :  { %v1961_v24 = vpop.f32.mrb[86].mxu0 }
 0x27c   :  { %6553 = vmatmul.mubr.msk.f32.gmra.mrb[14].mxu1 %vm2004_vm2, %v1901_v15  ;;  %v1963_v23 = vpop.f32.mrb[87].mxu0 }
 0x27d   :  { %2528 = vmatprep.mubr.f32.mxu1 %v10999_v34 }
 0x27f   :  { %v1966_v25 = vpop.f32.mrb[88].mxu0 }
 0x280   :  { %6554 = vmatmul.mubr.msk.f32.gmra.mrb[16].mxu1 %vm2004_vm2, %v1906_v31  ;;  %v1968_v20 = vpop.f32.mrb[89].mxu0  ;;  %v2791_v31 = vlaneseq }
 0x281   :  { %2534 = vmatprep.mubr.f32.mxu1 %v10999_v34 }
 0x283   :  { %v1971_v17 = vpop.f32.mrb[90].mxu0 }
 0x284   :  { %6555 = vmatmul.mubr.msk.f32.gmra.mrb[18].mxu1 %vm2004_vm2, %v1911_v33  ;;  %v1973_v28 = vpop.f32.mrb[91].mxu0  ;;  %v9766_v33 = vshrl.u32 %v2791_v31, 7 }
 0x285   :  { %2540 = vmatprep.mubr.f32.mxu1 %v10999_v34 }
 0x286   :  { %11000 = vst [vmem:[#allocation207_spill] sm:$0xff] %v9766_v33 }
 0x287   :  { %v1976_v26 = vpop.f32.mrb[92].mxu0 }
 0x288   :  { %6556 = vmatmul.mubr.msk.f32.gmra.mrb[20].mxu1 %vm2004_vm2, %v1916_v14  ;;  %v1978_v27 = vpop.f32.mrb[93].mxu0  ;;  %v9769_v14 = vsub.s32 0, %v9766_v33 }
 0x289   :  { %2546 = vmatprep.mubr.f32.mxu1 %v10999_v34 }
 0x28a   :  { %11001 = vst [vmem:[#allocation208_spill] sm:$0xff] %v9769_v14 }
 0x28b   :  { %v1981_v15 = vpop.f32.mrb[94].mxu0 }
 0x28c   :  { %6557 = vmatmul.mubr.msk.f32.gmra.mrb[22].mxu1 %vm2004_vm2, %v1921_v32  ;;  %v1983_v30 = vpop.f32.mrb[95].mxu0  ;;  %v1390_v32 = vld [vmem:[#allocation12] ss:$8 sm:$0x3] }
 0x28d   :  { %2693 = vmatprep.mubr.f32.mxu1 %v10999_v34 }
 0x290   :  { %6560 = vmatmul.mubr.msk.f32.vlgmr.msra.gmra.mrb[0].mxu1 %vm2004_vm2, %v1926_v29  ;;  %v9772_v29 = vsub.s32 1, %v9766_v33 }
 0x291   :  { %2699 = vmatprep.mubr.f32.mxu1 %v10999_v34 }
 0x292   :  { %11002 = vst [vmem:[#allocation209_spill] sm:$0xff] %v9772_v29 }
 0x294   :  { %6561 = vmatmul.mubr.msk.f32.gmra.mrb[2].mxu1 %vm2004_vm2, %v1931_v35  ;;  %v9775_v35 = vrot.slane %v1390_v32, %v9769_v14 }
 0x295   :  { %2705 = vmatprep.mubr.f32.mxu1 %v10999_v34 }
 0x298   :  { %6562 = vmatmul.mubr.msk.f32.gmra.mrb[4].mxu1 %vm2004_vm2, %v1936_v19  ;;  %v9778_v19 = vrot.slane %v1390_v32, %v9772_v29 }
 0x299   :  { %2711 = vmatprep.mubr.f32.mxu1 %v10999_v34 }
 0x29c   :  { %6563 = vmatmul.mubr.msk.f32.gmra.mrb[6].mxu1 %vm2004_vm2, %v1941_v37 }
 0x29d   :  { %2717 = vmatprep.mubr.f32.mxu1 %v10999_v34 }
 0x2a0   :  { %6564 = vmatmul.mubr.msk.f32.gmra.mrb[8].mxu1 %vm2004_vm2, %v1946_v22 }
 0x2a1   :  { %2723 = vmatprep.mubr.f32.mxu1 %v10999_v34 }
 0x2a4   :  { %6565 = vmatmul.mubr.msk.f32.gmra.mrb[10].mxu1 %vm2004_vm2, %v1951_v21 }
 0x2a5   :  { %2729 = vmatprep.mubr.f32.mxu1 %v10999_v34 }
 0x2a8   :  { %6566 = vmatmul.mubr.msk.f32.gmra.mrb[12].mxu1 %vm2004_vm2, %v1956_v16 }
 0x2a9   :  { %2735 = vmatprep.mubr.f32.mxu1 %v10999_v34 }
 0x2ac   :  { %6567 = vmatmul.mubr.msk.f32.gmra.mrb[14].mxu1 %vm2004_vm2, %v1961_v24 }
 0x2ad   :  { %2741 = vmatprep.mubr.f32.mxu1 %v10999_v34 }
 0x2b0   :  { %6568 = vmatmul.mubr.msk.f32.gmra.mrb[16].mxu1 %vm2004_vm2, %v1966_v25 }
 0x2b1   :  { %2747 = vmatprep.mubr.f32.mxu1 %v10999_v34 }
 0x2b4   :  { %6569 = vmatmul.mubr.msk.f32.gmra.mrb[18].mxu1 %vm2004_vm2, %v1971_v17 }
 0x2b5   :  { %2753 = vmatprep.mubr.f32.mxu1 %v10999_v34 }
 0x2b8   :  { %6570 = vmatmul.mubr.msk.f32.gmra.mrb[20].mxu1 %vm2004_vm2, %v1976_v26 }
 0x2b9   :  { %2759 = vmatprep.mubr.f32.mxu1 %v10999_v34 }
 0x2bc   :  { %6571 = vmatmul.mubr.msk.f32.gmra.mrb[22].mxu1 %vm2004_vm2, %v1981_v15 }
 0x363   :  { %v2695_v37 = vpop.f32.mrb[0].mxu1 }
 0x364   :  { %v9781_v22 = vadd.f32 %v9775_v35, %v2695_v37  ;;  %v2697_v21 = vpop.f32.mrb[1].mxu1 }
 0x365   :  { %v9784_v16 = vadd.f32 %v9778_v19, %v2697_v21 }
 0x366   :  { %v9787_v18 = vmul.f32 0.01, %v9781_v22 }
 0x367   :  { %v9790_v24 = vmul.f32 0.01, %v9784_v16  ;;  %v2701_v23 = vpop.f32.mrb[2].mxu1 }
 0x368   :  { %v9795_v20 = vadd.f32 %v9775_v35, %v2701_v23  ;;  %v2703_v17 = vpop.f32.mrb[3].mxu1 }
 0x369   :  { %v9800_v26 = vadd.f32 %v9778_v19, %v2703_v17 }
 0x36a   :  { %v9803_v27 = vmul.f32 0.01, %v9795_v20 }
 0x36b   :  { %v9806_v15 = vmul.f32 0.01, %v9800_v26  ;;  %v2707_v30 = vpop.f32.mrb[4].mxu1 }
 0x36c   :  { %v9811_v32 = vadd.f32 %v9775_v35, %v2707_v30  ;;  %v2709_v37 = vpop.f32.mrb[5].mxu1 }
 0x36d   :  { %v9816_v23 = vadd.f32 %v9778_v19, %v2709_v37 }
 0x36e   :  { %v9819_v17 = vmul.f32 0.01, %v9811_v32 }
 0x36f   :  { %v9822_v25 = vmul.f32 0.01, %v9816_v23  ;;  %v2713_v28 = vpop.f32.mrb[6].mxu1 }
 0x370   :  { %v9827_v30 = vadd.f32 %v9775_v35, %v2713_v28  ;;  %v2715_v33 = vpop.f32.mrb[7].mxu1 }
 0x371   :  { %v9832_v37 = vadd.f32 %v9778_v19, %v2715_v33 }
 0x372   :  { %v9835_v29 = vmul.f32 0.01, %v9827_v30 }
 0x373   :  { %v9838_v14 = vmul.f32 0.01, %v9832_v37  ;;  %v2719_v12 = vpop.f32.mrb[8].mxu1 }
 0x374   :  { %v9843_v28 = vadd.f32 %v9775_v35, %v2719_v12  ;;  %v2721_v13 = vpop.f32.mrb[9].mxu1 }
 0x375   :  { %v9848_v33 = vadd.f32 %v9778_v19, %v2721_v13 }
 0x376   :  { %v9851_v36 = vmul.f32 0.01, %v9843_v28 }
 0x377   :  { %v9854_v63 = vmul.f32 0.01, %v9848_v33  ;;  %v2725_v38 = vpop.f32.mrb[10].mxu1 }
 0x378   :  { %v9859_v12 = vadd.f32 %v9775_v35, %v2725_v38  ;;  %v2727_v61 = vpop.f32.mrb[11].mxu1 }
 0x379   :  { %v9864_v13 = vadd.f32 %v9778_v19, %v2727_v61 }
 0x37a   :  { %v9867_v62 = vmul.f32 0.01, %v9859_v12 }
 0x37b   :  { %v9870_v59 = vmul.f32 0.01, %v9864_v13  ;;  %v2731_v60 = vpop.f32.mrb[12].mxu1 }
 0x37c   :  { %v9875_v38 = vadd.f32 %v9775_v35, %v2731_v60  ;;  %v2733_v57 = vpop.f32.mrb[13].mxu1 }
 0x37d   :  { %v2860_v21 = vmax.f32 %v9864_v13, %v9870_v59  ;;  %v9880_v61 = vadd.f32 %v9778_v19, %v2733_v57 }
 0x37e   :  { %v9883_v58 = vmul.f32 0.01, %v9875_v38 }
 0x37f   :  { %v2838_v55 = vmul.f32 0.01, %v9880_v61  ;;  %v2737_v56 = vpop.f32.mrb[14].mxu1 }
 0x380   :  { %v9889_v31 = vadd.f32 %v9775_v35, %v2737_v56  ;;  %v2739_v60 = vpop.f32.mrb[15].mxu1 }
 0x381   :  { %v2862_v53 = vmax.f32 %v9880_v61, %v2838_v55  ;;  %v2816_v59 = vadd.f32 %v9778_v19, %v2739_v60 }
 0x382   :  { %v2839_v57 = vmul.f32 0.01, %v9889_v31 }
 0x383   :  { %v2840_v13 = vmul.f32 0.01, %v2816_v59  ;;  %v2743_v54 = vpop.f32.mrb[16].mxu1 }
 0x384   :  { %v2863_v10 = vmax.f32 %v9889_v31, %v2839_v57  ;;  %v9896_v9 = vadd.f32 %v9775_v35, %v2743_v54  ;;  %v2745_v8 = vpop.f32.mrb[17].mxu1 }
 0x385   :  { %v2864_v7 = vmax.f32 %v2816_v59, %v2840_v13  ;;  %v2818_v11 = vadd.f32 %v9778_v19, %v2745_v8 }
 0x386   :  { %v2841_v56 = vmul.f32 0.01, %v9896_v9 }
 0x387   :  { %v2842_v6 = vmul.f32 0.01, %v2818_v11  ;;  %v2749_v5 = vpop.f32.mrb[18].mxu1 }
 0x388   :  { %v2865_v55 = vmax.f32 %v9896_v9, %v2841_v56  ;;  %v2819_v61 = vadd.f32 %v9775_v35, %v2749_v5  ;;  %v2751_v60 = vpop.f32.mrb[19].mxu1 }
 0x389   :  { %v2866_v4 = vmax.f32 %v2818_v11, %v2842_v6  ;;  %v2820_v3 = vadd.f32 %v9778_v19, %v2751_v60 }
 0x38a   :  { %v2843_v31 = vmul.f32 0.01, %v2819_v61 }
 0x38b   :  { %v2844_v57 = vmul.f32 0.01, %v2820_v3  ;;  %v2755_v54 = vpop.f32.mrb[20].mxu1 }
 0x38c   :  { %v2867_v2 = vmax.f32 %v2819_v61, %v2843_v31  ;;  %v2821_v59 = vadd.f32 %v9775_v35, %v2755_v54  ;;  %v2757_v13 = vpop.f32.mrb[21].mxu1 }
 0x38d   :  { %v2868_v8 = vmax.f32 %v2820_v3, %v2844_v57  ;;  %v2822_v1 = vadd.f32 %v9778_v19, %v2757_v13 }
 0x38e   :  { %v2845_v51 = vmul.f32 0.01, %v2821_v59 }
 0x38f   :  { %v2846_v52 = vmul.f32 0.01, %v2822_v1  ;;  %v2761_v49 = vpop.f32.mrb[22].mxu1 }
 0x390   :  { %v2869_v9 = vmax.f32 %v2821_v59, %v2845_v51  ;;  %v2823_v5 = vadd.f32 %v9775_v35, %v2761_v49  ;;  %v2763_v56 = vpop.f32.mrb[23].mxu1 }
 0x391   :  { %v2870_v6 = vmax.f32 %v2822_v1, %v2846_v52  ;;  %v2824_v11 = vadd.f32 %v9778_v19, %v2763_v56 }
 0x392   :  { %v2847_v60 = vmul.f32 0.01, %v2823_v5 }
 0x393   :  { %v2848_v50 = vmul.f32 0.01, %v2824_v11 }
 0x394   :  { %v2871_v0 = vmax.f32 %v2823_v5, %v2847_v60 }
 0x395   :  { %v2872_v61 = vmax.f32 %v2824_v11, %v2848_v50 }
 0x396   :  { %8013 = dma.done.wait [#allocation8], 1536 }
 0x397   :  { %8014 = vsyncadd [#allocation8], 4294965760  ;;  %v11003_v3 = vmax.f32 %v9784_v16, %v9790_v24  ;;  %v11004_v31 = vmax.f32 %v9800_v26, %v9806_v15  ;;  %v11005_v49 = vmax.f32 %v9781_v22, %v9787_v18  ;;  %v11006_v1 = vmax.f32 %v9795_v20, %v9803_v27  ;;  %3057 = vmatprep.mubr.f32.mxu1 %v10999_v34 }
 0x398   :  { %v11007_v52 = vmax.f32 %v9816_v23, %v9822_v25  ;;  %v11008_v50 = vmax.f32 %v9832_v37, %v9838_v14 }
 0x399   :  { %v7064_v57 = vpack.c.bf16 %v11004_v31, %v11003_v3  ;;  %v7066_v51 = vpack.c.bf16 %v11006_v1, %v11005_v49 }
 0x39a   :  { %v7068_v35 = vpack.c.bf16 %v11008_v50, %v11007_v52 }
 0x39b   :  { %8015 = dma.done.wait [#allocation8 + $0x1], 13824 }
 0x39c   :  { %8016 = vsyncadd [#allocation8 + $0x1], 4294953472  ;;  %7065 = vmatprep.subr.bf16.mxu1 %v7064_v57  ;;  %v11009_v19 = vmax.f32 %v9811_v32, %v9819_v17  ;;  %v11010_v22 = vmax.f32 %v9827_v30, %v9835_v29  ;;  %v11011_v18 = vmax.f32 %v9848_v33, %v9854_v63  ;;  %v11012_v14 = vmax.f32 %v9843_v28, %v9851_v36  ;;  %v11016_v32 = vld [vmem:[#allocation71_spill] sm:$0xff]  ;;  %v11019_v17 = vld [vmem:[#allocation72_spill] sm:$0xff] }
 0x39d   :  { %7067 = vmatpush1.bf16.msra.mxu1 %v7066_v51  ;;  %v11013_v25 = vmax.f32 %v9859_v12, %v9867_v62  ;;  %v7748_v26 = vcombine.high %v8339_v39, %v8344_v40  ;;  %v7076_v27 = vpack.c.bf16 %v2864_v7, %v2862_v53  ;;  %v7749_v29 = vcombine.low %v8339_v39, %v8344_v40  ;;  %v11021_v33 = vld [vmem:[#allocation33_spill] sm:$0xff]  ;;  %v11023_v13 = vld [vmem:[#allocation35_spill] sm:$0xff]  ;;  %v11024_v5 = vld [vmem:[#allocation36_spill] sm:$0xff] }
 0x39e   :  { %v7070_v16 = vpack.c.bf16 %v11010_v22, %v11009_v19  ;;  %7069 = vmatprep.subr.bf16.mxu1 %v7068_v35  ;;  %v7072_v24 = vpack.c.bf16 %v2860_v21, %v11011_v18  ;;  %v7750_v63 = vcombine.high %v8349_v41, %v8354_v42  ;;  %v7751_v36 = vcombine.low %v8349_v41, %v8354_v42  ;;  %v11017_v21 = vld [vmem:[#allocation70_spill] sm:$0xff]  ;;  %v11025_v11 = vld [vmem:[#allocation37_spill] sm:$0xff]  ;;  %v11027_v49 = vld [vmem:[#allocation39_spill] sm:$0xff] }
 0x39f   :  { %v7074_v20 = vpack.c.bf16 %v11013_v25, %v11012_v14  ;;  %7089 = vmatprep.subr.bf16.mxu0 %v7748_v26  ;;  %v11014_v62 = vmax.f32 %v9875_v38, %v9883_v58  ;;  %v7752_v7 = vcombine.high %v8359_v43, %v8364_v44  ;;  %v7080_v53 = vpack.c.bf16 %v2868_v8, %v2866_v4  ;;  %v11026_v3 = vld [vmem:[#allocation38_spill] sm:$0xff]  ;;  %v11028_v52 = vld [vmem:[#allocation40_spill] sm:$0xff]  ;;  %v11029_v19 = vld [vmem:[#allocation41_spill] sm:$0xff] }
 0x3a0   :  { %7091 = vmatpush1.bf16.msra.mxu0 %v7749_v29  ;;  %v7753_v39 = vcombine.low %v8359_v43, %v8364_v44  ;;  %v7082_v40 = vpack.c.bf16 %v2867_v2, %v2865_v55  ;;  %v7754_v41 = vcombine.high %v8369_v45, %v8374_v46  ;;  %v7084_v42 = vpack.c.bf16 %v2872_v61, %v2870_v6  ;;  %v11015_v43 = vld [vmem:[#allocation31_spill] sm:$0xff]  ;;  %v11022_v55 = vld [vmem:[#allocation34_spill] sm:$0xff]  ;;  %v11034_v29 = vld [vmem:[#allocation76_spill] sm:$0xff] }
 0x3a1   :  { %7071 = vmatpush1.bf16.msra.mxu1 %v7070_v16  ;;  %v7078_v15 = vpack.c.bf16 %v2863_v10, %v11014_v62  ;;  %7093 = vmatprep.subr.bf16.mxu0 %v7750_v63  ;;  %v7755_v10 = vcombine.low %v8369_v45, %v8374_v46  ;;  %v7086_v58 = vpack.c.bf16 %v2871_v0, %v2869_v9  ;;  %v2896_v44 = vunpack.c.l.bf16 %v11015_v43  ;;  %v11018_v46 = vld [vmem:[#allocation73_spill] sm:$0xff]  ;;  %v11030_v18 = vld [vmem:[#allocation75_spill] sm:$0xff] }
 0x3a2   :  { %7073 = vmatprep.subr.bf16.mxu1 %v7072_v24  ;;  %v7756_v4 = vcombine.high %v8379_v47, %v8384_v48  ;;  %v7757_v2 = vcombine.low %v8379_v47, %v8384_v48  ;;  %vm2920_vm3 = vcmask 785408   ;;  %v7758_v23 = vcombine.high %v11017_v21, %v11016_v32  ;;  %v11020_v48 = vld [vmem:[#allocation32_spill] sm:$0xff]  ;;  %v11031_v24 = vld [vmem:[#allocation74_spill] sm:$0xff] }
 0x3a3   :  { %v2897_v0 = vunpack.c.h.bf16 %v11015_v43  ;;  %v7759_v45 = vcombine.low %v11017_v21, %v11016_v32  ;;  %v7760_v47 = vcombine.high %v11019_v17, %v11018_v46  ;;  %v2898_v30 = vunpack.c.l.bf16 %v11020_v48  ;;  %v11042_v32 = vld [vmem:[#allocation84_spill] sm:$0xff] }
 0x3a4   :  { %7095 = vmatpush1.bf16.msra.mxu0 %v7751_v36  ;;  %v7761_v37 = vcombine.low %v11019_v17, %v11018_v46  ;;  %v2899_v28 = vunpack.c.h.bf16 %v11020_v48  ;;  %v2900_v12 = vunpack.c.l.bf16 %v11021_v33  ;;  %v2901_v38 = vunpack.c.h.bf16 %v11021_v33  ;;  %v11044_v17 = vld [vmem:[#allocation44_spill] sm:$0xff] }
 0x3a5   :  { %7075 = vmatpush1.bf16.msra.mxu1 %v7074_v20  ;;  %7097 = vmatprep.subr.bf16.mxu0 %v7752_v7  ;;  %v2902_v54 = vunpack.c.l.bf16 %v11022_v55  ;;  %v2903_v59 = vunpack.c.h.bf16 %v11022_v55  ;;  %v2904_v8 = vunpack.c.l.bf16 %v11023_v13  ;;  %v2905_v9 = vunpack.c.h.bf16 %v11023_v13  ;;  %v11032_v20 = vld [vmem:[#allocation42_spill] sm:$0xff] }
 0x3a6   :  { %7077 = vmatprep.subr.bf16.mxu1 %v7076_v27  ;;  %v2906_v56 = vunpack.c.l.bf16 %v11024_v5  ;;  %v2907_v6 = vunpack.c.h.bf16 %v11024_v5  ;;  %v2908_v60 = vunpack.c.l.bf16 %v11025_v11  ;;  %v2909_v61 = vunpack.c.h.bf16 %v11025_v11  ;;  %v11033_v27 = vld [vmem:[#allocation77_spill] sm:$0xff]  ;;  %v11036_v7 = vld [vmem:[#allocation78_spill] sm:$0xff] }
 0x3a7   :  { %v2910_v31 = vunpack.c.l.bf16 %v11026_v3  ;;  %v2911_v57 = vunpack.c.h.bf16 %v11026_v3  ;;  %v2912_v1 = vunpack.c.l.bf16 %v11027_v49  ;;  %v2913_v51 = vunpack.c.h.bf16 %v11027_v49  ;;  %v11046_v11 = vld [vmem:[#allocation46_spill] sm:$0xff]  ;;  %v11048_v49 = vld [vmem:[#allocation48_spill] sm:$0xff] }
 0x3a8   :  { %7099 = vmatpush1.bf16.msra.mxu0 %v7753_v39  ;;  %v2914_v50 = vunpack.c.l.bf16 %v11028_v52  ;;  %v2915_v35 = vunpack.c.h.bf16 %v11028_v52  ;;  %v2916_v22 = vunpack.c.l.bf16 %v11029_v19  ;;  %v2917_v16 = vunpack.c.h.bf16 %v11029_v19  ;;  %v11050_v19 = vld [vmem:[#allocation50_spill] sm:$0xff] }
 0x3a9   :  { %7079 = vmatpush1.bf16.msra.mxu1 %v7078_v15  ;;  %7101 = vmatprep.subr.bf16.mxu0 %v7754_v41  ;;  %v7762_v14 = vcombine.high %v11031_v24, %v11030_v18  ;;  %v7763_v25 = vcombine.low %v11031_v24, %v11030_v18  ;;  %v2918_v26 = vunpack.c.l.bf16 %v11032_v20  ;;  %v7764_v63 = vcombine.high %v11034_v29, %v11033_v27  ;;  %v11035_v15 = vld [vmem:[#allocation79_spill] sm:$0xff]  ;;  %v11038_v41 = vld [vmem:[#allocation80_spill] sm:$0xff] }
 0x3aa   :  { %7081 = vmatprep.subr.bf16.mxu1 %v7080_v53  ;;  %v7765_v36 = vcombine.low %v11034_v29, %v11033_v27  ;;  %v2919_v62 = vunpack.c.h.bf16 %v11032_v20  ;;  %v7766_v53 = vcombine.high %v11036_v7, %v11035_v15  ;;  %v7767_v39 = vcombine.low %v11036_v7, %v11035_v15  ;;  %v11053_v20 = vld [vmem:[#allocation51_spill] sm:$0xff] }
 0x3ab   :  { %vm3365_vm4 = vcmask 719872  }
 0x3ac   :  { %7103 = vmatpush1.bf16.msra.mxu0 %v7755_v10 }
 0x3ad   :  { %7083 = vmatpush1.bf16.msra.mxu1 %v7082_v40  ;;  %7105 = vmatprep.subr.bf16.mxu0 %v7756_v4  ;;  %v11037_v40 = vld [vmem:[#allocation81_spill] sm:$0xff]  ;;  %v11040_v4 = vld [vmem:[#allocation82_spill] sm:$0xff] }
 0x3ae   :  { %7085 = vmatprep.subr.bf16.mxu1 %v7084_v42  ;;  %v7768_v42 = vcombine.high %v11038_v41, %v11037_v40  ;;  %v7769_v10 = vcombine.low %v11038_v41, %v11037_v40  ;;  %v11056_v40 = vld [vmem:[#allocation56_spill] sm:$0xff]  ;;  %v11057_v41 = vld [vmem:[#allocation55_spill] sm:$0xff] }
 0x3b0   :  { %7107 = vmatpush1.bf16.msra.mxu0 %v7757_v2  ;;  %v11041_v2 = vld [vmem:[#allocation85_spill] sm:$0xff] }
 0x3b1   :  { %7087 = vmatpush1.bf16.msra.mxu1 %v7086_v58  ;;  %7109 = vmatprep.subr.bf16.mxu0 %v7758_v23  ;;  %v11039_v58 = vld [vmem:[#allocation83_spill] sm:$0xff]  ;;  %v7772_v21 = vcombine.high %v11042_v32, %v11041_v2  ;;  %v7773_v23 = vcombine.low %v11042_v32, %v11041_v2 }
 0x3b2   :  { %v7770_v43 = vcombine.high %v11040_v4, %v11039_v58 }
 0x3b4   :  { %6572 = vmatmul.mubr.msk.f32.vlgmr.msra.gmra.mrb[24].mxu1 %vm2920_vm3, %v2896_v44  ;;  %7111 = vmatpush1.bf16.msra.mxu0 %v7759_v45  ;;  %v7771_v44 = vcombine.low %v11040_v4, %v11039_v58  ;;  %v11058_v4 = vld [vmem:[#allocation58_spill] sm:$0xff] }
 0x3b5   :  { %3063 = vmatprep.mubr.f32.mxu1 %v10999_v34  ;;  %7113 = vmatprep.subr.bf16.mxu0 %v7760_v47  ;;  %v11045_v47 = vld [vmem:[#allocation43_spill] sm:$0xff] }
 0x3b6   :  { %v7774_v48 = vcombine.high %v11045_v47, %v11044_v17 }
 0x3b8   :  { %6573 = vmatmul.mubr.msk.f32.gmra.mrb[26].mxu1 %vm2920_vm3, %v2897_v0  ;;  %7115 = vmatpush1.bf16.msra.mxu0 %v7761_v37  ;;  %v11043_v0 = vld [vmem:[#allocation86_spill] sm:$0xff] }
 0x3b9   :  { %3069 = vmatprep.mubr.f32.mxu1 %v10999_v34  ;;  %7117 = vmatprep.subr.bf16.mxu0 %v7762_v14  ;;  %v3364_v45 = vunpack.c.h.bf16 %v11043_v0  ;;  %v3363_v46 = vunpack.c.l.bf16 %v11043_v0  ;;  %v11061_v0 = vld [vmem:[#allocation59_spill] sm:$0xff] }
 0x3bc   :  { %6574 = vmatmul.mubr.msk.f32.gmra.mrb[28].mxu1 %vm2920_vm3, %v2898_v30  ;;  %7119 = vmatpush1.bf16.msra.mxu0 %v7763_v25  ;;  %v11052_v25 = vld [vmem:[#allocation52_spill] sm:$0xff] }
 0x3bd   :  { %3075 = vmatprep.mubr.f32.mxu1 %v10999_v34  ;;  %7121 = vmatprep.subr.bf16.mxu0 %v7764_v63  ;;  %v7783_v29 = vcombine.low %v11053_v20, %v11052_v25 }
 0x3c0   :  { %6575 = vmatmul.mubr.msk.f32.gmra.mrb[30].mxu1 %vm2920_vm3, %v2899_v28  ;;  %7123 = vmatpush1.bf16.msra.mxu0 %v7765_v36  ;;  %v11054_v36 = vld [vmem:[#allocation54_spill] sm:$0xff] }
 0x3c1   :  { %3081 = vmatprep.mubr.f32.mxu1 %v10999_v34  ;;  %7125 = vmatprep.subr.bf16.mxu0 %v7766_v53 }
 0x3c4   :  { %6576 = vmatmul.mubr.msk.f32.gmra.mrb[32].mxu1 %vm2920_vm3, %v2900_v12  ;;  %7127 = vmatpush1.bf16.msra.mxu0 %v7767_v39 }
 0x3c5   :  { %3087 = vmatprep.mubr.f32.mxu1 %v10999_v34  ;;  %7129 = vmatprep.subr.bf16.mxu0 %v7768_v42  ;;  %v7786_v42 = vcombine.high %v11057_v41, %v11056_v40 }
 0x3c8   :  { %6577 = vmatmul.mubr.msk.f32.gmra.mrb[34].mxu1 %vm2920_vm3, %v2901_v38  ;;  %7131 = vmatpush1.bf16.msra.mxu0 %v7769_v10  ;;  %v7787_v10 = vcombine.low %v11057_v41, %v11056_v40  ;;  %v11074_v40 = vld [vmem:[#allocation89_spill] sm:$0xff] }
 0x3c9   :  { %3093 = vmatprep.mubr.f32.mxu1 %v10999_v34  ;;  %7133 = vmatprep.subr.bf16.mxu0 %v7770_v43  ;;  %v11059_v43 = vld [vmem:[#allocation57_spill] sm:$0xff] }
 0x3ca   :  { %v7789_v32 = vcombine.low %v11059_v43, %v11058_v4 }
 0x3cc   :  { %6578 = vmatmul.mubr.msk.f32.gmra.mrb[36].mxu1 %vm2920_vm3, %v2902_v54  ;;  %7135 = vmatpush1.bf16.msra.mxu0 %v7771_v44  ;;  %v7788_v44 = vcombine.high %v11059_v43, %v11058_v4  ;;  %v11075_v43 = vld [vmem:[#allocation92_spill] sm:$0xff] }
 0x3cd   :  { %3099 = vmatprep.mubr.f32.mxu1 %v10999_v34  ;;  %7137 = vmatprep.subr.bf16.mxu0 %v7772_v21 }
 0x3d0   :  { %6579 = vmatmul.mubr.msk.f32.gmra.mrb[38].mxu1 %vm2920_vm3, %v2903_v59  ;;  %7139 = vmatpush1.bf16.msra.mxu0 %v7773_v23  ;;  %v11060_v23 = vld [vmem:[#allocation60_spill] sm:$0xff] }
 0x3d1   :  { %3105 = vmatprep.mubr.f32.mxu1 %v10999_v34  ;;  %3436 = vmatprep.subr.mxu0 %v3364_v45  ;;  %v7790_v45 = vcombine.high %v11061_v0, %v11060_v23 }
 0x3d4   :  { %6580 = vmatmul.mubr.msk.f32.gmra.mrb[40].mxu1 %vm2920_vm3, %v2904_v8  ;;  %3437 = vmatpush1.msra.mxu0 %v3363_v46 }
 0x3d5   :  { %3111 = vmatprep.mubr.f32.mxu1 %v10999_v34  ;;  %7141 = vmatprep.subr.bf16.mxu0 %v7774_v48  ;;  %v11062_v48 = vld [vmem:[#allocation62_spill] sm:$0xff] }
 0x3d8   :  { %6581 = vmatmul.mubr.msk.f32.gmra.mrb[42].mxu1 %vm2920_vm3, %v2905_v9 }
 0x3d9   :  { %3117 = vmatprep.mubr.f32.mxu1 %v10999_v34 }
 0x3dc   :  { %6582 = vmatmul.mubr.msk.f32.gmra.mrb[44].mxu1 %vm2920_vm3, %v2906_v56  ;;  %v7775_v56 = vcombine.low %v11045_v47, %v11044_v17  ;;  %v7791_v17 = vcombine.low %v11061_v0, %v11060_v23 }
 0x3dd   :  { %3123 = vmatprep.mubr.f32.mxu1 %v10999_v34 }
 0x3e0   :  { %6583 = vmatmul.mubr.msk.f32.gmra.mrb[46].mxu1 %vm2920_vm3, %v2907_v6 }
 0x3e1   :  { %3129 = vmatprep.mubr.f32.mxu1 %v10999_v34 }
 0x3e4   :  { %6584 = vmatmul.mubr.msk.f32.gmra.mrb[48].mxu1 %vm2920_vm3, %v2908_v60  ;;  %v11047_v60 = vld [vmem:[#allocation45_spill] sm:$0xff] }
 0x3e5   :  { %3135 = vmatprep.mubr.f32.mxu1 %v10999_v34 }
 0x3e8   :  { %6585 = vmatmul.mubr.msk.f32.gmra.mrb[50].mxu1 %vm2920_vm3, %v2909_v61  ;;  %v7776_v61 = vcombine.high %v11047_v60, %v11046_v11 }
 0x3e9   :  { %3141 = vmatprep.mubr.f32.mxu1 %v10999_v34 }
 0x3ec   :  { %6586 = vmatmul.mubr.msk.f32.gmra.mrb[52].mxu1 %vm2920_vm3, %v2910_v31  ;;  %v7777_v31 = vcombine.low %v11047_v60, %v11046_v11  ;;  %v11064_v60 = vld [vmem:[#allocation64_spill] sm:$0xff] }
 0x3ed   :  { %3147 = vmatprep.mubr.f32.mxu1 %v10999_v34 }
 0x3f0   :  { %6587 = vmatmul.mubr.msk.f32.gmra.mrb[54].mxu1 %vm2920_vm3, %v2911_v57 }
 0x3f1   :  { %3153 = vmatprep.mubr.f32.mxu1 %v10999_v34 }
 0x3f4   :  { %6588 = vmatmul.mubr.msk.f32.gmra.mrb[56].mxu1 %vm2920_vm3, %v2912_v1  ;;  %v11049_v1 = vld [vmem:[#allocation47_spill] sm:$0xff] }
 0x3f5   :  { %3159 = vmatprep.mubr.f32.mxu1 %v10999_v34 }
 0x3f8   :  { %6589 = vmatmul.mubr.msk.f32.gmra.mrb[58].mxu1 %vm2920_vm3, %v2913_v51  ;;  %v7778_v51 = vcombine.high %v11049_v1, %v11048_v49 }
 0x3f9   :  { %3165 = vmatprep.mubr.f32.mxu1 %v10999_v34 }
 0x3fc   :  { %6590 = vmatmul.mubr.msk.f32.gmra.mrb[60].mxu1 %vm2920_vm3, %v2914_v50  ;;  %v7779_v50 = vcombine.low %v11049_v1, %v11048_v49  ;;  %v11066_v1 = vld [vmem:[#allocation66_spill] sm:$0xff] }
 0x3fd   :  { %3171 = vmatprep.mubr.f32.mxu1 %v10999_v34 }
 0x400   :  { %6591 = vmatmul.mubr.msk.f32.gmra.mrb[62].mxu1 %vm2920_vm3, %v2915_v35 }
 0x401   :  { %3177 = vmatprep.mubr.f32.mxu1 %v10999_v34 }
 0x404   :  { %6592 = vmatmul.mubr.msk.f32.gmra.mrb[64].mxu1 %vm2920_vm3, %v2916_v22  ;;  %v11051_v22 = vld [vmem:[#allocation49_spill] sm:$0xff] }
 0x405   :  { %3183 = vmatprep.mubr.f32.mxu1 %v10999_v34  ;;  %v7781_v24 = vcombine.low %v11051_v22, %v11050_v19 }
 0x408   :  { %6593 = vmatmul.mubr.msk.f32.gmra.mrb[66].mxu1 %vm2920_vm3, %v2917_v16  ;;  %v7780_v16 = vcombine.high %v11051_v22, %v11050_v19  ;;  %v11068_v22 = vld [vmem:[#allocation68_spill] sm:$0xff] }
 0x409   :  { %3189 = vmatprep.mubr.f32.mxu1 %v10999_v34 }
 0x40c   :  { %6594 = vmatmul.mubr.msk.f32.gmra.mrb[68].mxu1 %vm2920_vm3, %v2918_v26  ;;  %v7782_v26 = vcombine.high %v11053_v20, %v11052_v25  ;;  %v11070_v20 = vld [vmem:[#allocation69_spill] sm:$0xff] }
 0x40d   :  { %3195 = vmatprep.mubr.f32.mxu1 %v10999_v34 }
 0x410   :  { %6595 = vmatmul.mubr.msk.f32.gmra.mrb[70].mxu1 %vm2920_vm3, %v2919_v62  ;;  %v11055_v62 = vld [vmem:[#allocation53_spill] sm:$0xff] }
 0x411   :  { %v7784_v15 = vcombine.high %v11055_v62, %v11054_v36  ;;  %v7785_v53 = vcombine.low %v11055_v62, %v11054_v36  ;;  %v11071_v36 = vld [vmem:[#allocation88_spill] sm:$0xff]  ;;  %v11072_v62 = vld [vmem:[#allocation87_spill] sm:$0xff] }
 0x487   :  { %v10071_v30 = vpop.f32.mrb[24].mxu1 }
 0x488   :  { %v3061_v37 = vpop.f32.mrb[25].mxu1 }
 0x48b   :  { %v10073_v28 = vpop.f32.mrb[26].mxu1 }
 0x48c   :  { %v10075_v33 = vpop.f32.mrb[27].mxu1 }
 0x48f   :  { %v10077_v12 = vpop.f32.mrb[28].mxu1 }
 0x490   :  { %v10079_v38 = vpop.f32.mrb[29].mxu1 }
 0x493   :  { %v10081_v55 = vpop.f32.mrb[30].mxu1 }
 0x494   :  { %v10083_v54 = vpop.f32.mrb[31].mxu1 }
 0x497   :  { %v10085_v59 = vpop.f32.mrb[32].mxu1 }
 0x498   :  { %v10087_v13 = vpop.f32.mrb[33].mxu1 }
 0x49b   :  { %v10089_v8 = vpop.f32.mrb[34].mxu1 }
 0x49c   :  { %v10091_v9 = vpop.f32.mrb[35].mxu1 }
 0x49f   :  { %v3095_v5 = vpop.f32.mrb[36].mxu1 }
 0x4a0   :  { %v3097_v6 = vpop.f32.mrb[37].mxu1 }
 0x4a1   :  { %6596 = vmatprep.mubr.msk.f32.mxu0 %vm3365_vm4, %v3097_v6 }
 0x4a2   :  { %3449 = vmatmul.mubr.f32.vlgmr.msra.gmra.mrb[96].mxu0 %v3095_v5 }
 0x4a3   :  { %7143 = vmatpush1.bf16.msra.mxu0 %v7775_v56  ;;  %v3101_v3 = vpop.f32.mrb[38].mxu1 }
 0x4a4   :  { %v3103_v57 = vpop.f32.mrb[39].mxu1  ;;  %7145 = vmatprep.subr.bf16.mxu0 %v7776_v61  ;;  %v11065_v61 = vld [vmem:[#allocation63_spill] sm:$0xff] }
 0x4a5   :  { %6597 = vmatprep.mubr.msk.f32.mxu0 %vm3365_vm4, %v3103_v57  ;;  %v7795_v57 = vcombine.low %v11065_v61, %v11064_v60 }
 0x4a6   :  { %3455 = vmatmul.mubr.f32.gmra.mrb[98].mxu0 %v3101_v3  ;;  %v7794_v3 = vcombine.high %v11065_v61, %v11064_v60 }
 0x4a7   :  { %7147 = vmatpush1.bf16.msra.mxu0 %v7777_v31  ;;  %v3107_v52 = vpop.f32.mrb[40].mxu1 }
 0x4a8   :  { %v3109_v35 = vpop.f32.mrb[41].mxu1  ;;  %7149 = vmatprep.subr.bf16.mxu0 %v7778_v51  ;;  %v11067_v51 = vld [vmem:[#allocation65_spill] sm:$0xff] }
 0x4a9   :  { %6598 = vmatprep.mubr.msk.f32.mxu0 %vm3365_vm4, %v3109_v35  ;;  %v7797_v35 = vcombine.low %v11067_v51, %v11066_v1 }
 0x4aa   :  { %3461 = vmatmul.mubr.f32.gmra.mrb[100].mxu0 %v3107_v52  ;;  %v7796_v52 = vcombine.high %v11067_v51, %v11066_v1  ;;  %v11083_v1 = vld [vmem:[#allocation100_spill] sm:$0xff] }
 0x4ab   :  { %7151 = vmatpush1.bf16.msra.mxu0 %v7779_v50  ;;  %v3113_v18 = vpop.f32.mrb[42].mxu1 }
 0x4ac   :  { %v3115_v14 = vpop.f32.mrb[43].mxu1  ;;  %7153 = vmatprep.subr.bf16.mxu0 %v7780_v16  ;;  %v11069_v16 = vld [vmem:[#allocation67_spill] sm:$0xff] }
 0x4ad   :  { %6599 = vmatprep.mubr.msk.f32.mxu0 %vm3365_vm4, %v3115_v14  ;;  %v7799_v14 = vcombine.low %v11069_v16, %v11068_v22 }
 0x4ae   :  { %3467 = vmatmul.mubr.f32.gmra.mrb[102].mxu0 %v3113_v18  ;;  %v7798_v18 = vcombine.high %v11069_v16, %v11068_v22  ;;  %v11087_v16 = vld [vmem:[#allocation104_spill] sm:$0xff] }
 0x4af   :  { %7155 = vmatpush1.bf16.msra.mxu0 %v7781_v24  ;;  %v3119_v27 = vpop.f32.mrb[44].mxu1 }
 0x4b0   :  { %v3121_v63 = vpop.f32.mrb[45].mxu1  ;;  %7157 = vmatprep.subr.bf16.mxu0 %v7782_v26  ;;  %v3282_v26 = vunpack.c.h.bf16 %v11070_v20 }
 0x4b1   :  { %6600 = vmatprep.mubr.msk.f32.mxu0 %vm3365_vm4, %v3121_v63 }
 0x4b2   :  { %3473 = vmatmul.mubr.f32.gmra.mrb[104].mxu0 %v3119_v27 }
 0x4b3   :  { %7159 = vmatpush1.bf16.msra.mxu0 %v7783_v29  ;;  %v3125_v7 = vpop.f32.mrb[46].mxu1  ;;  %v3281_v29 = vunpack.c.l.bf16 %v11070_v20  ;;  %v11089_v20 = vld [vmem:[#allocation106_spill] sm:$0xff] }
 0x4b4   :  { %v3127_v39 = vpop.f32.mrb[47].mxu1  ;;  %7161 = vmatprep.subr.bf16.mxu0 %v7784_v15  ;;  %v7800_v15 = vcombine.high %v11072_v62, %v11071_v36 }
 0x4b5   :  { %6601 = vmatprep.mubr.msk.f32.mxu0 %vm3365_vm4, %v3127_v39  ;;  %v11073_v39 = vld [vmem:[#allocation90_spill] sm:$0xff] }
 0x4b6   :  { %3479 = vmatmul.mubr.f32.gmra.mrb[106].mxu0 %v3125_v7  ;;  %v7802_v41 = vcombine.high %v11074_v40, %v11073_v39  ;;  %v7803_v4 = vcombine.low %v11074_v40, %v11073_v39  ;;  %v11093_v39 = vld [vmem:[#allocation110_spill] sm:$0xff]  ;;  %v11094_v40 = vld [vmem:[#allocation109_spill] sm:$0xff] }
 0x4b7   :  { %7163 = vmatpush1.bf16.msra.mxu0 %v7785_v53  ;;  %6602 = vmatprep.mubr.msk.f32.mxu0 %vm3365_vm4, %v3061_v37  ;;  %v10126_v58 = vpop.f32.mrb[48].mxu1  ;;  %v11063_v37 = vld [vmem:[#allocation61_spill] sm:$0xff]  ;;  %v7801_v53 = vcombine.low %v11072_v62, %v11071_v36  ;;  %v11091_v36 = vld [vmem:[#allocation108_spill] sm:$0xff]  ;;  %v11092_v62 = vld [vmem:[#allocation107_spill] sm:$0xff] }
 0x4b8   :  { %7165 = vmatprep.subr.bf16.mxu0 %v7786_v42  ;;  %v10130_v2 = vpop.f32.mrb[49].mxu1  ;;  %v7792_v5 = vcombine.high %v11063_v37, %v11062_v48  ;;  %v7793_v6 = vcombine.low %v11063_v37, %v11062_v48 }
 0x4bb   :  { %7167 = vmatpush1.bf16.msra.mxu0 %v7787_v10  ;;  %v10134_v21 = vpop.f32.mrb[50].mxu1 }
 0x4bc   :  { %7169 = vmatprep.subr.bf16.mxu0 %v7788_v44  ;;  %v10138_v46 = vpop.f32.mrb[51].mxu1  ;;  %v11076_v44 = vld [vmem:[#allocation91_spill] sm:$0xff] }
 0x4bf   :  { %7171 = vmatpush1.bf16.msra.mxu0 %v7789_v32  ;;  %v10142_v47 = vpop.f32.mrb[52].mxu1  ;;  %v7804_v32 = vcombine.high %v11076_v44, %v11075_v43 }
 0x4c0   :  { %7173 = vmatprep.subr.bf16.mxu0 %v7790_v45  ;;  %v10146_v56 = vpop.f32.mrb[53].mxu1  ;;  %v11078_v45 = vld [vmem:[#allocation93_spill] sm:$0xff] }
 0x4c3   :  { %7175 = vmatpush1.bf16.msra.mxu0 %v7791_v17  ;;  %v10150_v11 = vpop.f32.mrb[54].mxu1 }
 0x4c4   :  { %7177 = vmatprep.subr.bf16.mxu0 %v7792_v5  ;;  %v10154_v31 = vpop.f32.mrb[55].mxu1  ;;  %v11080_v5 = vld [vmem:[#allocation95_spill] sm:$0xff] }
 0x4c7   :  { %7179 = vmatpush1.bf16.msra.mxu0 %v7793_v6  ;;  %v10158_v49 = vpop.f32.mrb[56].mxu1 }
 0x4c8   :  { %7181 = vmatprep.subr.bf16.mxu0 %v7794_v3  ;;  %v10162_v50 = vpop.f32.mrb[57].mxu1  ;;  %v11082_v3 = vld [vmem:[#allocation97_spill] sm:$0xff] }
 0x4cb   :  { %7183 = vmatpush1.bf16.msra.mxu0 %v7795_v57  ;;  %v10166_v19 = vpop.f32.mrb[58].mxu1 }
 0x4cc   :  { %7185 = vmatprep.subr.bf16.mxu0 %v7796_v52  ;;  %v10170_v24 = vpop.f32.mrb[59].mxu1 }
 0x4cf   :  { %7187 = vmatpush1.bf16.msra.mxu0 %v7797_v35  ;;  %v10174_v25 = vpop.f32.mrb[60].mxu1 }
 0x4d0   :  { %7189 = vmatprep.subr.bf16.mxu0 %v7798_v18  ;;  %v10177_v27 = vpop.f32.mrb[61].mxu1  ;;  %v11088_v18 = vld [vmem:[#allocation103_spill] sm:$0xff] }
 0x4d3   :  { %7191 = vmatpush1.bf16.msra.mxu0 %v7799_v14  ;;  %v10180_v63 = vpop.f32.mrb[62].mxu1  ;;  %v7816_v14 = vcombine.high %v11088_v18, %v11087_v16 }
 0x4d4   :  { %3555 = vmatprep.subr.mxu0 %v3282_v26  ;;  %v10184_v7 = vpop.f32.mrb[63].mxu1  ;;  %v11090_v26 = vld [vmem:[#allocation105_spill] sm:$0xff] }
 0x4d7   :  { %3556 = vmatpush1.msra.mxu0 %v3281_v29  ;;  %v10190_v42 = vpop.f32.mrb[64].mxu1  ;;  %v7819_v29 = vcombine.low %v11090_v26, %v11089_v20 }
 0x4d8   :  { %3568 = vmatmul.mubr.f32.vlgmr.msra.gmra.mrb[96].mxu0 %v10071_v30  ;;  %7193 = vmatprep.subr.bf16.mxu0 %v7800_v15  ;;  %v10193_v10 = vpop.f32.mrb[65].mxu1  ;;  %v7805_v30 = vcombine.low %v11076_v44, %v11075_v43  ;;  %v7820_v15 = vcombine.high %v11092_v62, %v11091_v36  ;;  %v11095_v43 = vld [vmem:[#allocation112_spill] sm:$0xff]  ;;  %v11096_v44 = vld [vmem:[#allocation111_spill] sm:$0xff] }
 0x4d9   :  { %6603 = vmatprep.mubr.msk.f32.mxu0 %vm3365_vm4, %v10075_v33  ;;  %7195 = vmatpush1.bf16.msra.mxu0 %v7801_v53  ;;  %v11077_v33 = vld [vmem:[#allocation94_spill] sm:$0xff]  ;;  %v7821_v53 = vcombine.low %v11092_v62, %v11091_v36  ;;  %v11116_v36 = vld [vmem:[#allocation133_spill] sm:$0xff]  ;;  %v11117_v62 = vld [vmem:[#allocation132_spill] sm:$0xff] }
 0x4da   :  { %7197 = vmatprep.subr.bf16.mxu0 %v7802_v41  ;;  %v7806_v17 = vcombine.high %v11078_v45, %v11077_v33  ;;  %v7822_v41 = vcombine.high %v11094_v40, %v11093_v39 }
 0x4db   :  { %v10201_v23 = vpop.f32.mrb[66].mxu1 }
 0x4dc   :  { %3574 = vmatmul.mubr.f32.gmra.mrb[98].mxu0 %v10073_v28  ;;  %v10204_v0 = vpop.f32.mrb[67].mxu1  ;;  %v7807_v28 = vcombine.low %v11078_v45, %v11077_v33  ;;  %v11097_v33 = vld [vmem:[#allocation113_spill] sm:$0xff] }
 0x4dd   :  { %6604 = vmatprep.mubr.msk.f32.mxu0 %vm3365_vm4, %v10079_v38  ;;  %7199 = vmatpush1.bf16.msra.mxu0 %v7803_v4  ;;  %v11079_v38 = vld [vmem:[#allocation96_spill] sm:$0xff]  ;;  %v7823_v4 = vcombine.low %v11094_v40, %v11093_v39  ;;  %v3685_v45 = vunpack.c.h.bf16 %v11097_v33  ;;  %v11119_v39 = vld [vmem:[#allocation134_spill] sm:$0xff] }
 0x4de   :  { %7201 = vmatprep.subr.bf16.mxu0 %v7804_v32  ;;  %v7808_v6 = vcombine.high %v11080_v5, %v11079_v38  ;;  %v7824_v32 = vcombine.high %v11096_v44, %v11095_v43 }
 0x4df   :  { %v10212_v48 = vpop.f32.mrb[68].mxu1 }
 0x4e0   :  { %3580 = vmatmul.mubr.f32.gmra.mrb[100].mxu0 %v10077_v12  ;;  %v10215_v37 = vpop.f32.mrb[69].mxu1  ;;  %v7809_v12 = vcombine.low %v11080_v5, %v11079_v38  ;;  %v11099_v38 = vld [vmem:[#allocation114_spill] sm:$0xff] }
 0x4e1   :  { %6605 = vmatprep.mubr.msk.f32.mxu0 %vm3365_vm4, %v10083_v54  ;;  %7203 = vmatpush1.bf16.msra.mxu0 %v7805_v30  ;;  %v11081_v54 = vld [vmem:[#allocation98_spill] sm:$0xff]  ;;  %v7825_v30 = vcombine.low %v11096_v44, %v11095_v43  ;;  %v11121_v43 = vld [vmem:[#allocation136_spill] sm:$0xff] }
 0x4e2   :  { %7205 = vmatprep.subr.bf16.mxu0 %v7806_v17  ;;  %v7810_v57 = vcombine.high %v11082_v3, %v11081_v54  ;;  %v3684_v17 = vunpack.c.l.bf16 %v11097_v33  ;;  %v11123_v33 = vld [vmem:[#allocation138_spill] sm:$0xff] }
 0x4e3   :  { %v10223_v60 = vpop.f32.mrb[70].mxu1 }
 0x4e4   :  { %3586 = vmatmul.mubr.f32.gmra.mrb[102].mxu0 %v10081_v55  ;;  %v10226_v61 = vpop.f32.mrb[71].mxu1  ;;  %v7811_v55 = vcombine.low %v11082_v3, %v11081_v54  ;;  %v11101_v54 = vld [vmem:[#allocation116_spill] sm:$0xff] }
 0x4e5   :  { %6606 = vmatprep.mubr.msk.f32.mxu0 %vm3365_vm4, %v10087_v13  ;;  %7207 = vmatpush1.bf16.msra.mxu0 %v7807_v28  ;;  %v11084_v13 = vld [vmem:[#allocation99_spill] sm:$0xff] }
 0x4e6   :  { %7209 = vmatprep.subr.bf16.mxu0 %v7808_v6  ;;  %v7812_v51 = vcombine.high %v11084_v13, %v11083_v1  ;;  %v7813_v52 = vcombine.low %v11084_v13, %v11083_v1  ;;  %v11098_v28 = vld [vmem:[#allocation115_spill] sm:$0xff]  ;;  %v11103_v1 = vld [vmem:[#allocation118_spill] sm:$0xff] }
 0x4e7   :  { %v7826_v5 = vcombine.high %v11099_v38, %v11098_v28  ;;  %v7827_v6 = vcombine.low %v11099_v38, %v11098_v28  ;;  %v11124_v28 = vld [vmem:[#allocation140_spill] sm:$0xff] }
 0x4e8   :  { %3592 = vmatmul.mubr.f32.gmra.mrb[104].mxu0 %v10085_v59  ;;  %v11085_v59 = vld [vmem:[#allocation102_spill] sm:$0xff]  ;;  %v3898_v38 = vunpack.c.h.bf16 %v11124_v28 }
 0x4e9   :  { %6607 = vmatprep.mubr.msk.f32.mxu0 %vm3365_vm4, %v10091_v9  ;;  %7211 = vmatpush1.bf16.msra.mxu0 %v7809_v12  ;;  %v11086_v9 = vld [vmem:[#allocation101_spill] sm:$0xff] }
 0x4ea   :  { %7213 = vmatprep.subr.bf16.mxu0 %v7810_v57  ;;  %v7814_v35 = vcombine.high %v11086_v9, %v11085_v59  ;;  %v7815_v22 = vcombine.low %v11086_v9, %v11085_v59  ;;  %v11100_v12 = vld [vmem:[#allocation117_spill] sm:$0xff]  ;;  %v11107_v9 = vld [vmem:[#allocation122_spill] sm:$0xff] }
 0x4eb   :  { %v7828_v3 = vcombine.high %v11101_v54, %v11100_v12  ;;  %v7829_v57 = vcombine.low %v11101_v54, %v11100_v12 }
 0x4ec   :  { %3598 = vmatmul.mubr.f32.gmra.mrb[106].mxu0 %v10089_v8  ;;  %v7817_v8 = vcombine.low %v11088_v18, %v11087_v16  ;;  %v11111_v18 = vld [vmem:[#allocation126_spill] sm:$0xff] }
 0x4ed   :  { %7215 = vmatpush1.bf16.msra.mxu0 %v7811_v55  ;;  %6608 = vmatprep.mubr.msk.f32.mxu0 %vm3365_vm4, %v10130_v2  ;;  %v7818_v2 = vcombine.high %v11090_v26, %v11089_v20  ;;  %v11102_v55 = vld [vmem:[#allocation119_spill] sm:$0xff] }
 0x4ee   :  { %7217 = vmatprep.subr.bf16.mxu0 %v7812_v51  ;;  %v7830_v13 = vcombine.high %v11103_v1, %v11102_v55  ;;  %v7831_v51 = vcombine.low %v11103_v1, %v11102_v55  ;;  %v11114_v26 = vld [vmem:[#allocation131_spill] sm:$0xff] }
 0x4f1   :  { %7219 = vmatpush1.bf16.msra.mxu0 %v7813_v52  ;;  %v11105_v52 = vld [vmem:[#allocation120_spill] sm:$0xff] }
 0x4f2   :  { %7221 = vmatprep.subr.bf16.mxu0 %v7814_v35 }
 0x4f5   :  { %7223 = vmatpush1.bf16.msra.mxu0 %v7815_v22  ;;  %v11109_v22 = vld [vmem:[#allocation124_spill] sm:$0xff] }
 0x4f6   :  { %7225 = vmatprep.subr.bf16.mxu0 %v7816_v14 }
 0x4f9   :  { %7227 = vmatpush1.bf16.msra.mxu0 %v7817_v8  ;;  %v11113_v8 = vld [vmem:[#allocation128_spill] sm:$0xff] }
 0x4fa   :  { %7229 = vmatprep.subr.bf16.mxu0 %v7818_v2  ;;  %v11115_v2 = vld [vmem:[#allocation130_spill] sm:$0xff] }
 0x4fd   :  { %7231 = vmatpush1.bf16.msra.mxu0 %v7819_v29  ;;  %v7842_v29 = vcombine.high %v11115_v2, %v11114_v26 }
 0x4fe   :  { %7233 = vmatprep.subr.bf16.mxu0 %v7820_v15  ;;  %v7845_v15 = vcombine.low %v11117_v62, %v11116_v36 }
 0x501   :  { %7235 = vmatpush1.bf16.msra.mxu0 %v7821_v53  ;;  %v11118_v53 = vld [vmem:[#allocation135_spill] sm:$0xff] }
 0x502   :  { %7237 = vmatprep.subr.bf16.mxu0 %v7822_v41  ;;  %v7846_v40 = vcombine.high %v11119_v39, %v11118_v53  ;;  %v7847_v41 = vcombine.low %v11119_v39, %v11118_v53 }
 0x505   :  { %7239 = vmatpush1.bf16.msra.mxu0 %v7823_v4  ;;  %v11120_v4 = vld [vmem:[#allocation137_spill] sm:$0xff] }
 0x506   :  { %7241 = vmatprep.subr.bf16.mxu0 %v7824_v32  ;;  %v7848_v44 = vcombine.high %v11121_v43, %v11120_v4  ;;  %v7849_v32 = vcombine.low %v11121_v43, %v11120_v4 }
 0x509   :  { %7243 = vmatpush1.bf16.msra.mxu0 %v7825_v30  ;;  %v11122_v30 = vld [vmem:[#allocation139_spill] sm:$0xff] }
 0x50a   :  { %3756 = vmatprep.subr.mxu0 %v3685_v45  ;;  %v7850_v45 = vcombine.high %v11123_v33, %v11122_v30 }
 0x50d   :  { %3757 = vmatpush1.msra.mxu0 %v3684_v17  ;;  %v7851_v17 = vcombine.low %v11123_v33, %v11122_v30 }
 0x50e   :  { %3769 = vmatmul.mubr.f32.vlgmr.msra.gmra.mrb[96].mxu0 %v10126_v58  ;;  %7245 = vmatprep.subr.bf16.mxu0 %v7826_v5  ;;  %v11104_v58 = vld [vmem:[#allocation121_spill] sm:$0xff]  ;;  %v3897_v5 = vunpack.c.l.bf16 %v11124_v28 }
 0x50f   :  { %7247 = vmatpush1.bf16.msra.mxu0 %v7827_v6  ;;  %6609 = vmatprep.mubr.msk.f32.mxu0 %vm3365_vm4, %v10138_v46  ;;  %v7832_v59 = vcombine.high %v11105_v52, %v11104_v58  ;;  %v7833_v46 = vcombine.low %v11105_v52, %v11104_v58 }
 0x510   :  { %7249 = vmatprep.subr.bf16.mxu0 %v7828_v3 }
 0x512   :  { %3775 = vmatmul.mubr.f32.gmra.mrb[98].mxu0 %v10134_v21  ;;  %v11106_v21 = vld [vmem:[#allocation123_spill] sm:$0xff] }
 0x513   :  { %7251 = vmatpush1.bf16.msra.mxu0 %v7829_v57  ;;  %6610 = vmatprep.mubr.msk.f32.mxu0 %vm3365_vm4, %v10146_v56  ;;  %v7834_v35 = vcombine.high %v11107_v9, %v11106_v21  ;;  %v7835_v56 = vcombine.low %v11107_v9, %v11106_v21 }
 0x514   :  { %7253 = vmatprep.subr.bf16.mxu0 %v7830_v13 }
 0x516   :  { %3781 = vmatmul.mubr.f32.gmra.mrb[100].mxu0 %v10142_v47  ;;  %v11108_v47 = vld [vmem:[#allocation125_spill] sm:$0xff] }
 0x517   :  { %7255 = vmatpush1.bf16.msra.mxu0 %v7831_v51  ;;  %6611 = vmatprep.mubr.msk.f32.mxu0 %vm3365_vm4, %v10154_v31  ;;  %v7836_v16 = vcombine.high %v11109_v22, %v11108_v47  ;;  %v7837_v31 = vcombine.low %v11109_v22, %v11108_v47 }
 0x518   :  { %7257 = vmatprep.subr.bf16.mxu0 %v7832_v59 }
 0x51a   :  { %3787 = vmatmul.mubr.f32.gmra.mrb[102].mxu0 %v10150_v11  ;;  %v11110_v11 = vld [vmem:[#allocation127_spill] sm:$0xff] }
 0x51b   :  { %7259 = vmatpush1.bf16.msra.mxu0 %v7833_v46  ;;  %6612 = vmatprep.mubr.msk.f32.mxu0 %vm3365_vm4, %v10162_v50  ;;  %v7838_v14 = vcombine.high %v11111_v18, %v11110_v11  ;;  %v7839_v50 = vcombine.low %v11111_v18, %v11110_v11 }
 0x51c   :  { %7261 = vmatprep.subr.bf16.mxu0 %v7834_v35 }
 0x51e   :  { %3793 = vmatmul.mubr.f32.gmra.mrb[104].mxu0 %v10158_v49  ;;  %v11112_v49 = vld [vmem:[#allocation129_spill] sm:$0xff] }
 0x51f   :  { %7263 = vmatpush1.bf16.msra.mxu0 %v7835_v56  ;;  %6613 = vmatprep.mubr.msk.f32.mxu0 %vm3365_vm4, %v10170_v24  ;;  %v7840_v20 = vcombine.high %v11113_v8, %v11112_v49  ;;  %v7841_v24 = vcombine.low %v11113_v8, %v11112_v49 }
 0x520   :  { %7265 = vmatprep.subr.bf16.mxu0 %v7836_v16 }
 0x522   :  { %3799 = vmatmul.mubr.f32.gmra.mrb[106].mxu0 %v10166_v19  ;;  %v7843_v19 = vcombine.low %v11115_v2, %v11114_v26 }
 0x523   :  { %7267 = vmatpush1.bf16.msra.mxu0 %v7837_v31  ;;  %6614 = vmatprep.mubr.msk.f32.mxu0 %vm3365_vm4, %v10177_v27  ;;  %v7844_v27 = vcombine.high %v11117_v62, %v11116_v36 }
 0x524   :  { %7269 = vmatprep.subr.bf16.mxu0 %v7838_v14 }
 0x527   :  { %7271 = vmatpush1.bf16.msra.mxu0 %v7839_v50 }
 0x528   :  { %7273 = vmatprep.subr.bf16.mxu0 %v7840_v20 }
 0x52b   :  { %7275 = vmatpush1.bf16.msra.mxu0 %v7841_v24 }
 0x52c   :  { %7277 = vmatprep.subr.bf16.mxu0 %v7842_v29 }
 0x52f   :  { %7279 = vmatpush1.bf16.msra.mxu0 %v7843_v19 }
 0x530   :  { %7281 = vmatprep.subr.bf16.mxu0 %v7844_v27 }
 0x533   :  { %7283 = vmatpush1.bf16.msra.mxu0 %v7845_v15 }
 0x534   :  { %7285 = vmatprep.subr.bf16.mxu0 %v7846_v40 }
 0x537   :  { %7287 = vmatpush1.bf16.msra.mxu0 %v7847_v41 }
 0x538   :  { %7289 = vmatprep.subr.bf16.mxu0 %v7848_v44 }
 0x53b   :  { %7291 = vmatpush1.bf16.msra.mxu0 %v7849_v32 }
 0x53c   :  { %7293 = vmatprep.subr.bf16.mxu0 %v7850_v45 }
 0x53f   :  { %7295 = vmatpush1.bf16.msra.mxu0 %v7851_v17 }
 0x540   :  { %3969 = vmatprep.subr.mxu0 %v3898_v38 }
 0x543   :  { %3970 = vmatpush1.msra.mxu0 %v3897_v5 }
 0x544   :  { %3982 = vmatmul.mubr.f32.vlgmr.msra.gmra.mrb[96].mxu0 %v10174_v25  ;;  %v2883_v25 = vld [vmem:[#allocation12 + $0x1] ss:$8 sm:$0x3] }
 0x545   :  { %6615 = vmatprep.mubr.msk.f32.mxu0 %vm3365_vm4, %v10184_v7 }
 0x548   :  { %3988 = vmatmul.mubr.f32.gmra.mrb[98].mxu0 %v10180_v63  ;;  %v11125_v63 = vld [vmem:[#allocation208_spill] sm:$0xff] }
 0x549   :  { %6616 = vmatprep.mubr.msk.f32.mxu0 %vm3365_vm4, %v10193_v10  ;;  %v4034_v7 = vrot.slane %v2883_v25, %v11125_v63  ;;  %v11126_v10 = vld [vmem:[#allocation209_spill] sm:$0xff] }
 0x54c   :  { %3994 = vmatmul.mubr.f32.gmra.mrb[100].mxu0 %v10190_v42  ;;  %v4038_v42 = vrot.slane %v2883_v25, %v11126_v10 }
 0x54d   :  { %6617 = vmatprep.mubr.msk.f32.mxu0 %vm3365_vm4, %v10204_v0 }
 0x550   :  { %4000 = vmatmul.mubr.f32.gmra.mrb[102].mxu0 %v10201_v23 }
 0x551   :  { %6618 = vmatprep.mubr.msk.f32.mxu0 %vm3365_vm4, %v10215_v37 }
 0x554   :  { %4006 = vmatmul.mubr.f32.gmra.mrb[104].mxu0 %v10212_v48 }
 0x555   :  { %6619 = vmatprep.mubr.msk.f32.mxu0 %vm3365_vm4, %v10226_v61 }
 0x558   :  { %4012 = vmatmul.mubr.f32.gmra.mrb[106].mxu0 %v10223_v60 }
 0x617   :  { %v3983_v6 = vpop.f32.mrb[96].mxu0 }
 0x618   :  { %v4041_v12 = vadd.f32 %v4034_v7, %v3983_v6  ;;  %v3985_v0 = vpop.f32.mrb[97].mxu0 }
 0x619   :  { %v4042_v54 = vadd.f32 %v4038_v42, %v3985_v0 }
 0x61a   :  { %v4053_v23 = vmul.f32 0.01, %v4041_v12 }
 0x61b   :  { %v4054_v3 = vmul.f32 0.01, %v4042_v54  ;;  %v3989_v57 = vpop.f32.mrb[98].mxu0 }
 0x61c   :  { %v4065_v37 = vmax.f32 %v4041_v12, %v4053_v23  ;;  %v4043_v55 = vadd.f32 %v4034_v7, %v3989_v57  ;;  %v3991_v48 = vpop.f32.mrb[99].mxu0 }
 0x61d   :  { %v4066_v1 = vmax.f32 %v4042_v54, %v4054_v3  ;;  %v4044_v13 = vadd.f32 %v4038_v42, %v3991_v48 }
 0x61e   :  { %v4055_v61 = vmul.f32 0.01, %v4043_v55 }
 0x61f   :  { %v4056_v51 = vmul.f32 0.01, %v4044_v13  ;;  %v3995_v60 = vpop.f32.mrb[100].mxu0 }
 0x620   :  { %v4067_v58 = vmax.f32 %v4043_v55, %v4055_v61  ;;  %v4045_v52 = vadd.f32 %v4034_v7, %v3995_v60  ;;  %v3997_v59 = vpop.f32.mrb[101].mxu0 }
 0x621   :  { %v4068_v46 = vmax.f32 %v4044_v13, %v4056_v51  ;;  %v4046_v21 = vadd.f32 %v4038_v42, %v3997_v59 }
 0x622   :  { %v4057_v9 = vmul.f32 0.01, %v4045_v52 }
 0x623   :  { %v4058_v35 = vmul.f32 0.01, %v4046_v21  ;;  %v4001_v56 = vpop.f32.mrb[102].mxu0 }
 0x624   :  { %v4069_v47 = vmax.f32 %v4045_v52, %v4057_v9  ;;  %v4047_v22 = vadd.f32 %v4034_v7, %v4001_v56  ;;  %v4003_v16 = vpop.f32.mrb[103].mxu0 }
 0x625   :  { %v4070_v31 = vmax.f32 %v4046_v21, %v4058_v35  ;;  %v4048_v11 = vadd.f32 %v4038_v42, %v4003_v16 }
 0x626   :  { %v4059_v18 = vmul.f32 0.01, %v4047_v22 }
 0x627   :  { %v4060_v14 = vmul.f32 0.01, %v4048_v11  ;;  %v4007_v50 = vpop.f32.mrb[104].mxu0 }
 0x628   :  { %v4071_v49 = vmax.f32 %v4047_v22, %v4059_v18  ;;  %v4049_v8 = vadd.f32 %v4034_v7, %v4007_v50  ;;  %v4009_v20 = vpop.f32.mrb[105].mxu0 }
 0x629   :  { %v4072_v24 = vmax.f32 %v4048_v11, %v4060_v14  ;;  %v4050_v26 = vadd.f32 %v4038_v42, %v4009_v20 }
 0x62a   :  { %v4061_v2 = vmul.f32 0.01, %v4049_v8 }
 0x62b   :  { %v4062_v29 = vmul.f32 0.01, %v4050_v26  ;;  %v4013_v19 = vpop.f32.mrb[106].mxu0 }
 0x62c   :  { %v4073_v36 = vmax.f32 %v4049_v8, %v4061_v2  ;;  %v4051_v62 = vadd.f32 %v4034_v7, %v4013_v19  ;;  %v4015_v27 = vpop.f32.mrb[107].mxu0 }
 0x62d   :  { %v4074_v15 = vmax.f32 %v4050_v26, %v4062_v29  ;;  %v4052_v53 = vadd.f32 %v4038_v42, %v4015_v27 }
 0x62e   :  { %v4063_v39 = vmul.f32 0.01, %v4051_v62 }
 0x62f   :  { %v4064_v40 = vmul.f32 0.01, %v4052_v53 }
 0x630   :  { %v4075_v41 = vmax.f32 %v4051_v62, %v4063_v39 }
 0x631   :  { %v4076_v4 = vmax.f32 %v4052_v53, %v4064_v40 }
 0x632   :  { %8017 = dma.done.wait [#allocation8 + $0x2], 768 }
 0x633   :  { %8018 = vsyncadd [#allocation8 + $0x2], 4294966528  ;;  %v7296_v43 = vpack.c.bf16 %v4068_v46, %v4066_v1  ;;  %v7298_v44 = vpack.c.bf16 %v4067_v58, %v4065_v37  ;;  %v7300_v32 = vpack.c.bf16 %v4072_v24, %v4070_v31  ;;  %4205 = vmatprep.mubr.f32.mxu1 %v10999_v34 }
 0x634   :  { %8019 = dma.done.wait [#allocation8 + $0x3], 7680 }
 0x635   :  { %8020 = vsyncadd [#allocation8 + $0x3], 4294959616  ;;  %v11127_v30 = vmov 0.0|0.0   ;;  %7297 = vmatprep.subr.bf16.mxu1 %v7296_v43  ;;  %v11128_v33 = vld [vmem:[#allocation177_spill] sm:$0xff]  ;;  %v7302_v45 = vpack.c.bf16 %v4071_v49, %v4069_v47  ;;  %v7304_v17 = vpack.c.bf16 %v4076_v4, %v4074_v15  ;;  %v11129_v28 = vld [vmem:[#allocation178_spill] sm:$0xff]  ;;  %v7306_v38 = vpack.c.bf16 %v4075_v41, %v4073_v36 }
 0x636   :  { %7398 = vmatprep.subr.bf16.mxu0 %v11127_v30  ;;  %7299 = vmatpush1.bf16.msra.mxu1 %v7298_v44  ;;  %v11130_v5 = vld [vmem:[#allocation141_spill] sm:$0xff]  ;;  %v11131_v7 = vld [vmem:[#allocation179_spill] sm:$0xff]  ;;  %vm4104_vm5 = vcmask 392192   ;;  %v11132_v6 = vld [vmem:[#allocation180_spill] sm:$0xff]  ;;  %vm4369_vm6 = vcmask 916480  }
 0x637   :  { %7400 = vmatpush1.bf16.msra.mxu0 %v11128_v33  ;;  %7301 = vmatprep.subr.bf16.mxu1 %v7300_v32  ;;  %v4092_v25 = vunpack.c.l.bf16 %v11130_v5  ;;  %v4093_v42 = vunpack.c.h.bf16 %v11130_v5  ;;  %v11133_v12 = vld [vmem:[#allocation162_spill] sm:$0xff]  ;;  %v11135_v23 = vld [vmem:[#allocation181_spill] sm:$0xff]  ;;  %v11136_v3 = vld [vmem:[#allocation163_spill] sm:$0xff] }
 0x638   :  { %7401 = vmatprep.subr.bf16.mxu0 %v11127_v30  ;;  %v11134_v0 = vld [vmem:[#allocation142_spill] sm:$0xff]  ;;  %v11138_v55 = vld [vmem:[#allocation164_spill] sm:$0xff]  ;;  %v11139_v48 = vld [vmem:[#allocation143_spill] sm:$0xff] }
 0x639   :  { %v4094_v54 = vunpack.c.l.bf16 %v11134_v0  ;;  %v4095_v57 = vunpack.c.h.bf16 %v11134_v0  ;;  %v11137_v37 = vld [vmem:[#allocation182_spill] sm:$0xff]  ;;  %v4096_v1 = vunpack.c.l.bf16 %v11139_v48  ;;  %v11140_v13 = vld [vmem:[#allocation183_spill] sm:$0xff]  ;;  %v11141_v61 = vld [vmem:[#allocation165_spill] sm:$0xff]  ;;  %v4097_v51 = vunpack.c.h.bf16 %v11139_v48 }
 0x63a   :  { %7303 = vmatpush1.bf16.msra.mxu1 %v7302_v45  ;;  %v11142_v60 = vld [vmem:[#allocation184_spill] sm:$0xff]  ;;  %v11143_v58 = vld [vmem:[#allocation166_spill] sm:$0xff]  ;;  %v11145_v46 = vld [vmem:[#allocation185_spill] sm:$0xff] }
 0x63b   :  { %7403 = vmatpush1.bf16.msra.mxu0 %v11129_v28  ;;  %7305 = vmatprep.subr.bf16.mxu1 %v7304_v17  ;;  %v11144_v52 = vld [vmem:[#allocation144_spill] sm:$0xff]  ;;  %v11146_v21 = vld [vmem:[#allocation167_spill] sm:$0xff]  ;;  %v11147_v35 = vld [vmem:[#allocation186_spill] sm:$0xff] }
 0x63c   :  { %7404 = vmatprep.subr.bf16.mxu0 %v11127_v30  ;;  %v4098_v59 = vunpack.c.l.bf16 %v11144_v52  ;;  %v4099_v9 = vunpack.c.h.bf16 %v11144_v52  ;;  %v11148_v56 = vld [vmem:[#allocation168_spill] sm:$0xff]  ;;  %v11149_v47 = vld [vmem:[#allocation145_spill] sm:$0xff]  ;;  %v11150_v16 = vld [vmem:[#allocation187_spill] sm:$0xff] }
 0x63d   :  { %v4100_v22 = vunpack.c.l.bf16 %v11149_v47  ;;  %v11151_v31 = vld [vmem:[#allocation169_spill] sm:$0xff]  ;;  %v4101_v11 = vunpack.c.h.bf16 %v11149_v47  ;;  %v11152_v18 = vld [vmem:[#allocation188_spill] sm:$0xff]  ;;  %v11153_v14 = vld [vmem:[#allocation170_spill] sm:$0xff] }
 0x63e   :  { %7307 = vmatpush1.bf16.msra.mxu1 %v7306_v38  ;;  %v11154_v50 = vld [vmem:[#allocation146_spill] sm:$0xff]  ;;  %v11155_v8 = vld [vmem:[#allocation189_spill] sm:$0xff]  ;;  %v11156_v20 = vld [vmem:[#allocation171_spill] sm:$0xff] }
 0x63f   :  { %7406 = vmatpush1.bf16.msra.mxu0 %v11131_v7  ;;  %7308 = vmatprep.subr.bf16.mxu1 %v11127_v30  ;;  %v4102_v49 = vunpack.c.l.bf16 %v11154_v50  ;;  %v4103_v24 = vunpack.c.h.bf16 %v11154_v50  ;;  %v11157_v26 = vld [vmem:[#allocation190_spill] sm:$0xff]  ;;  %v11158_v2 = vld [vmem:[#allocation172_spill] sm:$0xff]  ;;  %v11159_v29 = vld [vmem:[#allocation191_spill] sm:$0xff] }
 0x640   :  { %7407 = vmatprep.subr.bf16.mxu0 %v11127_v30  ;;  %v11160_v19 = vld [vmem:[#allocation173_spill] sm:$0xff]  ;;  %v11161_v36 = vld [vmem:[#allocation174_spill] sm:$0xff]  ;;  %v11162_v62 = vld [vmem:[#allocation175_spill] sm:$0xff] }
 0x641   :  { %6620 = vmatmul.mubr.msk.f32.vlgmr.msra.gmra.mrb[72].mxu1 %vm4104_vm5, %v4092_v25  ;;  %v11163_v27 = vld [vmem:[#allocation176_spill] sm:$0xff]  ;;  %v11164_v32 = vld [vmem:[#allocation147_spill] sm:$0xff]  ;;  %v11166_v5 = vld [vmem:[#allocation149_spill] sm:$0xff] }
 0x642   :  { %4211 = vmatprep.mubr.f32.mxu1 %v10999_v34  ;;  %7310 = vmatpush1.bf16.msra.mxu1 %v11133_v12  ;;  %v11165_v17 = vld [vmem:[#allocation148_spill] sm:$0xff]  ;;  %v11168_v0 = vld [vmem:[#allocation151_spill] sm:$0xff]  ;;  %v11174_v52 = vld [vmem:[#allocation157_spill] sm:$0xff] }
 0x643   :  { %7409 = vmatpush1.bf16.msra.mxu0 %v11132_v6  ;;  %7311 = vmatprep.subr.bf16.mxu1 %v11127_v30  ;;  %v11181_v47 = vld [vmem:[#allocation194_spill] sm:$0xff]  ;;  %v11188_v50 = vld [vmem:[#allocation201_spill] sm:$0xff] }
 0x644   :  { %7410 = vmatprep.subr.bf16.mxu0 %v11127_v30 }
 0x645   :  { %6621 = vmatmul.mubr.msk.f32.gmra.mrb[74].mxu1 %vm4104_vm5, %v4093_v42  ;;  %v11167_v42 = vld [vmem:[#allocation150_spill] sm:$0xff] }
 0x646   :  { %4217 = vmatprep.mubr.f32.mxu1 %v10999_v34  ;;  %7313 = vmatpush1.bf16.msra.mxu1 %v11136_v3  ;;  %v11169_v3 = vld [vmem:[#allocation152_spill] sm:$0xff] }
 0x647   :  { %7412 = vmatpush1.bf16.msra.mxu0 %v11135_v23  ;;  %7314 = vmatprep.subr.bf16.mxu1 %v11127_v30 }
 0x648   :  { %7413 = vmatprep.subr.bf16.mxu0 %v11127_v30 }
 0x649   :  { %6622 = vmatmul.mubr.msk.f32.gmra.mrb[76].mxu1 %vm4104_vm5, %v4094_v54 }
 0x64a   :  { %4223 = vmatprep.mubr.f32.mxu1 %v10999_v34  ;;  %7316 = vmatpush1.bf16.msra.mxu1 %v11138_v55  ;;  %v11170_v55 = vld [vmem:[#allocation153_spill] sm:$0xff] }
 0x64b   :  { %7415 = vmatpush1.bf16.msra.mxu0 %v11137_v37  ;;  %7317 = vmatprep.subr.bf16.mxu1 %v11127_v30 }
 0x64c   :  { %7416 = vmatprep.subr.bf16.mxu0 %v11127_v30 }
 0x64d   :  { %6623 = vmatmul.mubr.msk.f32.gmra.mrb[78].mxu1 %vm4104_vm5, %v4095_v57 }
 0x64e   :  { %4229 = vmatprep.mubr.f32.mxu1 %v10999_v34  ;;  %7319 = vmatpush1.bf16.msra.mxu1 %v11141_v61 }
 0x64f   :  { %7418 = vmatpush1.bf16.msra.mxu0 %v11140_v13  ;;  %7320 = vmatprep.subr.bf16.mxu1 %v11127_v30  ;;  %v11171_v13 = vld [vmem:[#allocation154_spill] sm:$0xff] }
 0x650   :  { %7419 = vmatprep.subr.bf16.mxu0 %v11127_v30 }
 0x651   :  { %6624 = vmatmul.mubr.msk.f32.gmra.mrb[80].mxu1 %vm4104_vm5, %v4096_v1 }
 0x652   :  { %4235 = vmatprep.mubr.f32.mxu1 %v10999_v34  ;;  %7322 = vmatpush1.bf16.msra.mxu1 %v11143_v58  ;;  %v11173_v58 = vld [vmem:[#allocation156_spill] sm:$0xff] }
 0x653   :  { %7421 = vmatpush1.bf16.msra.mxu0 %v11142_v60  ;;  %7323 = vmatprep.subr.bf16.mxu1 %v11127_v30  ;;  %v11172_v60 = vld [vmem:[#allocation155_spill] sm:$0xff] }
 0x654   :  { %7422 = vmatprep.subr.bf16.mxu0 %v11127_v30 }
 0x655   :  { %6625 = vmatmul.mubr.msk.f32.gmra.mrb[82].mxu1 %vm4104_vm5, %v4097_v51 }
 0x656   :  { %4241 = vmatprep.mubr.f32.mxu1 %v10999_v34  ;;  %7325 = vmatpush1.bf16.msra.mxu1 %v11146_v21  ;;  %v11177_v21 = vld [vmem:[#allocation160_spill] sm:$0xff] }
 0x657   :  { %7424 = vmatpush1.bf16.msra.mxu0 %v11145_v46  ;;  %7326 = vmatprep.subr.bf16.mxu1 %v11127_v30  ;;  %v11176_v46 = vld [vmem:[#allocation159_spill] sm:$0xff] }
 0x658   :  { %7425 = vmatprep.subr.bf16.mxu0 %v11127_v30 }
 0x659   :  { %6626 = vmatmul.mubr.msk.f32.gmra.mrb[84].mxu1 %vm4104_vm5, %v4098_v59  ;;  %v11175_v59 = vld [vmem:[#allocation158_spill] sm:$0xff] }
 0x65a   :  { %4247 = vmatprep.mubr.f32.mxu1 %v10999_v34  ;;  %7328 = vmatpush1.bf16.msra.mxu1 %v11148_v56  ;;  %v11180_v56 = vld [vmem:[#allocation193_spill] sm:$0xff] }
 0x65b   :  { %7427 = vmatpush1.bf16.msra.mxu0 %v11147_v35  ;;  %7329 = vmatprep.subr.bf16.mxu1 %v11127_v30  ;;  %v11179_v35 = vld [vmem:[#allocation192_spill] sm:$0xff] }
 0x65c   :  { %7428 = vmatprep.subr.bf16.mxu0 %v11127_v30 }
 0x65d   :  { %6627 = vmatmul.mubr.msk.f32.gmra.mrb[86].mxu1 %vm4104_vm5, %v4099_v9  ;;  %v11178_v9 = vld [vmem:[#allocation161_spill] sm:$0xff] }
 0x65e   :  { %4253 = vmatprep.mubr.f32.mxu1 %v10999_v34  ;;  %7331 = vmatpush1.bf16.msra.mxu1 %v11151_v31  ;;  %v11184_v31 = vld [vmem:[#allocation197_spill] sm:$0xff] }
 0x65f   :  { %7430 = vmatpush1.bf16.msra.mxu0 %v11150_v16  ;;  %7332 = vmatprep.subr.bf16.mxu1 %v11127_v30  ;;  %v11183_v16 = vld [vmem:[#allocation196_spill] sm:$0xff] }
 0x660   :  { %7431 = vmatprep.subr.bf16.mxu0 %v11127_v30 }
 0x661   :  { %6628 = vmatmul.mubr.msk.f32.gmra.mrb[88].mxu1 %vm4104_vm5, %v4100_v22  ;;  %v11182_v22 = vld [vmem:[#allocation195_spill] sm:$0xff] }
 0x662   :  { %4259 = vmatprep.mubr.f32.mxu1 %v10999_v34  ;;  %7334 = vmatpush1.bf16.msra.mxu1 %v11153_v14  ;;  %v11187_v14 = vld [vmem:[#allocation200_spill] sm:$0xff] }
 0x663   :  { %7433 = vmatpush1.bf16.msra.mxu0 %v11152_v18  ;;  %7335 = vmatprep.subr.bf16.mxu1 %v11127_v30  ;;  %v11186_v18 = vld [vmem:[#allocation199_spill] sm:$0xff] }
 0x664   :  { %7434 = vmatprep.subr.bf16.mxu0 %v11127_v30 }
 0x665   :  { %6629 = vmatmul.mubr.msk.f32.gmra.mrb[90].mxu1 %vm4104_vm5, %v4101_v11  ;;  %v11185_v11 = vld [vmem:[#allocation198_spill] sm:$0xff] }
 0x666   :  { %4265 = vmatprep.mubr.f32.mxu1 %v10999_v34  ;;  %7337 = vmatpush1.bf16.msra.mxu1 %v11156_v20  ;;  %v11191_v20 = vld [vmem:[#allocation204_spill] sm:$0xff] }
 0x667   :  { %7436 = vmatpush1.bf16.msra.mxu0 %v11155_v8  ;;  %7338 = vmatprep.subr.bf16.mxu1 %v11127_v30  ;;  %v11190_v8 = vld [vmem:[#allocation203_spill] sm:$0xff] }
 0x668   :  { %7437 = vmatprep.subr.bf16.mxu0 %v11127_v30 }
 0x669   :  { %6630 = vmatmul.mubr.msk.f32.gmra.mrb[92].mxu1 %vm4104_vm5, %v4102_v49  ;;  %v11189_v49 = vld [vmem:[#allocation202_spill] sm:$0xff] }
 0x66a   :  { %4271 = vmatprep.mubr.f32.mxu1 %v10999_v34  ;;  %7340 = vmatpush1.bf16.msra.mxu1 %v11158_v2 }
 0x66b   :  { %7439 = vmatpush1.bf16.msra.mxu0 %v11157_v26  ;;  %7341 = vmatprep.subr.bf16.mxu1 %v11127_v30  ;;  %v11193_v26 = vld [vmem:[#allocation206_spill] sm:$0xff] }
 0x66c   :  { %7440 = vmatprep.subr.bf16.mxu0 %v11127_v30 }
 0x66d   :  { %6631 = vmatmul.mubr.msk.f32.gmra.mrb[94].mxu1 %vm4104_vm5, %v4103_v24  ;;  %v11192_v24 = vld [vmem:[#allocation205_spill] sm:$0xff] }
 0x66e   :  { %7343 = vmatpush1.bf16.msra.mxu1 %v11160_v19 }
 0x66f   :  { %7442 = vmatpush1.bf16.msra.mxu0 %v11159_v29  ;;  %7344 = vmatprep.subr.bf16.mxu1 %v11127_v30 }
 0x672   :  { %7346 = vmatpush1.bf16.msra.mxu1 %v11161_v36 }
 0x673   :  { %7347 = vmatprep.subr.bf16.mxu1 %v11127_v30 }
 0x676   :  { %7349 = vmatpush1.bf16.msra.mxu1 %v11162_v62 }
 0x677   :  { %7350 = vmatprep.subr.bf16.mxu1 %v11127_v30 }
 0x67a   :  { %7352 = vmatpush1.bf16.msra.mxu1 %v11163_v27 }
 0x67b   :  { %7353 = vmatprep.subr.bf16.mxu1 %v11127_v30 }
 0x714   :  { %v10459_v15 = vpop.f32.mrb[72].mxu1 }
 0x715   :  { %v4209_v53 = vpop.f32.mrb[73].mxu1 }
 0x718   :  { %v10461_v39 = vpop.f32.mrb[74].mxu1 }
 0x719   :  { %v10463_v40 = vpop.f32.mrb[75].mxu1 }
 0x71c   :  { %v10465_v41 = vpop.f32.mrb[76].mxu1 }
 0x71d   :  { %v10467_v4 = vpop.f32.mrb[77].mxu1 }
 0x720   :  { %v4225_v43 = vpop.f32.mrb[78].mxu1 }
 0x721   :  { %v4227_v44 = vpop.f32.mrb[79].mxu1 }
 0x722   :  { %6632 = vmatprep.mubr.msk.f32.mxu1 %vm4369_vm6, %v4227_v44 }
 0x723   :  { %4444 = vmatmul.mubr.f32.vlgmr.msra.gmra.mrb[96].mxu1 %v4225_v43 }
 0x724   :  { %7355 = vmatpush1.bf16.msra.mxu1 %v11164_v32  ;;  %v4231_v33 = vpop.f32.mrb[80].mxu1 }
 0x725   :  { %v4233_v45 = vpop.f32.mrb[81].mxu1  ;;  %7356 = vmatprep.subr.bf16.mxu1 %v11127_v30 }
 0x726   :  { %6633 = vmatprep.mubr.msk.f32.mxu1 %vm4369_vm6, %v4233_v45 }
 0x727   :  { %4449 = vmatmul.mubr.f32.gmra.mrb[98].mxu1 %v4231_v33 }
 0x728   :  { %7358 = vmatpush1.bf16.msra.mxu1 %v11165_v17  ;;  %v4237_v28 = vpop.f32.mrb[82].mxu1 }
 0x729   :  { %v4239_v38 = vpop.f32.mrb[83].mxu1  ;;  %7359 = vmatprep.subr.bf16.mxu1 %v11127_v30 }
 0x72a   :  { %6634 = vmatprep.mubr.msk.f32.mxu1 %vm4369_vm6, %v4239_v38 }
 0x72b   :  { %4454 = vmatmul.mubr.f32.gmra.mrb[100].mxu1 %v4237_v28 }
 0x72c   :  { %7361 = vmatpush1.bf16.msra.mxu1 %v11166_v5  ;;  %6635 = vmatprep.mubr.msk.f32.mxu1 %vm4369_vm6, %v4209_v53  ;;  %v4243_v25 = vpop.f32.mrb[84].mxu1 }
 0x72d   :  { %7362 = vmatprep.subr.bf16.mxu1 %v11127_v30  ;;  %v4245_v7 = vpop.f32.mrb[85].mxu1 }
 0x72e   :  { %6638 = vmatprep.mubr.msk.f32.mxu0 %vm4369_vm6, %v4245_v7 }
 0x72f   :  { %4668 = vmatmul.mubr.f32.vlgmr.msra.gmra.mrb[108].mxu0 %v4243_v25 }
 0x730   :  { %7364 = vmatpush1.bf16.msra.mxu1 %v11167_v42  ;;  %v4249_v6 = vpop.f32.mrb[86].mxu1 }
 0x731   :  { %7365 = vmatprep.subr.bf16.mxu1 %v11127_v30  ;;  %v4251_v12 = vpop.f32.mrb[87].mxu1 }
 0x732   :  { %6639 = vmatprep.mubr.msk.f32.mxu0 %vm4369_vm6, %v4251_v12 }
 0x733   :  { %4673 = vmatmul.mubr.f32.gmra.mrb[110].mxu0 %v4249_v6  ;;  %v4085_v6 = vld [vmem:[#allocation12 + $0x2] ss:$0 sm:$0xff] }
 0x734   :  { %7367 = vmatpush1.bf16.msra.mxu1 %v11168_v0  ;;  %v4255_v54 = vpop.f32.mrb[88].mxu1 }
 0x735   :  { %7368 = vmatprep.subr.bf16.mxu1 %v11127_v30  ;;  %v4257_v23 = vpop.f32.mrb[89].mxu1 }
 0x736   :  { %6640 = vmatprep.mubr.msk.f32.mxu0 %vm4369_vm6, %v4257_v23 }
 0x737   :  { %4678 = vmatmul.mubr.f32.gmra.mrb[112].mxu0 %v4255_v54 }
 0x738   :  { %7370 = vmatpush1.bf16.msra.mxu1 %v11169_v3  ;;  %v4261_v57 = vpop.f32.mrb[90].mxu1 }
 0x739   :  { %7371 = vmatprep.subr.bf16.mxu1 %v11127_v30  ;;  %v4263_v37 = vpop.f32.mrb[91].mxu1 }
 0x73c   :  { %7373 = vmatpush1.bf16.msra.mxu1 %v11170_v55  ;;  %v4267_v48 = vpop.f32.mrb[92].mxu1 }
 0x73d   :  { %7374 = vmatprep.subr.bf16.mxu1 %v11127_v30  ;;  %v4269_v1 = vpop.f32.mrb[93].mxu1 }
 0x740   :  { %7376 = vmatpush1.bf16.msra.mxu1 %v11171_v13  ;;  %v4273_v61 = vpop.f32.mrb[94].mxu1 }
 0x741   :  { %7377 = vmatprep.subr.bf16.mxu1 %v11127_v30  ;;  %v4275_v51 = vpop.f32.mrb[95].mxu1 }
 0x744   :  { %7379 = vmatpush1.bf16.msra.mxu1 %v11172_v60 }
 0x745   :  { %7380 = vmatprep.subr.bf16.mxu1 %v11127_v30 }
 0x748   :  { %7382 = vmatpush1.bf16.msra.mxu1 %v11173_v58 }
 0x749   :  { %7383 = vmatprep.subr.bf16.mxu1 %v11127_v30 }
 0x74c   :  { %7385 = vmatpush1.bf16.msra.mxu1 %v11174_v52 }
 0x74d   :  { %7386 = vmatprep.subr.bf16.mxu1 %v11127_v30 }
 0x750   :  { %7388 = vmatpush1.bf16.msra.mxu1 %v11175_v59 }
 0x751   :  { %7389 = vmatprep.subr.bf16.mxu1 %v11127_v30 }
 0x754   :  { %7391 = vmatpush1.bf16.msra.mxu1 %v11176_v46 }
 0x755   :  { %7392 = vmatprep.subr.bf16.mxu1 %v11127_v30 }
 0x758   :  { %7394 = vmatpush1.bf16.msra.mxu1 %v11177_v21 }
 0x759   :  { %7395 = vmatprep.subr.bf16.mxu1 %v11127_v30 }
 0x75c   :  { %7397 = vmatpush1.bf16.msra.mxu1 %v11178_v9 }
 0x75d   :  { %7443 = vmatprep.subr.bf16.mxu1 %v11127_v30 }
 0x75f   :  { %4533 = vmatmul.mubr.f32.vlgmr.msra.gmra.mrb[102].mxu1 %v10459_v15 }
 0x760   :  { %6636 = vmatprep.mubr.msk.f32.mxu1 %vm4369_vm6, %v10463_v40  ;;  %7445 = vmatpush1.bf16.msra.mxu1 %v11179_v35 }
 0x761   :  { %7446 = vmatprep.subr.bf16.mxu1 %v11127_v30 }
 0x763   :  { %4538 = vmatmul.mubr.f32.gmra.mrb[104].mxu1 %v10461_v39 }
 0x764   :  { %6637 = vmatprep.mubr.msk.f32.mxu1 %vm4369_vm6, %v10467_v4  ;;  %7448 = vmatpush1.bf16.msra.mxu1 %v11180_v56 }
 0x765   :  { %7449 = vmatprep.subr.bf16.mxu1 %v11127_v30 }
 0x767   :  { %4543 = vmatmul.mubr.f32.gmra.mrb[106].mxu1 %v10465_v41 }
 0x768   :  { %7451 = vmatpush1.bf16.msra.mxu1 %v11181_v47  ;;  %6641 = vmatprep.mubr.msk.f32.mxu1 %vm4369_vm6, %v4263_v37 }
 0x769   :  { %7452 = vmatprep.subr.bf16.mxu1 %v11127_v30 }
 0x76c   :  { %7454 = vmatpush1.bf16.msra.mxu1 %v11182_v22 }
 0x76d   :  { %7455 = vmatprep.subr.bf16.mxu1 %v11127_v30 }
 0x770   :  { %7457 = vmatpush1.bf16.msra.mxu1 %v11183_v16 }
 0x771   :  { %7458 = vmatprep.subr.bf16.mxu1 %v11127_v30 }
 0x774   :  { %7460 = vmatpush1.bf16.msra.mxu1 %v11184_v31 }
 0x775   :  { %7461 = vmatprep.subr.bf16.mxu1 %v11127_v30 }
 0x778   :  { %7463 = vmatpush1.bf16.msra.mxu1 %v11185_v11 }
 0x779   :  { %7464 = vmatprep.subr.bf16.mxu1 %v11127_v30 }
 0x77c   :  { %7466 = vmatpush1.bf16.msra.mxu1 %v11186_v18 }
 0x77d   :  { %7467 = vmatprep.subr.bf16.mxu1 %v11127_v30 }
 0x780   :  { %7469 = vmatpush1.bf16.msra.mxu1 %v11187_v14 }
 0x781   :  { %7470 = vmatprep.subr.bf16.mxu1 %v11127_v30 }
 0x784   :  { %7472 = vmatpush1.bf16.msra.mxu1 %v11188_v50 }
 0x785   :  { %7473 = vmatprep.subr.bf16.mxu1 %v11127_v30 }
 0x788   :  { %7475 = vmatpush1.bf16.msra.mxu1 %v11189_v49 }
 0x789   :  { %7476 = vmatprep.subr.bf16.mxu1 %v11127_v30 }
 0x78c   :  { %7478 = vmatpush1.bf16.msra.mxu1 %v11190_v8 }
 0x78d   :  { %7479 = vmatprep.subr.bf16.mxu1 %v11127_v30 }
 0x790   :  { %7481 = vmatpush1.bf16.msra.mxu1 %v11191_v20 }
 0x791   :  { %7482 = vmatprep.subr.bf16.mxu1 %v11127_v30 }
 0x794   :  { %7484 = vmatpush1.bf16.msra.mxu1 %v11192_v24 }
 0x795   :  { %7485 = vmatprep.subr.bf16.mxu1 %v11127_v30 }
 0x798   :  { %7487 = vmatpush1.bf16.msra.mxu1 %v11193_v26 }
 0x79b   :  { %4806 = vmatmul.mubr.f32.vlgmr.msra.gmra.mrb[108].mxu1 %v4261_v57 }
 0x79c   :  { %6642 = vmatprep.mubr.msk.f32.mxu1 %vm4369_vm6, %v4269_v1 }
 0x79f   :  { %4811 = vmatmul.mubr.f32.gmra.mrb[110].mxu1 %v4267_v48 }
 0x7a0   :  { %6643 = vmatprep.mubr.msk.f32.mxu1 %vm4369_vm6, %v4275_v51 }
 0x7a3   :  { %4816 = vmatmul.mubr.f32.gmra.mrb[112].mxu1 %v4273_v61 }
 0x7f6   :  { %v4445_v2 = vpop.f32.mrb[96].mxu1 }
 0x7f7   :  { %v4447_v29 = vpop.f32.mrb[97].mxu1 }
 0x7fa   :  { %v4450_v19 = vpop.f32.mrb[98].mxu1 }
 0x7fb   :  { %v4452_v36 = vpop.f32.mrb[99].mxu1 }
 0x7fe   :  { %v4455_v62 = vpop.f32.mrb[100].mxu1 }
 0x7ff   :  { %v4457_v27 = vpop.f32.mrb[101].mxu1 }
 0x802   :  { %v4669_v15 = vpop.f32.mrb[108].mxu0 }
 0x803   :  { %v4671_v53 = vpop.f32.mrb[109].mxu0 }
 0x806   :  { %v4674_v39 = vpop.f32.mrb[110].mxu0 }
 0x807   :  { %v4676_v40 = vpop.f32.mrb[111].mxu0 }
 0x80a   :  { %v4679_v41 = vpop.f32.mrb[112].mxu0 }
 0x80b   :  { %v4681_v4 = vpop.f32.mrb[113].mxu0 }
 0x832   :  { %v4534_v43 = vpop.f32.mrb[102].mxu1 }
 0x833   :  { %v4535_v44 = vadd.f32 %v4534_v43, %v4445_v2  ;;  %v4536_v32 = vpop.f32.mrb[103].mxu1 }
 0x835   :  { %v4683_v33 = vadd.f32 %v4669_v15, %v4535_v44 }
 0x836   :  { %v4539_v45 = vpop.f32.mrb[104].mxu1 }
 0x837   :  { %v4540_v17 = vadd.f32 %v4539_v45, %v4450_v19  ;;  %v4541_v28 = vpop.f32.mrb[105].mxu1 }
 0x839   :  { %v4684_v38 = vadd.f32 %v4674_v39, %v4540_v17 }
 0x83a   :  { %v4544_v5 = vpop.f32.mrb[106].mxu1 }
 0x83b   :  { %v4545_v25 = vadd.f32 %v4544_v5, %v4455_v62  ;;  %v4546_v7 = vpop.f32.mrb[107].mxu1 }
 0x83d   :  { %v4685_v42 = vadd.f32 %v4679_v41, %v4545_v25 }
 0x86e   :  { %v4807_v12 = vpop.f32.mrb[108].mxu1 }
 0x86f   :  { %v4821_v0 = vadd.f32 %v4807_v12, %v4683_v33  ;;  %v4809_v54 = vpop.f32.mrb[109].mxu1 }
 0x871   :  { %v4824_v23 = vadd.f32 %v4821_v0, %v4085_v6 }
 0x872   :  { %v4812_v3 = vpop.f32.mrb[110].mxu1 }
 0x873   :  { %v4827_v57 = vmul.f32 0.01, %v4824_v23  ;;  %v4822_v37 = vadd.f32 %v4812_v3, %v4684_v38  ;;  %v4814_v55 = vpop.f32.mrb[111].mxu1 }
 0x875   :  { %v4830_v48 = vmax.f32 %v4824_v23, %v4827_v57  ;;  %v4825_v1 = vadd.f32 %v4822_v37, %v4085_v6 }
 0x876   :  { %v4817_v13 = vpop.f32.mrb[112].mxu1 }
 0x877   :  { %v4828_v61 = vmul.f32 0.01, %v4825_v1  ;;  %v4823_v51 = vadd.f32 %v4817_v13, %v4685_v42  ;;  %v4819_v60 = vpop.f32.mrb[113].mxu1 }
 0x879   :  { %v4831_v58 = vmax.f32 %v4825_v1, %v4828_v61  ;;  %v4826_v52 = vadd.f32 %v4823_v51, %v4085_v6 }
 0x87b   :  { %v4829_v59 = vmul.f32 0.01, %v4826_v52 }
 0x87d   :  { %v4832_v46 = vmax.f32 %v4826_v52, %v4829_v59 }
 0x87e   :  { %8021 = dma.done.wait [#allocation8 + $0x4], 1920 }
 0x87f   :  { %8022 = vsyncadd [#allocation8 + $0x4], 4294965376  ;;  %v7488_v21 = vpack.c.bf16 %v4831_v58, %v4830_v48  ;;  %7498 = vmatprep.subr.bf16.mxu1 %v11127_v30  ;;  %v6683_v9 = vld [vmem:[#allocation14] sm:$0xff]   ;;  %vm4850_vm7 = vcmask 195584   ;;  %v6730_v35 = vld [vmem:[#allocation14 + $0x8] sm:$0xff]   ;;  %vm8038_vm8 = vmmov 0  }
 0x880   :  { %v6684_v56 = vunpack.c.l.bf16 %v6683_v9  ;;  %v6685_v47 = vunpack.c.h.bf16 %v6683_v9  ;;  %v6688_v22 = vunpack.c.l.bf16 %v6730_v35  ;;  %v7904_v16 = vld [vmem:[#allocation6 + $0x14] sm:$0xff]   ;;  %v6695_v11 = vld [vmem:[#allocation6] sm:$0xff]   ;;  %v6689_v18 = vunpack.c.h.bf16 %v6730_v35  ;;  %v6732_v14 = vld [vmem:[#allocation6 + $0x8] sm:$0xff]   ;;  %6865 = vmatprep.mubr.msk.f32.mxu1 %vm8038_vm8, %v10999_v34 }
 0x881   :  { %7489 = vmatprep.subr.bf16.mxu0 %v7488_v21  ;;  %v6731_v31 = vld [vmem:[#allocation14 + $0x10] sm:$0xff]   ;;  %7500 = vmatpush3.bf16.msra.mxu1 %v6695_v11  ;;  %v4979_v8 = vld [vmem:[#allocation6 + $0x24] sm:$0x3]  ;;  %v4968_v26 = vld [vmem:[#allocation6 + $0x10] sm:$0x3]  ;;  %vm4985_vm9 = vcmask 293888  }
 0x882   :  { %7491 = vmatpush3.bf16.msra.mxu0 %v7488_v21  ;;  %6833 = vmatprep.mubr.msk.f32.mxu0 %vm4850_vm7, %v6684_v56  ;;  %v6692_v50 = vunpack.c.l.bf16 %v6731_v31  ;;  %v7871_v49 = vld [vmem:[#allocation6 + $0x1c] sm:$0xff]  ;;  %v6693_v20 = vunpack.c.h.bf16 %v6731_v31  ;;  %v4984_v24 = vunpack.c.l.bf16 %v4979_v8  ;;  %v4973_v2 = vunpack.c.l.bf16 %v4968_v26  ;;  %v6707_v29 = vld [vmem:[#allocation6 + $0x28] sm:$0xff]   ;;  %v6734_v27 = vld [vmem:[#allocation6 + $0x30] sm:$0xff]  }
 0x883   :  { %6831 = vmatprep.subr.mxu0 %v4832_v46  ;;  %7501 = vmatprep.subr.bf16.mxu1 %v11127_v30  ;;  %v7905_v19 = vld [vmem:[#allocation6 + $0x3c] sm:$0xff]   ;;  %v7873_v15 = vld [vmem:[#allocation6 + $0x44] sm:$0xff]  ;;  %v5143_v53 = vld [vmem:[#allocation6 + $0x38] sm:$0x3]  ;;  %vm5500_vm11 = vcmask 818176  }
 0x884   :  { %v5231_v40 = vld [vmem:[#allocation6 + $0x4c] sm:$0x3]  ;;  %v5148_v4 = vunpack.c.l.bf16 %v5143_v53  ;;  %v6719_v33 = vld [vmem:[#allocation6 + $0x50] sm:$0xff]   ;;  %v7906_v45 = vld [vmem:[#allocation6 + $0x64] sm:$0xff]  }
 0x885   :  { %7503 = vmatpush3.bf16.msra.mxu1 %v6732_v14  ;;  %v5236_v43 = vunpack.c.l.bf16 %v5231_v40  ;;  %v6736_v17 = vld [vmem:[#allocation6 + $0x58] sm:$0xff]   ;;  %v7875_v28 = vld [vmem:[#allocation6 + $0x6c] sm:$0xff]  ;;  %v5319_v38 = vld [vmem:[#allocation6 + $0x60] sm:$0x3] }
 0x886   :  { %6832 = vmatpush3.msra.mxu0 %v4832_v46  ;;  %6863 = vmatprep.subr.mxu1 %v10999_v34  ;;  %v5407_v5 = vld [vmem:[#allocation6 + $0x74] sm:$0x3]  ;;  %v5324_v25 = vunpack.c.l.bf16 %v5319_v38  ;;  %v5490_v60 = vld [vmem:[#allocation12 + $0x3] ss:$0 sm:$0xff]  ;;  %v11194_v46 = vld [vmem:[#allocation207_spill] sm:$0xff] }
 0x887   :  { %7492 = vmatprep.subr.bf16.mxu0 %v11127_v30  ;;  %6834 = vmatmul.mubr.msk.f32.vlgmr.msra.gmra.mrb[114].mxu0 %vm4850_vm7, %v6685_v47  ;;  %v5412_v7 = vunpack.c.l.bf16 %v5407_v5  ;;  %vm5494_vm10 = vcmp.lt.s32.totalorder %v11194_v46, 4 }
 0x888   :  { %6836 = vmatprep.mubr.msk.f32.mxu0 %vm4850_vm7, %v6688_v22  ;;  %7494 = vmatpush3.bf16.msra.mxu0 %v7904_v16  ;;  %v10595_v9 = vsel %vm5494_vm10, 1.0, %v10999_v34 }
 0x889   :  { %7495 = vmatprep.subr.bf16.mxu0 %v11127_v30  ;;  %6864 = vmatpush3.msk.msra.mxu1 %vm2041_vm1, %v4973_v2 }
 0x88a   :  { %7510 = vmatprep.subr.bf16.mxu1 %v11127_v30 }
 0x88b   :  { %6837 = vmatmul.mubr.msk.f32.gmra.mrb[116].mxu0 %vm4850_vm7, %v6689_v18 }
 0x88c   :  { %6839 = vmatprep.mubr.msk.f32.mxu0 %vm4850_vm7, %v6692_v50  ;;  %7497 = vmatpush3.bf16.msra.mxu0 %v7871_v49 }
 0x88d   :  { %6850 = vmatprep.subr.mxu0 %v10999_v34 }
 0x88f   :  { %6840 = vmatmul.mubr.msk.f32.gmra.mrb[118].mxu0 %vm4850_vm7, %v6693_v20 }
 0x890   :  { %6851 = vmatpush3.msk.msra.mxu0 %vm2041_vm1, %v4984_v24  ;;  %6852 = vmatprep.mubr.msk.f32.mxu0 %vm8038_vm8, %v10999_v34 }
 0x891   :  { %7504 = vmatprep.subr.bf16.mxu0 %v11127_v30 }
 0x95a   :  { %v6835_v36 = vpop.f32.mrb[114].mxu0 }
 0x95b   :  { %v4935_v62 = vpop.f32.mrb[115].mxu0  ;;  %6853 = vmatmul.mubr.msk.f32.vlgmr.msra.gmra.mrb[120].mxu0 %vm4985_vm9, %v6835_v36 }
 0x95c   :  { %7506 = vmatpush3.bf16.msra.mxu0 %v6707_v29  ;;  %6866 = vmatmul.mubr.msk.f32.vlgmr.msra.gmra.mrb[114].mxu1 %vm4985_vm9, %v4935_v62 }
 0x95d   :  { %7512 = vmatpush3.bf16.msra.mxu1 %v7905_v19  ;;  %7507 = vmatprep.subr.bf16.mxu0 %v11127_v30 }
 0x95e   :  { %7513 = vmatprep.subr.bf16.mxu1 %v11127_v30  ;;  %v6838_v39 = vpop.f32.mrb[116].mxu0  ;;  %6878 = vmatprep.mubr.msk.f32.mxu0 %vm8038_vm8, %v10999_v34 }
 0x95f   :  { %v4945_v41 = vpop.f32.mrb[117].mxu0  ;;  %6891 = vmatprep.mubr.msk.f32.mxu1 %vm8038_vm8, %v10999_v34 }
 0x960   :  { %7509 = vmatpush3.bf16.msra.mxu0 %v6734_v27 }
 0x961   :  { %7515 = vmatpush3.bf16.msra.mxu1 %v7873_v15  ;;  %6876 = vmatprep.subr.mxu0 %v10999_v34 }
 0x962   :  { %6889 = vmatprep.subr.mxu1 %v10999_v34  ;;  %v6841_v44 = vpop.f32.mrb[118].mxu0 }
 0x963   :  { %v4955_v32 = vpop.f32.mrb[119].mxu0 }
 0x964   :  { %6877 = vmatpush3.msk.msra.mxu0 %vm2041_vm1, %v5148_v4 }
 0x965   :  { %6879 = vmatmul.mubr.msk.f32.vlgmr.msra.gmra.mrb[122].mxu0 %vm4985_vm9, %v4945_v41  ;;  %6890 = vmatpush3.msk.msra.mxu1 %vm2041_vm1, %v5236_v43  ;;  %v5525_v41 = vld [vmem:[#allocation12 + $0x4] ss:$0 sm:$0xff]  ;;  %v5527_v43 = vld [vmem:[#allocation12 + $0x5] ss:$0 sm:$0xff] }
 0x966   :  { %7516 = vmatprep.subr.bf16.mxu0 %v11127_v30  ;;  %6892 = vmatmul.mubr.msk.f32.vlgmr.msra.gmra.mrb[116].mxu1 %vm4985_vm9, %v6838_v39 }
 0x967   :  { %7518 = vmatpush3.bf16.msra.mxu0 %v6719_v33  ;;  %7522 = vmatprep.subr.bf16.mxu1 %v11127_v30 }
 0x968   :  { %7524 = vmatpush3.bf16.msra.mxu1 %v7906_v45  ;;  %7519 = vmatprep.subr.bf16.mxu0 %v11127_v30 }
 0x969   :  { %7525 = vmatprep.subr.bf16.mxu1 %v11127_v30  ;;  %6904 = vmatprep.mubr.msk.f32.mxu0 %vm8038_vm8, %v10999_v34 }
 0x96a   :  { %6917 = vmatprep.mubr.msk.f32.mxu1 %vm8038_vm8, %v10999_v34 }
 0x96b   :  { %7521 = vmatpush3.bf16.msra.mxu0 %v6736_v17 }
 0x96c   :  { %7527 = vmatpush3.bf16.msra.mxu1 %v7875_v28  ;;  %6902 = vmatprep.subr.mxu0 %v10999_v34 }
 0x96d   :  { %6915 = vmatprep.subr.mxu1 %v10999_v34 }
 0x96f   :  { %6903 = vmatpush3.msk.msra.mxu0 %vm2041_vm1, %v5324_v25 }
 0x970   :  { %6905 = vmatmul.mubr.msk.f32.vlgmr.msra.gmra.mrb[124].mxu0 %vm4985_vm9, %v4955_v32  ;;  %6916 = vmatpush3.msk.msra.mxu1 %vm2041_vm1, %v5412_v7 }
 0x971   :  { %6918 = vmatmul.mubr.msk.f32.vlgmr.msra.gmra.mrb[118].mxu1 %vm4985_vm9, %v6841_v44 }
 0xa2e   :  { %v5058_v42 = vpop.f32.mrb[120].mxu0 }
 0xa2f   :  { %v6854_v6 = vpop.f32.mrb[121].mxu0  ;;  %v5134_v12 = vpop.f32.mrb[114].mxu1 }
 0xa30   :  { %v5135_v0 = vadd.f32 %v5134_v12, %v5058_v42  ;;  %v6867_v54 = vpop.f32.mrb[115].mxu1 }
 0xa38   :  { %v5221_v23 = vpop.f32.mrb[122].mxu0 }
 0xa39   :  { %v5225_v3 = vadd.f32 %v5221_v23, %v5135_v0  ;;  %v6880_v57 = vpop.f32.mrb[123].mxu0  ;;  %v5309_v37 = vpop.f32.mrb[116].mxu1 }
 0xa3a   :  { %v6893_v55 = vpop.f32.mrb[117].mxu1 }
 0xa3b   :  { %v5313_v48 = vadd.f32 %v5309_v37, %v5225_v3 }
 0xa43   :  { %v5397_v1 = vpop.f32.mrb[124].mxu0 }
 0xa44   :  { %v5401_v13 = vadd.f32 %v5397_v1, %v5313_v48  ;;  %v6906_v61 = vpop.f32.mrb[125].mxu0  ;;  %v5485_v51 = vpop.f32.mrb[118].mxu1 }
 0xa45   :  { %v6919_v58 = vpop.f32.mrb[119].mxu1 }
 0xa46   :  { %v5489_v52 = vadd.f32 %v5485_v51, %v5401_v13 }
 0xa48   :  { %v5491_v59 = vadd.f32 %v5490_v60, %v5489_v52 }
 0xa4a   :  { %v5497_v21 = vmul.f32 0.01, %v5491_v59 }
 0xa4c   :  { %v5498_v35 = vmax.f32 %v5491_v59, %v5497_v21 }
 0xa4e   :  { %v5499_v56 = vmul.f32 %v10595_v9, %v5498_v35 }
 0xa50   :  { %v5501_v47 = vsel %vm5500_vm11, %v5499_v56, 0.0  ;;  %v5508_v22 = vmul.f32 %v5499_v56, %v5498_v35 }
 0xa51   :  { %v5502_v16 = vrot.slane %v5501_v47, 4 }
 0xa52   :  { %v5509_v31 = vsel %vm5500_vm11, %v5508_v22, 0.0 }
 0xa53   :  { %v5503_v11 = vadd.f32 %v5502_v16, %v5501_v47  ;;  %v5510_v18 = vrot.slane %v5509_v31, 4 }
 0xa55   :  { %v5504_v14 = vrot.slane %v5503_v11, 2  ;;  %v5511_v50 = vadd.f32 %v5510_v18, %v5509_v31 }
 0xa57   :  { %v5505_v49 = vadd.f32 %v5504_v14, %v5503_v11  ;;  %v5512_v8 = vrot.slane %v5511_v50, 2 }
 0xa59   :  { %v5506_v20 = vrot.slane %v5505_v49, 1  ;;  %v5513_v24 = vadd.f32 %v5512_v8, %v5511_v50 }
 0xa5b   :  { %v5507_v26 = vadd.f32 %v5506_v20, %v5505_v49  ;;  %v5514_v2 = vrot.slane %v5513_v24, 1 }
 0xa5d   :  { %v5515_v29 = vadd.f32 %v5514_v2, %v5513_v24  ;;  %v5516_v19 = vmul.f32 0.25, %v5507_v26 }
 0xa5f   :  { %v5517_v36 = vmul.f32 0.25, %v5515_v29  ;;  %v5518_v62 = vmul.f32 %v5516_v19, %v5516_v19  ;;  %v5521_v39 = vsub.f32 %v5498_v35, %v5516_v19 }
 0xa61   :  { %v5519_v27 = vsub.f32 %v5517_v36, %v5518_v62 }
 0xa63   :  { %v5520_v15 = vmax.f32 %v5519_v27, 0.0 }
 0xa65   :  { %v5522_v53 = vadd.f32 1e-05, %v5520_v15 }
 0xa67   :  { %7907 = vrsqrt.f32 %v5522_v53 }
 0xa71   :  { %v7908_v40 = vpop.eup %7907 }
 0xa72   :  { %v5524_v4 = vmul.f32 %v7908_v40, %v5521_v39 }
 0xa74   :  { %v5526_v44 = vmul.f32 %v5525_v41, %v5524_v4 }
 0xa76   :  { %v5528_v32 = vadd.f32 %v5527_v43, %v5526_v44 }
 0xa77   :  { %8023 = dma.done.wait [#allocation8 + $0x5], 10240 }
 0xa78   :  { %8024 = vsyncadd [#allocation8 + $0x5], 4294957056  ;;  %7528 = vmatprep.subr.bf16.mxu0 %v11127_v30  ;;  %6946 = vmatprep.mubr.msk.f32.mxu0 %vm8038_vm8, %v10999_v34  ;;  %v5533_v33 = vld [vmem:[#allocation7] sm:$0xff]  ;;  %v5534_v45 = vld [vmem:[#allocation7 + $0x10] sm:$0xff]  ;;  %vm5677_vm12 = vcmask 1041408   ;;  %vm5633_vm13 = vcmask 408576  }
 0xa79   :  { %7546 = vmatprep.subr.bf16.mxu1 %v11127_v30  ;;  %6963 = vmatprep.mubr.msk.f32.mxu1 %vm8038_vm8, %v10999_v34  ;;  %v5535_v17 = vld [vmem:[#allocation7 + $0x20] sm:$0xff]  ;;  %v5536_v28 = vld [vmem:[#allocation7 + $0x30] sm:$0xff]  ;;  %v5783_v53 = vld [vmem:[#allocation7 + $0xb8] sm:$0xff]  ;;  %vm5809_vm14 = vcmask 64512   ;;  %vm6022_vm15 = vcmask 588800   ;;  %vm6343_vm0 = vcmask 121856  }
 0xa7a   :  { %7530 = vmatpush3.bf16.msra.mxu0 %v5533_v33  ;;  %v5537_v38 = vld [vmem:[#allocation7 + $0x40] sm:$0xff]  ;;  %v5538_v5 = vld [vmem:[#allocation7 + $0x50] sm:$0xff]  ;;  %v5804_v39 = vld [vmem:[%s10686_s1] sm:$0xff]  ;;  %s8039_s1 = smov [#allocation15]  }
 0xa7b   :  { %7531 = vmatprep.subr.bf16.mxu0 %v11127_v30  ;;  %v5539_v25 = vld [vmem:[#allocation7 + $0x60] sm:$0x3]  ;;  %v5662_v42 = vld [vmem:[#allocation7 + $0x70] sm:$0xff]  ;;  %v5553_v23 = vld [vmem:[#allocation12 + $0x6] ss:$0 sm:$0xff]  ;;  %s6363_s18 = sshll.u32 %s8039_s1, 4  ;;  %s6364_s18 = int_to_ptr.vmem [resolvable:$true] %s6363_s18 }
 0xa7c   :  { %v5552_v7 = vunpack.c.l.bf16 %v5539_v25  ;;  %7548 = vmatpush3.bf16.msra.mxu1 %v5662_v42  ;;  %v5663_v6 = vld [vmem:[#allocation7 + $0x80] sm:$0xff]  ;;  %v5664_v12 = vld [vmem:[#allocation7 + $0x90] sm:$0xff]  ;;  %v5785_v41 = vld [vmem:[#allocation7 + $0xc8] sm:$0xff]  ;;  %s7987_s11 = scalar_lea.vmem %s6364_s18, 64  ;;  %p7992_p11 = scmp.lt.s32.totalorder %s6364_s18, %s6364_s18 }
 0xa7d   :  { %7549 = vmatprep.subr.bf16.mxu1 %v11127_v30  ;;  %v5665_v0 = vld [vmem:[#allocation7 + $0xa0] sm:$0x1]  ;;  %v5658_v26 = vld [vmem:[#allocation12 + $0x7] ss:$0 sm:$0xff]  ;;  %v5660_v29 = vld [vmem:[#allocation12 + $0x10] ss:$0 sm:$0xff]  ;;  %p7988_p10 = scmp.ne.s32.totalorder %s6364_s18, %s7987_s11  ;;  %p7993_p12 = scmp.lt.s32.totalorder %s7987_s11, %s7987_s11 }
 0xa7e   :  { %7533 = vmatpush3.bf16.msra.mxu0 %v5534_v45  ;;  %v5672_v54 = vunpack.c.l.bf16 %v5665_v0  ;;  %v5806_v62 = vld [vmem:[#allocation7 + $0xf0] ss:$8 sps:$4 sm:$0xff]   ;;  %v5784_v4 = vld [vmem:[#allocation7 + $0xc0] sm:$0xff] }
 0xa7f   :  { %7534 = vmatprep.subr.bf16.mxu0 %v11127_v30  ;;  %v5808_v27 = vunpack.c.h.bf16 %v5806_v62  ;;  %v5807_v15 = vunpack.c.l.bf16 %v5806_v62  ;;  %v5782_v40 = vld [vmem:[#allocation7 + $0xb0] sm:$0xff]  ;;  %v5787_v43 = vld [vmem:[#allocation7 + $0xd8] sm:$0xff]  ;;  %v5788_v45 = vld [vmem:[#allocation7 + $0xe0] sm:$0x1]  ;;  %p7994_p13 = por %p7993_p12, %p7992_p11 }
 0xa80   :  { %7551 = vmatpush3.bf16.msra.mxu1 %v5663_v6  ;;  %v5786_v44 = vld [vmem:[#allocation7 + $0xd0] sm:$0xff]  ;;  %v5989_v6 = vld [vmem:[#allocation7 + $0x160] sm:$0xff] }
 0xa81   :  { %7552 = vmatprep.subr.bf16.mxu1 %v11127_v30  ;;  %v5986_v25 = vld [vmem:[#allocation7 + $0x130] sm:$0xff]  ;;  %v5991_v0 = vld [vmem:[#allocation7 + $0x180] sm:$0xff]  ;;  %p7995_p0 = pnand %p7994_p13, %p7988_p10 }
 0xa82   :  { %7536 = vmatpush3.bf16.msra.mxu0 %v5535_v17  ;;  %v5802_v17 = vunpack.c.l.bf16 %v5788_v45  ;;  %v5988_v42 = vld [vmem:[#allocation7 + $0x150] sm:$0xff]  ;;  %v5993_v62 = vld [vmem:[#allocation7 + $0x1a0] sm:$0xff] }
 0xa83   :  { %7537 = vmatprep.subr.bf16.mxu0 %v11127_v30 }
 0xa84   :  { %7554 = vmatpush3.bf16.msra.mxu1 %v5664_v12  ;;  %v5990_v12 = vld [vmem:[#allocation7 + $0x170] sm:$0xff] }
 0xa85   :  { %6961 = vmatprep.subr.mxu1 %v10999_v34 }
 0xa86   :  { %7539 = vmatpush3.bf16.msra.mxu0 %v5536_v28  ;;  %v5983_v28 = vld [vmem:[#allocation7 + $0x100] sm:$0xff] }
 0xa87   :  { %7540 = vmatprep.subr.bf16.mxu0 %v11127_v30 }
 0xa88   :  { %6962 = vmatpush3.msk.msra.mxu1 %vm5677_vm12, %v5672_v54  ;;  %v5992_v54 = vld [vmem:[#allocation7 + $0x190] sm:$0xff] }
 0xa89   :  { %5813 = vmatprep.subr.mxu1 %v5808_v27  ;;  %v5994_v27 = vld [vmem:[#allocation7 + $0x1b0] sm:$0xff] }
 0xa8a   :  { %7542 = vmatpush3.bf16.msra.mxu0 %v5537_v38  ;;  %v5984_v38 = vld [vmem:[#allocation7 + $0x110] sm:$0xff] }
 0xa8b   :  { %7543 = vmatprep.subr.bf16.mxu0 %v11127_v30 }
 0xa8e   :  { %7545 = vmatpush3.bf16.msra.mxu0 %v5538_v5  ;;  %v5985_v5 = vld [vmem:[#allocation7 + $0x120] sm:$0xff] }
 0xa8f   :  { %6944 = vmatprep.subr.mxu0 %v10999_v34 }
 0xa92   :  { %6945 = vmatpush3.msk.msra.mxu0 %vm2041_vm1, %v5552_v7  ;;  %v5987_v7 = vld [vmem:[#allocation7 + $0x140] sm:$0xff] }
 0xa93   :  { %6947 = vmatmul.mubr.msk.f32.vlgmr.msra.gmra.mrb[126].mxu0 %vm5500_vm11, %v5528_v32  ;;  %7567 = vmatprep.subr.bf16.mxu0 %v11127_v30  ;;  %v5789_v32 = vld [vmem:[#allocation7 + $0xe8] sm:$0x1] }
 0xa94   :  { %v5803_v33 = vunpack.c.l.bf16 %v5789_v32  ;;  %7569 = vmatpush1.bf16.msra.mxu0 %v5983_v28 }
 0xa95   :  { %7570 = vmatprep.subr.bf16.mxu0 %v11127_v30 }
 0xa98   :  { %7572 = vmatpush1.bf16.msra.mxu0 %v5984_v38  ;;  %v6127_v38 = vld [vmem:[#allocation7 + $0x1d0] sm:$0xff] }
 0xa99   :  { %7573 = vmatprep.subr.bf16.mxu0 %v11127_v30 }
 0xa9c   :  { %7575 = vmatpush1.bf16.msra.mxu0 %v5985_v5  ;;  %v6128_v5 = vld [vmem:[#allocation7 + $0x1e0] sm:$0xff] }
 0xa9d   :  { %7576 = vmatprep.subr.bf16.mxu0 %v11127_v30 }
 0xaa0   :  { %7578 = vmatpush1.bf16.msra.mxu0 %v5986_v25  ;;  %v6131_v25 = vld [vmem:[#allocation7 + $0x210] sm:$0xff] }
 0xaa1   :  { %7579 = vmatprep.subr.bf16.mxu0 %v11127_v30 }
 0xaa4   :  { %7581 = vmatpush1.bf16.msra.mxu0 %v5987_v7  ;;  %v6132_v7 = vld [vmem:[#allocation7 + $0x220] sm:$0xff] }
 0xaa5   :  { %7582 = vmatprep.subr.bf16.mxu0 %v11127_v30 }
 0xaa8   :  { %7584 = vmatpush1.bf16.msra.mxu0 %v5988_v42  ;;  %v6133_v42 = vld [vmem:[#allocation7 + $0x230] sm:$0x3] }
 0xaa9   :  { %7585 = vmatprep.subr.bf16.mxu0 %v11127_v30 }
 0xaac   :  { %7587 = vmatpush1.bf16.msra.mxu0 %v5989_v6  ;;  %v6146_v6 = vunpack.c.l.bf16 %v6133_v42 }
 0xaad   :  { %7588 = vmatprep.subr.bf16.mxu0 %v11127_v30 }
 0xab0   :  { %7590 = vmatpush1.bf16.msra.mxu0 %v5990_v12  ;;  %v6021_v12 = vld [vmem:[#allocation12 + $0x15] ss:$0 sm:$0xff] }
 0xab1   :  { %7591 = vmatprep.subr.bf16.mxu0 %v11127_v30 }
 0xab4   :  { %7593 = vmatpush1.bf16.msra.mxu0 %v5991_v0 }
 0xab5   :  { %7594 = vmatprep.subr.bf16.mxu0 %v11127_v30 }
 0xab8   :  { %7596 = vmatpush1.bf16.msra.mxu0 %v5992_v54 }
 0xab9   :  { %7597 = vmatprep.subr.bf16.mxu0 %v11127_v30 }
 0xabc   :  { %7599 = vmatpush1.bf16.msra.mxu0 %v5993_v62  ;;  %v6258_v62 = vld [vmem:[#allocation7 + $0x270] sm:$0x1] }
 0xabd   :  { %7600 = vmatprep.subr.bf16.mxu0 %v11127_v30 }
 0xac0   :  { %7602 = vmatpush1.bf16.msra.mxu0 %v5994_v27  ;;  %v6265_v27 = vunpack.c.l.bf16 %v6258_v62 }
 0xac1   :  { %6074 = vmatprep.subr.mxu0 %v10999_v34 }
 0xb66   :  { %v5626_v3 = vpop.f32.mrb[126].mxu0 }
 0xb67   :  { %v5627_v57 = vadd.f32 %v5626_v3, %v5553_v23  ;;  %v6948_v37 = vpop.f32.mrb[127].mxu0  ;;  %v5673_v23 = vld [vmem:[#allocation12 + $0x11] ss:$0 sm:$0xff] }
 0xb69   :  { %v5630_v55 = vmul.f32 0.01, %v5627_v57 }
 0xb6b   :  { %v5631_v48 = vmax.f32 %v5627_v57, %v5630_v55 }
 0xb6d   :  { %v5632_v1 = vmul.f32 %v10595_v9, %v5631_v48 }
 0xb6f   :  { %v5634_v13 = vsel %vm5633_vm13, %v5632_v1, 0.0  ;;  %v5641_v61 = vmul.f32 %v5632_v1, %v5631_v48 }
 0xb70   :  { %v5635_v51 = vrot.slane %v5634_v13, 4 }
 0xb71   :  { %v5642_v60 = vsel %vm5633_vm13, %v5641_v61, 0.0 }
 0xb72   :  { %v5636_v58 = vadd.f32 %v5635_v51, %v5634_v13  ;;  %v5643_v52 = vrot.slane %v5642_v60, 4 }
 0xb74   :  { %v5637_v59 = vrot.slane %v5636_v58, 2  ;;  %v5644_v46 = vadd.f32 %v5643_v52, %v5642_v60 }
 0xb76   :  { %v5638_v21 = vadd.f32 %v5637_v59, %v5636_v58  ;;  %v5645_v35 = vrot.slane %v5644_v46, 2 }
 0xb78   :  { %v5639_v56 = vrot.slane %v5638_v21, 1  ;;  %v5646_v47 = vadd.f32 %v5645_v35, %v5644_v46 }
 0xb7a   :  { %v5640_v22 = vadd.f32 %v5639_v56, %v5638_v21  ;;  %v5647_v16 = vrot.slane %v5646_v47, 1 }
 0xb7c   :  { %v5648_v31 = vadd.f32 %v5647_v16, %v5646_v47  ;;  %v5649_v11 = vmul.f32 0.25, %v5640_v22 }
 0xb7e   :  { %v5650_v18 = vmul.f32 0.25, %v5648_v31  ;;  %v5651_v14 = vmul.f32 %v5649_v11, %v5649_v11  ;;  %v5654_v20 = vsub.f32 %v5631_v48, %v5649_v11 }
 0xb80   :  { %v5652_v50 = vsub.f32 %v5650_v18, %v5651_v14 }
 0xb82   :  { %v5653_v49 = vmax.f32 %v5652_v50, 0.0 }
 0xb84   :  { %v5655_v8 = vadd.f32 1e-05, %v5653_v49 }
 0xb86   :  { %7909 = vrsqrt.f32 %v5655_v8 }
 0xb90   :  { %v7910_v24 = vpop.eup %7909 }
 0xb91   :  { %v5657_v2 = vmul.f32 %v7910_v24, %v5654_v20 }
 0xb93   :  { %v5659_v19 = vmul.f32 %v5658_v26, %v5657_v2  ;;  %v5778_v26 = vld [vmem:[#allocation12 + $0x12] ss:$0 sm:$0xff] }
 0xb95   :  { %v5661_v36 = vadd.f32 %v5660_v29, %v5659_v19  ;;  %v5780_v29 = vld [vmem:[#allocation12 + $0x13] ss:$0 sm:$0xff] }
 0xb97   :  { %6964 = vmatmul.mubr.msk.f32.vlgmr.msra.gmra.mrb[120].mxu1 %vm5633_vm13, %v5661_v36 }
 0xb98   :  { %5877 = vmatprep.mubr.f32.mxu1 %v10999_v34  ;;  %5814 = vmatpush1.msra.mxu1 %v5807_v15  ;;  %v5995_v15 = vld [vmem:[#allocation7 + $0x1c0] sm:$0xf] }
 0xb99   :  { %7556 = vmatprep.subr.bf16.mxu1 %v5783_v53  ;;  %v6020_v53 = vunpack.c.l.bf16 %v5995_v15  ;;  %v6147_v15 = vld [vmem:[#allocation12 + $0x20] ss:$0 sm:$0xff] }
 0xb9b   :  { %6667 = vmatmul.mubr.msk.f32.vlgmr.msra.gmra.mrb[122].mxu1 %vm5809_vm14, %v5804_v39  ;;  %6075 = vmatpush1.msra.mxu0 %v6020_v53  ;;  %v5965_v39 = vld [vmem:[#allocation12 + $0x14] ss:$8 sm:$0x3] }
 0xb9c   :  { %7558 = vmatpush1.bf16.msra.mxu1 %v5782_v40  ;;  %5957 = vmatprep.mubr.f32.mxu1 %v10999_v34  ;;  %v5970_v40 = vrot.slane %v5965_v39, %v11125_v63  ;;  %v6129_v63 = vld [vmem:[#allocation7 + $0x1f0] sm:$0xff] }
 0xb9d   :  { %7560 = vmatprep.subr.bf16.mxu1 %v5785_v41  ;;  %v5974_v41 = vrot.slane %v5965_v39, %v11126_v10  ;;  %v6130_v10 = vld [vmem:[#allocation7 + $0x200] sm:$0xff] }
 0xba0   :  { %7562 = vmatpush1.bf16.msra.mxu1 %v5784_v4 }
 0xba1   :  { %7564 = vmatprep.subr.bf16.mxu1 %v5787_v43 }
 0xba4   :  { %7566 = vmatpush1.bf16.msra.mxu1 %v5786_v44 }
 0xba5   :  { %6668 = vmatprep.subr.msk.mxu1 %vm5677_vm12, %v5803_v33 }
 0xba8   :  { %6669 = vmatpush1.msk.msra.mxu1 %vm5677_vm12, %v5802_v17 }
 0xba9   :  { %7603 = vmatprep.subr.bf16.mxu1 %v11127_v30 }
 0xc6a   :  { %v5747_v3 = vpop.f32.mrb[120].mxu1 }
 0xc6b   :  { %v5748_v57 = vadd.f32 %v5747_v3, %v5673_v23  ;;  %v6965_v37 = vpop.f32.mrb[121].mxu1 }
 0xc6d   :  { %v5751_v55 = vmul.f32 0.01, %v5748_v57 }
 0xc6f   :  { %v5752_v48 = vmax.f32 %v5748_v57, %v5751_v55 }
 0xc71   :  { %v5753_v1 = vmul.f32 %v10595_v9, %v5752_v48 }
 0xc73   :  { %v5754_v13 = vsel %vm5633_vm13, %v5753_v1, 0.0  ;;  %v5761_v61 = vmul.f32 %v5753_v1, %v5752_v48 }
 0xc74   :  { %v5755_v51 = vrot.slane %v5754_v13, 4 }
 0xc75   :  { %v5762_v60 = vsel %vm5633_vm13, %v5761_v61, 0.0 }
 0xc76   :  { %v5756_v58 = vadd.f32 %v5755_v51, %v5754_v13  ;;  %v5763_v52 = vrot.slane %v5762_v60, 4 }
 0xc78   :  { %v5757_v59 = vrot.slane %v5756_v58, 2  ;;  %v5764_v46 = vadd.f32 %v5763_v52, %v5762_v60 }
 0xc7a   :  { %v5758_v21 = vadd.f32 %v5757_v59, %v5756_v58  ;;  %v5765_v35 = vrot.slane %v5764_v46, 2 }
 0xc7c   :  { %v5759_v56 = vrot.slane %v5758_v21, 1  ;;  %v5766_v47 = vadd.f32 %v5765_v35, %v5764_v46 }
 0xc7e   :  { %v5760_v22 = vadd.f32 %v5759_v56, %v5758_v21  ;;  %v5767_v16 = vrot.slane %v5766_v47, 1 }
 0xc80   :  { %v5768_v31 = vadd.f32 %v5767_v16, %v5766_v47  ;;  %v5769_v11 = vmul.f32 0.25, %v5760_v22 }
 0xc82   :  { %v5770_v18 = vmul.f32 0.25, %v5768_v31  ;;  %v5771_v14 = vmul.f32 %v5769_v11, %v5769_v11  ;;  %v5774_v20 = vsub.f32 %v5752_v48, %v5769_v11 }
 0xc84   :  { %v5772_v50 = vsub.f32 %v5770_v18, %v5771_v14 }
 0xc86   :  { %v5773_v49 = vmax.f32 %v5772_v50, 0.0 }
 0xc88   :  { %v5775_v8 = vadd.f32 1e-05, %v5773_v49 }
 0xc8a   :  { %7911 = vrsqrt.f32 %v5775_v8  ;;  %v6123_v8 = vld [vmem:[#allocation12 + $0x16] ss:$0 sm:$0xff] }
 0xc94   :  { %v7912_v24 = vpop.eup %7911 }
 0xc95   :  { %v5777_v2 = vmul.f32 %v7912_v24, %v5774_v20  ;;  %v6125_v24 = vld [vmem:[#allocation12 + $0x17] ss:$0 sm:$0xff] }
 0xc97   :  { %v5779_v19 = vmul.f32 %v5778_v26, %v5777_v2 }
 0xc99   :  { %v5781_v36 = vadd.f32 %v5780_v29, %v5779_v19  ;;  %v6255_v29 = vld [vmem:[#allocation7 + $0x240] sm:$0xff]  ;;  %v6256_v19 = vld [vmem:[#allocation7 + $0x250] sm:$0xff] }
 0xc9b   :  { %6670 = vmatmul.mubr.msk.f32.vlgmr.msra.gmra.mrb[122].mxu1 %vm5633_vm13, %v5781_v36  ;;  %v6257_v36 = vld [vmem:[#allocation7 + $0x260] sm:$0xff] }
 0xc9c   :  { %6992 = vmatprep.mubr.msk.f32.mxu1 %vm8038_vm8, %v10999_v34  ;;  %7605 = vmatpush3.bf16.msra.mxu1 %v6127_v38 }
 0xc9d   :  { %7606 = vmatprep.subr.bf16.mxu1 %v11127_v30 }
 0xca0   :  { %7608 = vmatpush3.bf16.msra.mxu1 %v6128_v5 }
 0xca1   :  { %7609 = vmatprep.subr.bf16.mxu1 %v11127_v30 }
 0xca4   :  { %7611 = vmatpush3.bf16.msra.mxu1 %v6129_v63 }
 0xca5   :  { %7612 = vmatprep.subr.bf16.mxu1 %v11127_v30 }
 0xca8   :  { %7614 = vmatpush3.bf16.msra.mxu1 %v6130_v10 }
 0xca9   :  { %7615 = vmatprep.subr.bf16.mxu1 %v11127_v30 }
 0xcac   :  { %7617 = vmatpush3.bf16.msra.mxu1 %v6131_v25 }
 0xcad   :  { %7618 = vmatprep.subr.bf16.mxu1 %v11127_v30 }
 0xcb0   :  { %7620 = vmatpush3.bf16.msra.mxu1 %v6132_v7 }
 0xcb1   :  { %6990 = vmatprep.subr.mxu1 %v10999_v34 }
 0xcb4   :  { %6991 = vmatpush3.msk.msra.mxu1 %vm2041_vm1, %v6146_v6  ;;  %vm6355_vm1 = vcmask 117760  }
 0xcb5   :  { %7621 = vmatprep.subr.bf16.mxu1 %v11127_v30 }
 0xd6e   :  { %v5959_v4 = vpop.f32.mrb[122].mxu1 }
 0xd6f   :  { %v5977_v43 = vadd.f32 %v5970_v40, %v5959_v4  ;;  %v5961_v44 = vpop.f32.mrb[123].mxu1 }
 0xd70   :  { %v5978_v32 = vadd.f32 %v5974_v41, %v5961_v44 }
 0xd71   :  { %v5979_v33 = vmul.f32 0.01, %v5977_v43 }
 0xd72   :  { %v5980_v45 = vmul.f32 0.01, %v5978_v32 }
 0xd73   :  { %v5981_v28 = vmax.f32 %v5977_v43, %v5979_v33 }
 0xd74   :  { %v5982_v17 = vmax.f32 %v5978_v32, %v5980_v45 }
 0xd76   :  { %6671 = vmatprep.mubr.msk.f32.mxu0 %vm6022_vm15, %v5982_v17 }
 0xd77   :  { %6091 = vmatmul.mubr.f32.vlgmr.msra.gmra.mrb[128].mxu0 %v5981_v28 }
 0xe4a   :  { %v6092_v0 = vpop.f32.mrb[128].mxu0 }
 0xe4b   :  { %v6093_v54 = vadd.f32 %v6092_v0, %v6021_v12  ;;  %v6094_v23 = vpop.f32.mrb[129].mxu0 }
 0xe4d   :  { %v6096_v3 = vmul.f32 0.01, %v6093_v54 }
 0xe4f   :  { %v6097_v57 = vmax.f32 %v6093_v54, %v6096_v3 }
 0xe51   :  { %v6098_v37 = vmul.f32 %v10595_v9, %v6097_v57 }
 0xe53   :  { %v6099_v55 = vsel %vm5500_vm11, %v6098_v37, 0.0  ;;  %v6106_v48 = vmul.f32 %v6098_v37, %v6097_v57  ;;  %v6251_v37 = vld [vmem:[#allocation12 + $0x21] ss:$0 sm:$0xff] }
 0xe54   :  { %v6100_v1 = vrot.slane %v6099_v55, 4 }
 0xe55   :  { %v6107_v13 = vsel %vm5500_vm11, %v6106_v48, 0.0  ;;  %v6253_v48 = vld [vmem:[#allocation12 + $0x22] ss:$0 sm:$0xff] }
 0xe56   :  { %v6101_v61 = vadd.f32 %v6100_v1, %v6099_v55  ;;  %v6108_v51 = vrot.slane %v6107_v13, 4 }
 0xe58   :  { %v6102_v60 = vrot.slane %v6101_v61, 2  ;;  %v6109_v58 = vadd.f32 %v6108_v51, %v6107_v13 }
 0xe5a   :  { %v6103_v52 = vadd.f32 %v6102_v60, %v6101_v61  ;;  %v6110_v59 = vrot.slane %v6109_v58, 2  ;;  %v6266_v61 = vld [vmem:[#allocation12 + $0x23] ss:$0 sm:$0xff] }
 0xe5c   :  { %v6104_v46 = vrot.slane %v6103_v52, 1  ;;  %v6111_v21 = vadd.f32 %v6110_v59, %v6109_v58 }
 0xe5e   :  { %v6105_v35 = vadd.f32 %v6104_v46, %v6103_v52  ;;  %v6112_v56 = vrot.slane %v6111_v21, 1 }
 0xe60   :  { %v6113_v47 = vadd.f32 %v6112_v56, %v6111_v21  ;;  %v6114_v22 = vmul.f32 0.25, %v6105_v35 }
 0xe62   :  { %v6115_v16 = vmul.f32 0.25, %v6113_v47  ;;  %v6116_v31 = vmul.f32 %v6114_v22, %v6114_v22  ;;  %v6119_v50 = vsub.f32 %v6097_v57, %v6114_v22 }
 0xe64   :  { %v6117_v11 = vsub.f32 %v6115_v16, %v6116_v31 }
 0xe66   :  { %v6118_v18 = vmax.f32 %v6117_v11, 0.0 }
 0xe68   :  { %v6120_v14 = vadd.f32 1e-05, %v6118_v18 }
 0xe6a   :  { %7913 = vrsqrt.f32 %v6120_v14 }
 0xe74   :  { %v7914_v49 = vpop.eup %7913 }
 0xe75   :  { %v6122_v20 = vmul.f32 %v7914_v49, %v6119_v50 }
 0xe77   :  { %v6124_v26 = vmul.f32 %v6123_v8, %v6122_v20 }
 0xe79   :  { %v6126_v2 = vadd.f32 %v6125_v24, %v6124_v26 }
 0xe7b   :  { %6993 = vmatmul.mubr.msk.f32.vlgmr.msra.gmra.mrb[124].mxu1 %vm5500_vm11, %v6126_v2 }
 0xe7c   :  { %7009 = vmatprep.mubr.msk.f32.mxu1 %vm8038_vm8, %v10999_v34  ;;  %7623 = vmatpush3.bf16.msra.mxu1 %v6255_v29 }
 0xe7d   :  { %7624 = vmatprep.subr.bf16.mxu1 %v11127_v30 }
 0xe80   :  { %7626 = vmatpush3.bf16.msra.mxu1 %v6256_v19 }
 0xe81   :  { %7627 = vmatprep.subr.bf16.mxu1 %v11127_v30 }
 0xe84   :  { %7629 = vmatpush3.bf16.msra.mxu1 %v6257_v36 }
 0xe85   :  { %7007 = vmatprep.subr.mxu1 %v10999_v34 }
 0xe88   :  { %7008 = vmatpush3.msk.msra.mxu1 %vm5677_vm12, %v6265_v27 }
 0xf4e   :  { %v6220_v53 = vpop.f32.mrb[124].mxu1 }
 0xf4f   :  { %v6221_v39 = vadd.f32 %v6220_v53, %v6147_v15  ;;  %v6994_v40 = vpop.f32.mrb[125].mxu1 }
 0xf51   :  { %v6224_v41 = vmul.f32 0.01, %v6221_v39 }
 0xf53   :  { %v6225_v4 = vmax.f32 %v6221_v39, %v6224_v41 }
 0xf55   :  { %v6226_v43 = vmul.f32 %v10595_v9, %v6225_v4 }
 0xf57   :  { %v6227_v44 = vsel %vm5633_vm13, %v6226_v43, 0.0  ;;  %v6234_v32 = vmul.f32 %v6226_v43, %v6225_v4 }
 0xf58   :  { %v6228_v30 = vrot.slane %v6227_v44, 4 }
 0xf59   :  { %v6235_v33 = vsel %vm5633_vm13, %v6234_v32, 0.0 }
 0xf5a   :  { %v6229_v45 = vadd.f32 %v6228_v30, %v6227_v44  ;;  %v6236_v34 = vrot.slane %v6235_v33, 4 }
 0xf5c   :  { %v6230_v17 = vrot.slane %v6229_v45, 2  ;;  %v6237_v28 = vadd.f32 %v6236_v34, %v6235_v33 }
 0xf5e   :  { %v6231_v38 = vadd.f32 %v6230_v17, %v6229_v45  ;;  %v6238_v5 = vrot.slane %v6237_v28, 2 }
 0xf60   :  { %v6232_v63 = vrot.slane %v6231_v38, 1  ;;  %v6239_v10 = vadd.f32 %v6238_v5, %v6237_v28 }
 0xf62   :  { %v6233_v25 = vadd.f32 %v6232_v63, %v6231_v38  ;;  %v6240_v7 = vrot.slane %v6239_v10, 1 }
 0xf64   :  { %v6241_v42 = vadd.f32 %v6240_v7, %v6239_v10  ;;  %v6242_v6 = vmul.f32 0.25, %v6233_v25 }
 0xf66   :  { %v6243_v12 = vmul.f32 0.25, %v6241_v42  ;;  %v6244_v9 = vmul.f32 %v6242_v6, %v6242_v6  ;;  %v6247_v3 = vsub.f32 %v6225_v4, %v6242_v6 }
 0xf68   :  { %v6245_v0 = vsub.f32 %v6243_v12, %v6244_v9 }
 0xf6a   :  { %v6246_v54 = vmax.f32 %v6245_v0, 0.0 }
 0xf6c   :  { %v6248_v23 = vadd.f32 1e-05, %v6246_v54 }
 0xf6e   :  { %7915 = vrsqrt.f32 %v6248_v23 }
 0xf78   :  { %v7916_v57 = vpop.eup %7915 }
 0xf79   :  { %v6250_v55 = vmul.f32 %v7916_v57, %v6247_v3 }
 0xf7b   :  { %v6252_v1 = vmul.f32 %v6251_v37, %v6250_v55 }
 0xf7d   :  { %v6254_v13 = vadd.f32 %v6253_v48, %v6252_v1 }
 0xf7f   :  { %7010 = vmatmul.mubr.msk.f32.vlgmr.msra.gmra.mrb[126].mxu1 %vm5633_vm13, %v6254_v13 }
0x1052   :  { %v6339_v51 = vpop.f32.mrb[126].mxu1 }
0x1053   :  { %v6340_v60 = vadd.f32 %v6339_v51, %v6266_v61  ;;  %v7011_v58 = vpop.f32.mrb[127].mxu1 }
0x1055   :  { %v6344_v52 = vsel %vm6343_vm0, %v6340_v60, -inf }
0x1056   :  { %6345 = vmax.xlane.f32.xlu0 %v6344_v52 }
0x10e3   :  { %v6346_v59 = vpop.xlane.xlu0 %6345 }
0x10e4   :  { %v6347_v46 = vsub.f32 %v6340_v60, %v6346_v59 }
0x10e6   :  { %v6348_v21 = vmul.f32 1.442695, %v6347_v46 }
0x10e8   :  { %7917 = vpow2.f32 %v6348_v21 }
0x10f2   :  { %v7918_v35 = vpop.eup %7917 }
0x10f3   :  { %v6350_v56 = vsel %vm6343_vm0, %v7918_v35, 0.0 }
0x10f4   :  { %6351 = vadd.xlane.f32.xlu0 %v6350_v56 }
0x1181   :  { %v6352_v47 = vpop.xlane.xlu0 %6351 }
0x1182   :  { %7919 = vrcp.f32 %v6352_v47 }
0x118c   :  { %v7920_v22 = vpop.eup %7919 }
0x118d   :  { %v6354_v16 = vmul.f32 %v7920_v22, %v7918_v35 }
0x118f   :  { %6356 = vst.msk [vmem:[#allocation15] sm:$0xf] %vm6355_vm1, %v6354_v16 }
0x1190   :  { %7998 = shalt.err (!%p7995_p0)
}
0x1191   :  { %s7999_s25 = scalar_lea.hbm %s10697_s12, 64 }
0x1192   :  { %p8000_p1 = scmp.ne.s32.totalorder %s10697_s12, %s7999_s25  ;;  %p8003_p2 = scmp.lt.u32.totalorder %s7999_s25, %s10697_s12 }
0x1194   :  { %p8005_p3 = pnand %p8003_p2, %p8000_p1 }
0x1196   :  { %8008 = shalt.err (!%p8005_p3)
}
0x1197   :  { %6366 = dma.vmem_to_hbm [thread:$0]  %s6364_s18, 64, %s10697_s12, [#allocation11]  }
0x1198   :  { %8025 = dma.done.wait [#allocation11], 64  }
0x1199   :  { %8026 = vsyncadd [#allocation11], 4294967232 }
0x119a   :  { %6370 = vsyncpa [#allocation10], 1 }
0x119b   :  { %6371 = vsyncpa [#allocation13], 1 }
0x119c   :  { %6372 = vsyncpa [#allocation11], 1 }
0x119d   :  { %6373 = vsyncmov [#allocation8] }
0x11a0   :  { %s6374_s5 = vpop.sfrf %6373 }
0x11a1   :  { %p6676_p4 = scmp.ne.s32.totalorder %s6374_s5, 0 }
0x11a3   :  { %6378 = shalt.err (%p6676_p4)  }
0x11a4   :  { %6380 = vsyncmov [#allocation8 + $0x1] }
0x11a7   :  { %s6381_s7 = vpop.sfrf %6380 }
0x11a8   :  { %p6677_p5 = scmp.ne.s32.totalorder %s6381_s7, 0 }
0x11aa   :  { %6385 = shalt.err (%p6677_p5)  }
0x11ab   :  { %6387 = vsyncmov [#allocation8 + $0x2] }
0x11ae   :  { %s6388_s30 = vpop.sfrf %6387 }
0x11af   :  { %p6678_p6 = scmp.ne.s32.totalorder %s6388_s30, 0 }
0x11b1   :  { %6392 = shalt.err (%p6678_p6)  }
0x11b2   :  { %6394 = vsyncmov [#allocation8 + $0x3] }
0x11b5   :  { %s6395_s13 = vpop.sfrf %6394 }
0x11b6   :  { %p6679_p7 = scmp.ne.s32.totalorder %s6395_s13, 0 }
0x11b8   :  { %6399 = shalt.err (%p6679_p7)  }
0x11b9   :  { %6401 = vsyncmov [#allocation8 + $0x4] }
0x11bc   :  { %s6402_s12 = vpop.sfrf %6401 }
0x11bd   :  { %p6680_p8 = scmp.ne.s32.totalorder %s6402_s12, 0 }
0x11bf   :  { %6406 = shalt.err (%p6680_p8)  }
0x11c0   :  { %6408 = vsyncmov [#allocation8 + $0x5] }
0x11c3   :  { %s6409_s14 = vpop.sfrf %6408 }
0x11c4   :  { %p6681_p9 = scmp.ne.s32.totalorder %s6409_s14, 0 }
0x11c6   :  { %6413 = shalt.err (%p6681_p9)  }

</bundles_post_ra>
